<compile_context>
chip_gen: v7x
topology: tpu7x:2x2x1
jax: 0.10.0
libtpu: 0.0.40
codegen_flags: <defaults>
</compile_context>

<pallas_src>
import functools

import jax
import jax.numpy as jnp
from jax import lax
from jax.experimental import pallas as pl
from jax.experimental.pallas import tpu as pltpu


# ------------------------------ fused kernel ------------------------------

def _drb_kernel(x_ref,                                   # (1, C0, (H+2)*(W+2)) pre-padded input
                dw0, dw1, dw2, dw3,                       # dense 3x3 weights, (9*G, cin_i)
                wf,                                       # 1x1 fusion weight, (C0, Ctot)
                rw1, rw2,                                 # RCAB 3x3 weights, (9*C0, C0)
                cw1, cw2,                                 # channel-attention FCs, (CR,C0)/(C0,CR)
                bias_ref,                                 # all biases packed, (80, 1)
                o_ref,                                    # (1, C0, H*(W+2))
                feats, fus_pad, t_pad,                    # channel-major padded VMEM scratch
                *, H, W, C0, G, slope):
    f32 = jnp.float32
    WP = W + 2
    PAD = (H + 2) * WP               # flat padded area per channel
    INNER = H * WP                   # computed slab: padded rows 1..H, all padded columns
    FRONT = 1                        # 1-element guard so the (-1,-1) tap slice stays in bounds
    lo = FRONT + WP                  # buffer index of padded (row=1, col=0)
    hi = lo + INNER

    # --- per-step init: zero only the border strips (front guard + padded row 0, and padded
    #     row H+1 + back guard).  Interior rows are fully overwritten below. ---
    z_lo = FRONT + WP
    z_hi = FRONT + (H + 1) * WP
    for buf in (feats, fus_pad, t_pad):
        c, l = buf.shape
        buf[:, :z_lo] = jnp.zeros((c, z_lo), f32)
        buf[:, z_hi:] = jnp.zeros((c, l - z_hi), f32)

    # Interior-column mask over the computed slab (zero at padded columns 0 and W+1).  Hoisted.
    col = jax.lax.broadcasted_iota(jnp.int32, (1, INNER), 1) % WP
    inside = jnp.logical_and(col >= 1, col <= W)
    maskf = inside.astype(f32)

    # Input channels: the wrapper already zero-padded H and W, so this is a straight copy.
    feats[:C0, FRONT:FRONT + PAD] = x_ref[0].astype(f32)

    def bias_col(off, n):
        return bias_ref[off:off + n, :].astype(f32)                     # (n, 1)

    def conv3x3(src, cin, w_ref, bcol, leaky):
        # 9 accumulated tap matmuls; each slab is a static lane slice (offsets are compile-time).
        cout = w_ref.shape[0] // 9
        acc = None
        t = 0
        for dy in (-1, 0, 1):
            for dx in (-1, 0, 1):
                s = lo + dy * WP + dx
                slab = src[:cin, s:s + INNER].astype(f32)               # (cin, INNER)
                wt = w_ref[t * cout:(t + 1) * cout, :].astype(f32)      # (cout, cin)
                y = jnp.dot(wt, slab, preferred_element_type=f32)
                acc = y if acc is None else acc + y
                t += 1
        acc = acc + bcol
        if leaky:
            acc = jnp.where(acc >= 0, acc, acc * slope)
        return acc                                                      # (cout, INNER)

    # ---- dense block: layer i reads channels [0, cin) and appends G new sublane rows ----
    boff = 0
    for i, dw in enumerate((dw0, dw1, dw2, dw3)):
        cin = C0 + i * G
        y = conv3x3(feats, cin, dw, bias_col(boff, G), leaky=True)
        feats[cin:cin + G, lo:hi] = y * maskf                           # 8-aligned channel append
        boff += G

    # ---- 1x1 fusion over all concatenated channels ----
    fl = feats[:, lo:hi]                                                # (Ctot, INNER)
    fus = jnp.dot(wf[...].astype(f32), fl, preferred_element_type=f32) + bias_col(boff, C0)
    boff += C0
    fus_m = fus * maskf
    fus_pad[:, lo:hi] = fus_m

    # ---- RCAB body: conv3x3 -> LeakyReLU(0.2) -> conv3x3 ----
    t1 = conv3x3(fus_pad, C0, rw1, bias_col(boff, C0), leaky=True)
    boff += C0
    t_pad[:, lo:hi] = t1 * maskf
    body = conv3x3(t_pad, C0, rw2, bias_col(boff, C0), leaky=False)     # (C0, INNER)

    # ---- channel attention: sigmoid(fc(avgpool) + fc(maxpool)), no biases, ReLU hidden ----
    body_m = body * maskf
    avg = jnp.sum(body_m, axis=1, keepdims=True) * (1.0 / (H * W))      # (C0, 1)
    mx = jnp.max(jnp.where(inside, body, jnp.finfo(f32).min),
                 axis=1, keepdims=True)                                 # (C0, 1)
    w1v = cw1[...].astype(f32)
    w2v = cw2[...].astype(f32)

    def fc(v):
        h = jnp.maximum(jnp.dot(w1v, v, preferred_element_type=f32), 0.0)
        return jnp.dot(w2v, h, preferred_element_type=f32)

    scale = jax.nn.sigmoid(fc(avg) + fc(mx))                            # (C0, 1)

    # out = x + fusion + body * scale (RCAB residual + outer residual).  Padded border columns
    # are zero here and are sliced away by the wrapper.
    out = feats[:C0, lo:hi] + fus_m + body_m * scale
    o_ref[0] = out.astype(o_ref.dtype)


# ------------------------------ wrapper ------------------------------

def dense_residual_block(x, p):
    """x: (N, C, H, W) NCHW, matching the PyTorch module. Returns (N, C, H, W)."""
    N, C0, H, W = x.shape
    G = p["layer0_w"].shape[0]
    Ctot = C0 + 4 * G
    CR = p["ca_w1"].shape[0]
    WP = W + 2
    PAD = (H + 2) * WP
    INNER = H * WP
    L = 1 + PAD + 1                                      # 1-element guards at both ends

    def tapmajor(w):                                     # OIHW (cout,cin,3,3) -> (9*cout, cin)
        cout, cin = w.shape[0], w.shape[1]
        return jnp.transpose(w, (2, 3, 0, 1)).reshape(9 * cout, cin)

    # Lane-dense, channel-major kernel input: pre-pad H/W with zeros, flatten the spatial dims.
    x_pad = jnp.pad(x, ((0, 0), (0, 0), (1, 1), (1, 1))).reshape(N, C0, PAD)

    biases = jnp.concatenate([p["layer0_b"], p["layer1_b"], p["layer2_b"], p["layer3_b"],
                              p["fusion_b"], p["rcab_b1"], p["rcab_b2"]]).reshape(-1, 1)

    weights = [tapmajor(p[f"layer{i}_w"]) for i in range(4)]
    weights += [p["fusion_w"].reshape(C0, Ctot),
                tapmajor(p["rcab_w1"]), tapmajor(p["rcab_w2"]),
                p["ca_w1"].reshape(CR, C0), p["ca_w2"].reshape(C0, CR),
                biases]

    def const_spec(a):                                   # full block, constant index map
        nd = a.ndim
        return pl.BlockSpec(a.shape, lambda n, _nd=nd: (0,) * _nd)

    in_specs = [pl.BlockSpec((1, C0, PAD), lambda n: (n, 0, 0))]
    in_specs += [const_spec(a) for a in weights]

    kern = functools.partial(_drb_kernel, H=H, W=W, C0=C0, G=G, slope=0.2)
    out = pl.pallas_call(
        kern,
        out_shape=jax.ShapeDtypeStruct((N, C0, INNER), x.dtype),
        grid_spec=pltpu.PrefetchScalarGridSpec(
            num_scalar_prefetch=0,
            grid=(N,),
            in_specs=in_specs,
            out_specs=pl.BlockSpec((1, C0, INNER), lambda n: (n, 0, 0)),
            scratch_shapes=[
                pltpu.VMEM((Ctot, L), jnp.float32),      # dense-concat features (channel-major)
                pltpu.VMEM((C0, L), jnp.float32),        # fusion output (padded)
                pltpu.VMEM((C0, L), jnp.float32),        # RCAB intermediate (padded)
            ],
        ),
        compiler_params=pltpu.CompilerParams(dimension_semantics=("parallel",)),
    )(x_pad, *weights)

    # Strip the padded columns (wrapper-side layout plumbing).
    return out.reshape(N, C0, H, WP)[:, :, :, 1:W + 1]


# --------------------------- pure-JAX reference ---------------------------

def _conv_ref(x, w, b, pad):
    out = lax.conv_general_dilated(
        x, w, (1, 1), padding=[(pad, pad), (pad, pad)],
        dimension_numbers=("NCHW", "OIHW", "NCHW"))
    if b is not None:
        out = out + b.reshape(1, -1, 1, 1)
    return out


def _leaky(v, s=0.2):
    return jnp.where(v >= 0, v, v * s)


def reference(x, p):
    feats = x
    for i in range(4):
        y = _leaky(_conv_ref(feats, p[f"layer{i}_w"], p[f"layer{i}_b"], 1))
        feats = jnp.concatenate([feats, y], axis=1)
    fusion = _conv_ref(feats, p["fusion_w"], p["fusion_b"], 0)
    t = _leaky(_conv_ref(fusion, p["rcab_w1"], p["rcab_b1"], 1))
    body = _conv_ref(t, p["rcab_w2"], p["rcab_b2"], 1)
    avg = jnp.mean(body, axis=(2, 3), keepdims=True)
    mx = jnp.max(body, axis=(2, 3), keepdims=True)

    def fc(v):
        h = jnp.maximum(_conv_ref(v, p["ca_w1"], None, 0), 0.0)
        return _conv_ref(h, p["ca_w2"], None, 0)

    scale = jax.nn.sigmoid(fc(avg) + fc(mx))
    return x + fusion + body * scale


# --------------------------------- main ---------------------------------

if __name__ == "__main__":
    n_filters, growth, reduction = 16, 8, 16
    N, H, W = 2, 16, 16

    key = jax.random.PRNGKey(0)
    keys = iter(jax.random.split(key, 32))
    p = {}
    for i in range(4):
        cin = n_filters + i * growth
        p[f"layer{i}_w"] = 0.1 * jax.random.normal(next(keys), (growth, cin, 3, 3), jnp.float32)
        p[f"layer{i}_b"] = 0.1 * jax.random.normal(next(keys), (growth,), jnp.float32)
    ctot = n_filters + 4 * growth
    p["fusion_w"] = 0.1 * jax.random.normal(next(keys), (n_filters, ctot, 1, 1), jnp.float32)
    p["fusion_b"] = 0.1 * jax.random.normal(next(keys), (n_filters,), jnp.float32)
    p["rcab_w1"] = 0.1 * jax.random.normal(next(keys), (n_filters, n_filters, 3, 3), jnp.float32)
    p["rcab_b1"] = 0.1 * jax.random.normal(next(keys), (n_filters,), jnp.float32)
    p["rcab_w2"] = 0.1 * jax.random.normal(next(keys), (n_filters, n_filters, 3, 3), jnp.float32)
    p["rcab_b2"] = 0.1 * jax.random.normal(next(keys), (n_filters,), jnp.float32)
    cr = n_filters // reduction                          # = 1
    p["ca_w1"] = 0.1 * jax.random.normal(next(keys), (cr, n_filters, 1, 1), jnp.float32)
    p["ca_w2"] = 0.1 * jax.random.normal(next(keys), (n_filters, cr, 1, 1), jnp.float32)

    x = jax.random.normal(next(keys), (N, n_filters, H, W), jnp.float32)

    out = jax.block_until_ready(dense_residual_block(x, p))
    ref = jax.block_until_ready(reference(x, p))

    assert out.shape == (N, n_filters, H, W), out.shape
    err = float(jnp.max(jnp.abs(out - ref)))
    assert err < 1e-3, f"mismatch vs pure-JAX reference: max abs err {err}"
    print("KERNEL_OK")
</pallas_src>

<mosaic_0001>
module attributes {stable_mosaic.version = 11 : i64} {
  func.func @_drb_kernel(%arg0: i32, %arg1: memref<1x16x324xf32, #tpu.memory_space<vmem>>, %arg2: memref<72x16xf32, #tpu.memory_space<vmem>>, %arg3: memref<72x24xf32, #tpu.memory_space<vmem>>, %arg4: memref<72x32xf32, #tpu.memory_space<vmem>>, %arg5: memref<72x40xf32, #tpu.memory_space<vmem>>, %arg6: memref<16x48xf32, #tpu.memory_space<vmem>>, %arg7: memref<144x16xf32, #tpu.memory_space<vmem>>, %arg8: memref<144x16xf32, #tpu.memory_space<vmem>>, %arg9: memref<1x16xf32, #tpu.memory_space<vmem>>, %arg10: memref<16x1xf32, #tpu.memory_space<vmem>>, %arg11: memref<80x1xf32, #tpu.memory_space<vmem>>, %arg12: memref<1x16x288xf32, #tpu.memory_space<vmem>>, %arg13: memref<48x326xf32, #tpu.memory_space<vmem>>, %arg14: memref<16x326xf32, #tpu.memory_space<vmem>>, %arg15: memref<16x326xf32, #tpu.memory_space<vmem>>) attributes {dimension_semantics = [#tpu.dimension_semantics<parallel>], iteration_bounds = array<i64: 2>, scalar_prefetch = 0 : i64, scratch_operands = 3 : i64, tpu.core_type = #tpu.core_type<tc>, window_params = [{transform_indices = @transform_0, window_bounds = array<i64: 1, 16, 324>}, {pipeline_mode = #tpu.pipeline_mode<synchronous>, transform_indices = @transform_1, window_bounds = array<i64: 72, 16>}, {pipeline_mode = #tpu.pipeline_mode<synchronous>, transform_indices = @transform_2, window_bounds = array<i64: 72, 24>}, {pipeline_mode = #tpu.pipeline_mode<synchronous>, transform_indices = @transform_3, window_bounds = array<i64: 72, 32>}, {pipeline_mode = #tpu.pipeline_mode<synchronous>, transform_indices = @transform_4, window_bounds = array<i64: 72, 40>}, {pipeline_mode = #tpu.pipeline_mode<synchronous>, transform_indices = @transform_5, window_bounds = array<i64: 16, 48>}, {pipeline_mode = #tpu.pipeline_mode<synchronous>, transform_indices = @transform_6, window_bounds = array<i64: 144, 16>}, {pipeline_mode = #tpu.pipeline_mode<synchronous>, transform_indices = @transform_7, window_bounds = array<i64: 144, 16>}, {pipeline_mode = #tpu.pipeline_mode<synchronous>, transform_indices = @transform_8, window_bounds = array<i64: 1, 16>}, {pipeline_mode = #tpu.pipeline_mode<synchronous>, transform_indices = @transform_9, window_bounds = array<i64: 16, 1>}, {pipeline_mode = #tpu.pipeline_mode<synchronous>, transform_indices = @transform_10, window_bounds = array<i64: 80, 1>}, {transform_indices = @transform_11, window_bounds = array<i64: 1, 16, 288>}]} {
    %cst = arith.constant 0.000000e+00 : f32
    %0 = vector.broadcast %cst : f32 to vector<48x19xf32>
    %c0 = arith.constant 0 : index
    %c0_0 = arith.constant 0 : index
    %1 = vector.load %arg13[%c0, %c0_0] : memref<48x326xf32, #tpu.memory_space<vmem>>, vector<48x19xf32>
    tpu.vector_store %arg13[%c0, %c0_0], %0 {strides = array<i32>} : memref<48x326xf32, #tpu.memory_space<vmem>>, vector<48x19xf32>,
    %cst_1 = arith.constant 0.000000e+00 : f32
    %2 = vector.broadcast %cst_1 : f32 to vector<48x19xf32>
    %c0_2 = arith.constant 0 : index
    %c307 = arith.constant 307 : index
    %3 = vector.load %arg13[%c0_2, %c307] : memref<48x326xf32, #tpu.memory_space<vmem>>, vector<48x19xf32>
    tpu.vector_store %arg13[%c0_2, %c307], %2 {strides = array<i32>} : memref<48x326xf32, #tpu.memory_space<vmem>>, vector<48x19xf32>,
    %cst_3 = arith.constant 0.000000e+00 : f32
    %4 = vector.broadcast %cst_3 : f32 to vector<16x19xf32>
    %c0_4 = arith.constant 0 : index
    %c0_5 = arith.constant 0 : index
    %5 = vector.load %arg14[%c0_4, %c0_5] : memref<16x326xf32, #tpu.memory_space<vmem>>, vector<16x19xf32>
    tpu.vector_store %arg14[%c0_4, %c0_5], %4 {strides = array<i32>} : memref<16x326xf32, #tpu.memory_space<vmem>>, vector<16x19xf32>,
    %cst_6 = arith.constant 0.000000e+00 : f32
    %6 = vector.broadcast %cst_6 : f32 to vector<16x19xf32>
    %c0_7 = arith.constant 0 : index
    %c307_8 = arith.constant 307 : index
    %7 = vector.load %arg14[%c0_7, %c307_8] : memref<16x326xf32, #tpu.memory_space<vmem>>, vector<16x19xf32>
    tpu.vector_store %arg14[%c0_7, %c307_8], %6 {strides = array<i32>} : memref<16x326xf32, #tpu.memory_space<vmem>>, vector<16x19xf32>,
    %cst_9 = arith.constant 0.000000e+00 : f32
    %8 = vector.broadcast %cst_9 : f32 to vector<16x19xf32>
    %c0_10 = arith.constant 0 : index
    %c0_11 = arith.constant 0 : index
    %9 = vector.load %arg15[%c0_10, %c0_11] : memref<16x326xf32, #tpu.memory_space<vmem>>, vector<16x19xf32>
    tpu.vector_store %arg15[%c0_10, %c0_11], %8 {strides = array<i32>} : memref<16x326xf32, #tpu.memory_space<vmem>>, vector<16x19xf32>,
    %cst_12 = arith.constant 0.000000e+00 : f32
    %10 = vector.broadcast %cst_12 : f32 to vector<16x19xf32>
    %c0_13 = arith.constant 0 : index
    %c307_14 = arith.constant 307 : index
    %11 = vector.load %arg15[%c0_13, %c307_14] : memref<16x326xf32, #tpu.memory_space<vmem>>, vector<16x19xf32>
    tpu.vector_store %arg15[%c0_13, %c307_14], %10 {strides = array<i32>} : memref<16x326xf32, #tpu.memory_space<vmem>>, vector<16x19xf32>,
    %12 = tpu.iota {dimensions = array<i32: 1>} : vector<1x288xi32>
    %c18_i32 = arith.constant 18 : i32
    %c0_i32 = arith.constant 0 : i32
    %13 = arith.cmpi eq, %c18_i32, %c0_i32 : i32
    %c1_i32 = arith.constant 1 : i32
    %14 = arith.select %13, %c1_i32, %c18_i32 : i32
    %15 = vector.broadcast %14 : i32 to vector<1x288xi32>
    %16 = arith.remsi %12, %15 : vector<1x288xi32>
    %c0_i32_15 = arith.constant 0 : i32
    %17 = vector.broadcast %c0_i32_15 : i32 to vector<1x288xi32>
    %18 = arith.cmpi ne, %16, %17 : vector<1x288xi32>
    %c0_i32_16 = arith.constant 0 : i32
    %19 = vector.broadcast %c0_i32_16 : i32 to vector<1x288xi32>
    %20 = arith.cmpi slt, %16, %19 : vector<1x288xi32>
    %c0_i32_17 = arith.constant 0 : i32
    %21 = arith.cmpi slt, %14, %c0_i32_17 : i32
    %22 = vector.broadcast %21 : i1 to vector<1x288xi1>
    %23 = vector.broadcast %22 : vector<1x288xi1> to vector<1x288xi1>
    %24 = arith.xori %20, %23 : vector<1x288xi1>
    %25 = arith.andi %24, %18 : vector<1x288xi1>
    %26 = vector.broadcast %14 : i32 to vector<1x288xi32>
    %27 = arith.addi %16, %26 : vector<1x288xi32>
    %28 = arith.select %25, %27, %16 : vector<1x288xi1>, vector<1x288xi32>
    %c1_i32_18 = arith.constant 1 : i32
    %29 = vector.broadcast %c1_i32_18 : i32 to vector<1x288xi32>
    %30 = arith.cmpi sge, %28, %29 : vector<1x288xi32>
    %c16_i32 = arith.constant 16 : i32
    %31 = vector.broadcast %c16_i32 : i32 to vector<1x288xi32>
    %32 = arith.cmpi sle, %28, %31 : vector<1x288xi32>
    %33 = arith.andi %30, %32 : vector<1x288xi1>
    %34 = arith.extui %33 : vector<1x288xi1> to vector<1x288xi32>
    %35 = arith.sitofp %34 : vector<1x288xi32> to vector<1x288xf32>
    %c0_19 = arith.constant 0 : index
    %c0_20 = arith.constant 0 : index
    %c0_21 = arith.constant 0 : index
    %36 = vector.load %arg1[%c0_19, %c0_20, %c0_21] : memref<1x16x324xf32, #tpu.memory_space<vmem>>, vector<1x16x324xf32>
    %37 = vector.shape_cast %36 : vector<1x16x324xf32> to vector<16x324xf32>
    %c0_22 = arith.constant 0 : index
    %c1 = arith.constant 1 : index
    %38 = vector.load %arg13[%c0_22, %c1] : memref<48x326xf32, #tpu.memory_space<vmem>>, vector<16x324xf32>
    tpu.vector_store %arg13[%c0_22, %c1], %37 {strides = array<i32>} : memref<48x326xf32, #tpu.memory_space<vmem>>, vector<16x324xf32>,
    %c0_23 = arith.constant 0 : index
    %c0_24 = arith.constant 0 : index
    %39 = vector.load %arg11[%c0_23, %c0_24] : memref<80x1xf32, #tpu.memory_space<vmem>>, vector<8x1xf32>
    %c0_25 = arith.constant 0 : index
    %c0_26 = arith.constant 0 : index
    %40 = vector.load %arg13[%c0_25, %c0_26] : memref<48x326xf32, #tpu.memory_space<vmem>>, vector<16x288xf32>
    %c0_27 = arith.constant 0 : index
    %c0_28 = arith.constant 0 : index
    %41 = vector.load %arg2[%c0_27, %c0_28] : memref<72x16xf32, #tpu.memory_space<vmem>>, vector<8x16xf32>
    %cst_29 = arith.constant dense<0.000000e+00> : vector<8x288xf32>
    %42 = tpu.matmul %41, %40, %cst_29 {dimension_numbers = #tpu.dot_dimension_numbers<[1], [0], [0], [1], [0, 0, 1, 1], [], []>} : vector<8x16xf32>, vector<16x288xf32>, vector<8x288xf32> -> vector<8x288xf32>
    %c0_30 = arith.constant 0 : index
    %c1_31 = arith.constant 1 : index
    %43 = vector.load %arg13[%c0_30, %c1_31] : memref<48x326xf32, #tpu.memory_space<vmem>>, vector<16x288xf32>
    %c8 = arith.constant 8 : index
    %c0_32 = arith.constant 0 : index
    %44 = vector.load %arg2[%c8, %c0_32] : memref<72x16xf32, #tpu.memory_space<vmem>>, vector<8x16xf32>
    %cst_33 = arith.constant dense<0.000000e+00> : vector<8x288xf32>
    %45 = tpu.matmul %44, %43, %cst_33 {dimension_numbers = #tpu.dot_dimension_numbers<[1], [0], [0], [1], [0, 0, 1, 1], [], []>} : vector<8x16xf32>, vector<16x288xf32>, vector<8x288xf32> -> vector<8x288xf32>
    %46 = arith.addf %42, %45 : vector<8x288xf32>
    %c0_34 = arith.constant 0 : index
    %c2 = arith.constant 2 : index
    %47 = vector.load %arg13[%c0_34, %c2] : memref<48x326xf32, #tpu.memory_space<vmem>>, vector<16x288xf32>
    %c16 = arith.constant 16 : index
    %c0_35 = arith.constant 0 : index
    %48 = vector.load %arg2[%c16, %c0_35] : memref<72x16xf32, #tpu.memory_space<vmem>>, vector<8x16xf32>
    %cst_36 = arith.constant dense<0.000000e+00> : vector<8x288xf32>
    %49 = tpu.matmul %48, %47, %cst_36 {dimension_numbers = #tpu.dot_dimension_numbers<[1], [0], [0], [1], [0, 0, 1, 1], [], []>} : vector<8x16xf32>, vector<16x288xf32>, vector<8x288xf32> -> vector<8x288xf32>
    %50 = arith.addf %46, %49 : vector<8x288xf32>
    %c0_37 = arith.constant 0 : index
    %c18 = arith.constant 18 : index
    %51 = vector.load %arg13[%c0_37, %c18] : memref<48x326xf32, #tpu.memory_space<vmem>>, vector<16x288xf32>
    %c24 = arith.constant 24 : index
    %c0_38 = arith.constant 0 : index
    %52 = vector.load %arg2[%c24, %c0_38] : memref<72x16xf32, #tpu.memory_space<vmem>>, vector<8x16xf32>
    %cst_39 = arith.constant dense<0.000000e+00> : vector<8x288xf32>
    %53 = tpu.matmul %52, %51, %cst_39 {dimension_numbers = #tpu.dot_dimension_numbers<[1], [0], [0], [1], [0, 0, 1, 1], [], []>} : vector<8x16xf32>, vector<16x288xf32>, vector<8x288xf32> -> vector<8x288xf32>
    %54 = arith.addf %50, %53 : vector<8x288xf32>
    %c0_40 = arith.constant 0 : index
    %c19 = arith.constant 19 : index
    %55 = vector.load %arg13[%c0_40, %c19] : memref<48x326xf32, #tpu.memory_space<vmem>>, vector<16x288xf32>
    %c32 = arith.constant 32 : index
    %c0_41 = arith.constant 0 : index
    %56 = vector.load %arg2[%c32, %c0_41] : memref<72x16xf32, #tpu.memory_space<vmem>>, vector<8x16xf32>
    %cst_42 = arith.constant dense<0.000000e+00> : vector<8x288xf32>
    %57 = tpu.matmul %56, %55, %cst_42 {dimension_numbers = #tpu.dot_dimension_numbers<[1], [0], [0], [1], [0, 0, 1, 1], [], []>} : vector<8x16xf32>, vector<16x288xf32>, vector<8x288xf32> -> vector<8x288xf32>
    %58 = arith.addf %54, %57 : vector<8x288xf32>
    %c0_43 = arith.constant 0 : index
    %c20 = arith.constant 20 : index
    %59 = vector.load %arg13[%c0_43, %c20] : memref<48x326xf32, #tpu.memory_space<vmem>>, vector<16x288xf32>
    %c40 = arith.constant 40 : index
    %c0_44 = arith.constant 0 : index
    %60 = vector.load %arg2[%c40, %c0_44] : memref<72x16xf32, #tpu.memory_space<vmem>>, vector<8x16xf32>
    %cst_45 = arith.constant dense<0.000000e+00> : vector<8x288xf32>
    %61 = tpu.matmul %60, %59, %cst_45 {dimension_numbers = #tpu.dot_dimension_numbers<[1], [0], [0], [1], [0, 0, 1, 1], [], []>} : vector<8x16xf32>, vector<16x288xf32>, vector<8x288xf32> -> vector<8x288xf32>
    %62 = arith.addf %58, %61 : vector<8x288xf32>
    %c0_46 = arith.constant 0 : index
    %c36 = arith.constant 36 : index
    %63 = vector.load %arg13[%c0_46, %c36] : memref<48x326xf32, #tpu.memory_space<vmem>>, vector<16x288xf32>
    %c48 = arith.constant 48 : index
    %c0_47 = arith.constant 0 : index
    %64 = vector.load %arg2[%c48, %c0_47] : memref<72x16xf32, #tpu.memory_space<vmem>>, vector<8x16xf32>
    %cst_48 = arith.constant dense<0.000000e+00> : vector<8x288xf32>
    %65 = tpu.matmul %64, %63, %cst_48 {dimension_numbers = #tpu.dot_dimension_numbers<[1], [0], [0], [1], [0, 0, 1, 1], [], []>} : vector<8x16xf32>, vector<16x288xf32>, vector<8x288xf32> -> vector<8x288xf32>
    %66 = arith.addf %62, %65 : vector<8x288xf32>
    %c0_49 = arith.constant 0 : index
    %c37 = arith.constant 37 : index
    %67 = vector.load %arg13[%c0_49, %c37] : memref<48x326xf32, #tpu.memory_space<vmem>>, vector<16x288xf32>
    %c56 = arith.constant 56 : index
    %c0_50 = arith.constant 0 : index
    %68 = vector.load %arg2[%c56, %c0_50] : memref<72x16xf32, #tpu.memory_space<vmem>>, vector<8x16xf32>
    %cst_51 = arith.constant dense<0.000000e+00> : vector<8x288xf32>
    %69 = tpu.matmul %68, %67, %cst_51 {dimension_numbers = #tpu.dot_dimension_numbers<[1], [0], [0], [1], [0, 0, 1, 1], [], []>} : vector<8x16xf32>, vector<16x288xf32>, vector<8x288xf32> -> vector<8x288xf32>
    %70 = arith.addf %66, %69 : vector<8x288xf32>
    %c0_52 = arith.constant 0 : index
    %c38 = arith.constant 38 : index
    %71 = vector.load %arg13[%c0_52, %c38] : memref<48x326xf32, #tpu.memory_space<vmem>>, vector<16x288xf32>
    %c64 = arith.constant 64 : index
    %c0_53 = arith.constant 0 : index
    %72 = vector.load %arg2[%c64, %c0_53] : memref<72x16xf32, #tpu.memory_space<vmem>>, vector<8x16xf32>
    %cst_54 = arith.constant dense<0.000000e+00> : vector<8x288xf32>
    %73 = tpu.matmul %72, %71, %cst_54 {dimension_numbers = #tpu.dot_dimension_numbers<[1], [0], [0], [1], [0, 0, 1, 1], [], []>} : vector<8x16xf32>, vector<16x288xf32>, vector<8x288xf32> -> vector<8x288xf32>
    %74 = arith.addf %70, %73 : vector<8x288xf32>
    %75 = vector.broadcast %39 : vector<8x1xf32> to vector<8x288xf32>
    %76 = arith.addf %74, %75 : vector<8x288xf32>
    %cst_55 = arith.constant 0.000000e+00 : f32
    %77 = vector.broadcast %cst_55 : f32 to vector<8x288xf32>
    %78 = arith.cmpf oge, %76, %77 : vector<8x288xf32>
    %cst_56 = arith.constant 2.000000e-01 : f32
    %79 = vector.broadcast %cst_56 : f32 to vector<8x288xf32>
    %80 = arith.mulf %76, %79 : vector<8x288xf32>
    %81 = arith.select %78, %76, %80 : vector<8x288xi1>, vector<8x288xf32>
    %82 = vector.broadcast %35 : vector<1x288xf32> to vector<8x288xf32>
    %83 = arith.mulf %81, %82 : vector<8x288xf32>
    %c16_57 = arith.constant 16 : index
    %c19_58 = arith.constant 19 : index
    %84 = vector.load %arg13[%c16_57, %c19_58] : memref<48x326xf32, #tpu.memory_space<vmem>>, vector<8x288xf32>
    tpu.vector_store %arg13[%c16_57, %c19_58], %83 {strides = array<i32>} : memref<48x326xf32, #tpu.memory_space<vmem>>, vector<8x288xf32>,
    %c8_59 = arith.constant 8 : index
    %c0_60 = arith.constant 0 : index
    %85 = vector.load %arg11[%c8_59, %c0_60] : memref<80x1xf32, #tpu.memory_space<vmem>>, vector<8x1xf32>
    %c0_61 = arith.constant 0 : index
    %c0_62 = arith.constant 0 : index
    %86 = vector.load %arg13[%c0_61, %c0_62] : memref<48x326xf32, #tpu.memory_space<vmem>>, vector<24x288xf32>
    %c0_63 = arith.constant 0 : index
    %c0_64 = arith.constant 0 : index
    %87 = vector.load %arg3[%c0_63, %c0_64] : memref<72x24xf32, #tpu.memory_space<vmem>>, vector<8x24xf32>
    %cst_65 = arith.constant dense<0.000000e+00> : vector<8x288xf32>
    %88 = tpu.matmul %87, %86, %cst_65 {dimension_numbers = #tpu.dot_dimension_numbers<[1], [0], [0], [1], [0, 0, 1, 1], [], []>} : vector<8x24xf32>, vector<24x288xf32>, vector<8x288xf32> -> vector<8x288xf32>
    %c0_66 = arith.constant 0 : index
    %c1_67 = arith.constant 1 : index
    %89 = vector.load %arg13[%c0_66, %c1_67] : memref<48x326xf32, #tpu.memory_space<vmem>>, vector<24x288xf32>
    %c8_68 = arith.constant 8 : index
    %c0_69 = arith.constant 0 : index
    %90 = vector.load %arg3[%c8_68, %c0_69] : memref<72x24xf32, #tpu.memory_space<vmem>>, vector<8x24xf32>
    %cst_70 = arith.constant dense<0.000000e+00> : vector<8x288xf32>
    %91 = tpu.matmul %90, %89, %cst_70 {dimension_numbers = #tpu.dot_dimension_numbers<[1], [0], [0], [1], [0, 0, 1, 1], [], []>} : vector<8x24xf32>, vector<24x288xf32>, vector<8x288xf32> -> vector<8x288xf32>
    %92 = arith.addf %88, %91 : vector<8x288xf32>
    %c0_71 = arith.constant 0 : index
    %c2_72 = arith.constant 2 : index
    %93 = vector.load %arg13[%c0_71, %c2_72] : memref<48x326xf32, #tpu.memory_space<vmem>>, vector<24x288xf32>
    %c16_73 = arith.constant 16 : index
    %c0_74 = arith.constant 0 : index
    %94 = vector.load %arg3[%c16_73, %c0_74] : memref<72x24xf32, #tpu.memory_space<vmem>>, vector<8x24xf32>
    %cst_75 = arith.constant dense<0.000000e+00> : vector<8x288xf32>
    %95 = tpu.matmul %94, %93, %cst_75 {dimension_numbers = #tpu.dot_dimension_numbers<[1], [0], [0], [1], [0, 0, 1, 1], [], []>} : vector<8x24xf32>, vector<24x288xf32>, vector<8x288xf32> -> vector<8x288xf32>
    %96 = arith.addf %92, %95 : vector<8x288xf32>
    %c0_76 = arith.constant 0 : index
    %c18_77 = arith.constant 18 : index
    %97 = vector.load %arg13[%c0_76, %c18_77] : memref<48x326xf32, #tpu.memory_space<vmem>>, vector<24x288xf32>
    %c24_78 = arith.constant 24 : index
    %c0_79 = arith.constant 0 : index
    %98 = vector.load %arg3[%c24_78, %c0_79] : memref<72x24xf32, #tpu.memory_space<vmem>>, vector<8x24xf32>
    %cst_80 = arith.constant dense<0.000000e+00> : vector<8x288xf32>
    %99 = tpu.matmul %98, %97, %cst_80 {dimension_numbers = #tpu.dot_dimension_numbers<[1], [0], [0], [1], [0, 0, 1, 1], [], []>} : vector<8x24xf32>, vector<24x288xf32>, vector<8x288xf32> -> vector<8x288xf32>
    %100 = arith.addf %96, %99 : vector<8x288xf32>
    %c0_81 = arith.constant 0 : index
    %c19_82 = arith.constant 19 : index
    %101 = vector.load %arg13[%c0_81, %c19_82] : memref<48x326xf32, #tpu.memory_space<vmem>>, vector<24x288xf32>
    %c32_83 = arith.constant 32 : index
    %c0_84 = arith.constant 0 : index
    %102 = vector.load %arg3[%c32_83, %c0_84] : memref<72x24xf32, #tpu.memory_space<vmem>>, vector<8x24xf32>
    %cst_85 = arith.constant dense<0.000000e+00> : vector<8x288xf32>
    %103 = tpu.matmul %102, %101, %cst_85 {dimension_numbers = #tpu.dot_dimension_numbers<[1], [0], [0], [1], [0, 0, 1, 1], [], []>} : vector<8x24xf32>, vector<24x288xf32>, vector<8x288xf32> -> vector<8x288xf32>
    %104 = arith.addf %100, %103 : vector<8x288xf32>
    %c0_86 = arith.constant 0 : index
    %c20_87 = arith.constant 20 : index
    %105 = vector.load %arg13[%c0_86, %c20_87] : memref<48x326xf32, #tpu.memory_space<vmem>>, vector<24x288xf32>
    %c40_88 = arith.constant 40 : index
    %c0_89 = arith.constant 0 : index
    %106 = vector.load %arg3[%c40_88, %c0_89] : memref<72x24xf32, #tpu.memory_space<vmem>>, vector<8x24xf32>
    %cst_90 = arith.constant dense<0.000000e+00> : vector<8x288xf32>
    %107 = tpu.matmul %106, %105, %cst_90 {dimension_numbers = #tpu.dot_dimension_numbers<[1], [0], [0], [1], [0, 0, 1, 1], [], []>} : vector<8x24xf32>, vector<24x288xf32>, vector<8x288xf32> -> vector<8x288xf32>
    %108 = arith.addf %104, %107 : vector<8x288xf32>
    %c0_91 = arith.constant 0 : index
    %c36_92 = arith.constant 36 : index
    %109 = vector.load %arg13[%c0_91, %c36_92] : memref<48x326xf32, #tpu.memory_space<vmem>>, vector<24x288xf32>
    %c48_93 = arith.constant 48 : index
    %c0_94 = arith.constant 0 : index
    %110 = vector.load %arg3[%c48_93, %c0_94] : memref<72x24xf32, #tpu.memory_space<vmem>>, vector<8x24xf32>
    %cst_95 = arith.constant dense<0.000000e+00> : vector<8x288xf32>
    %111 = tpu.matmul %110, %109, %cst_95 {dimension_numbers = #tpu.dot_dimension_numbers<[1], [0], [0], [1], [0, 0, 1, 1], [], []>} : vector<8x24xf32>, vector<24x288xf32>, vector<8x288xf32> -> vector<8x288xf32>
    %112 = arith.addf %108, %111 : vector<8x288xf32>
    %c0_96 = arith.constant 0 : index
    %c37_97 = arith.constant 37 : index
    %113 = vector.load %arg13[%c0_96, %c37_97] : memref<48x326xf32, #tpu.memory_space<vmem>>, vector<24x288xf32>
    %c56_98 = arith.constant 56 : index
    %c0_99 = arith.constant 0 : index
    %114 = vector.load %arg3[%c56_98, %c0_99] : memref<72x24xf32, #tpu.memory_space<vmem>>, vector<8x24xf32>
    %cst_100 = arith.constant dense<0.000000e+00> : vector<8x288xf32>
    %115 = tpu.matmul %114, %113, %cst_100 {dimension_numbers = #tpu.dot_dimension_numbers<[1], [0], [0], [1], [0, 0, 1, 1], [], []>} : vector<8x24xf32>, vector<24x288xf32>, vector<8x288xf32> -> vector<8x288xf32>
    %116 = arith.addf %112, %115 : vector<8x288xf32>
    %c0_101 = arith.constant 0 : index
    %c38_102 = arith.constant 38 : index
    %117 = vector.load %arg13[%c0_101, %c38_102] : memref<48x326xf32, #tpu.memory_space<vmem>>, vector<24x288xf32>
    %c64_103 = arith.constant 64 : index
    %c0_104 = arith.constant 0 : index
    %118 = vector.load %arg3[%c64_103, %c0_104] : memref<72x24xf32, #tpu.memory_space<vmem>>, vector<8x24xf32>
    %cst_105 = arith.constant dense<0.000000e+00> : vector<8x288xf32>
    %119 = tpu.matmul %118, %117, %cst_105 {dimension_numbers = #tpu.dot_dimension_numbers<[1], [0], [0], [1], [0, 0, 1, 1], [], []>} : vector<8x24xf32>, vector<24x288xf32>, vector<8x288xf32> -> vector<8x288xf32>
    %120 = arith.addf %116, %119 : vector<8x288xf32>
    %121 = vector.broadcast %85 : vector<8x1xf32> to vector<8x288xf32>
    %122 = arith.addf %120, %121 : vector<8x288xf32>
    %cst_106 = arith.constant 0.000000e+00 : f32
    %123 = vector.broadcast %cst_106 : f32 to vector<8x288xf32>
    %124 = arith.cmpf oge, %122, %123 : vector<8x288xf32>
    %cst_107 = arith.constant 2.000000e-01 : f32
    %125 = vector.broadcast %cst_107 : f32 to vector<8x288xf32>
    %126 = arith.mulf %122, %125 : vector<8x288xf32>
    %127 = arith.select %124, %122, %126 : vector<8x288xi1>, vector<8x288xf32>
    %128 = vector.broadcast %35 : vector<1x288xf32> to vector<8x288xf32>
    %129 = arith.mulf %127, %128 : vector<8x288xf32>
    %c24_108 = arith.constant 24 : index
    %c19_109 = arith.constant 19 : index
    %130 = vector.load %arg13[%c24_108, %c19_109] : memref<48x326xf32, #tpu.memory_space<vmem>>, vector<8x288xf32>
    tpu.vector_store %arg13[%c24_108, %c19_109], %129 {strides = array<i32>} : memref<48x326xf32, #tpu.memory_space<vmem>>, vector<8x288xf32>,
    %c16_110 = arith.constant 16 : index
    %c0_111 = arith.constant 0 : index
    %131 = vector.load %arg11[%c16_110, %c0_111] : memref<80x1xf32, #tpu.memory_space<vmem>>, vector<8x1xf32>
    %c0_112 = arith.constant 0 : index
    %c0_113 = arith.constant 0 : index
    %132 = vector.load %arg13[%c0_112, %c0_113] : memref<48x326xf32, #tpu.memory_space<vmem>>, vector<32x288xf32>
    %c0_114 = arith.constant 0 : index
    %c0_115 = arith.constant 0 : index
    %133 = vector.load %arg4[%c0_114, %c0_115] : memref<72x32xf32, #tpu.memory_space<vmem>>, vector<8x32xf32>
    %cst_116 = arith.constant dense<0.000000e+00> : vector<8x288xf32>
    %134 = tpu.matmul %133, %132, %cst_116 {dimension_numbers = #tpu.dot_dimension_numbers<[1], [0], [0], [1], [0, 0, 1, 1], [], []>} : vector<8x32xf32>, vector<32x288xf32>, vector<8x288xf32> -> vector<8x288xf32>
    %c0_117 = arith.constant 0 : index
    %c1_118 = arith.constant 1 : index
    %135 = vector.load %arg13[%c0_117, %c1_118] : memref<48x326xf32, #tpu.memory_space<vmem>>, vector<32x288xf32>
    %c8_119 = arith.constant 8 : index
    %c0_120 = arith.constant 0 : index
    %136 = vector.load %arg4[%c8_119, %c0_120] : memref<72x32xf32, #tpu.memory_space<vmem>>, vector<8x32xf32>
    %cst_121 = arith.constant dense<0.000000e+00> : vector<8x288xf32>
    %137 = tpu.matmul %136, %135, %cst_121 {dimension_numbers = #tpu.dot_dimension_numbers<[1], [0], [0], [1], [0, 0, 1, 1], [], []>} : vector<8x32xf32>, vector<32x288xf32>, vector<8x288xf32> -> vector<8x288xf32>
    %138 = arith.addf %134, %137 : vector<8x288xf32>
    %c0_122 = arith.constant 0 : index
    %c2_123 = arith.constant 2 : index
    %139 = vector.load %arg13[%c0_122, %c2_123] : memref<48x326xf32, #tpu.memory_space<vmem>>, vector<32x288xf32>
    %c16_124 = arith.constant 16 : index
    %c0_125 = arith.constant 0 : index
    %140 = vector.load %arg4[%c16_124, %c0_125] : memref<72x32xf32, #tpu.memory_space<vmem>>, vector<8x32xf32>
    %cst_126 = arith.constant dense<0.000000e+00> : vector<8x288xf32>
    %141 = tpu.matmul %140, %139, %cst_126 {dimension_numbers = #tpu.dot_dimension_numbers<[1], [0], [0], [1], [0, 0, 1, 1], [], []>} : vector<8x32xf32>, vector<32x288xf32>, vector<8x288xf32> -> vector<8x288xf32>
    %142 = arith.addf %138, %141 : vector<8x288xf32>
    %c0_127 = arith.constant 0 : index
    %c18_128 = arith.constant 18 : index
    %143 = vector.load %arg13[%c0_127, %c18_128] : memref<48x326xf32, #tpu.memory_space<vmem>>, vector<32x288xf32>
    %c24_129 = arith.constant 24 : index
    %c0_130 = arith.constant 0 : index
    %144 = vector.load %arg4[%c24_129, %c0_130] : memref<72x32xf32, #tpu.memory_space<vmem>>, vector<8x32xf32>
    %cst_131 = arith.constant dense<0.000000e+00> : vector<8x288xf32>
    %145 = tpu.matmul %144, %143, %cst_131 {dimension_numbers = #tpu.dot_dimension_numbers<[1], [0], [0], [1], [0, 0, 1, 1], [], []>} : vector<8x32xf32>, vector<32x288xf32>, vector<8x288xf32> -> vector<8x288xf32>
    %146 = arith.addf %142, %145 : vector<8x288xf32>
    %c0_132 = arith.constant 0 : index
    %c19_133 = arith.constant 19 : index
    %147 = vector.load %arg13[%c0_132, %c19_133] : memref<48x326xf32, #tpu.memory_space<vmem>>, vector<32x288xf32>
    %c32_134 = arith.constant 32 : index
    %c0_135 = arith.constant 0 : index
    %148 = vector.load %arg4[%c32_134, %c0_135] : memref<72x32xf32, #tpu.memory_space<vmem>>, vector<8x32xf32>
    %cst_136 = arith.constant dense<0.000000e+00> : vector<8x288xf32>
    %149 = tpu.matmul %148, %147, %cst_136 {dimension_numbers = #tpu.dot_dimension_numbers<[1], [0], [0], [1], [0, 0, 1, 1], [], []>} : vector<8x32xf32>, vector<32x288xf32>, vector<8x288xf32> -> vector<8x288xf32>
    %150 = arith.addf %146, %149 : vector<8x288xf32>
    %c0_137 = arith.constant 0 : index
    %c20_138 = arith.constant 20 : index
    %151 = vector.load %arg13[%c0_137, %c20_138] : memref<48x326xf32, #tpu.memory_space<vmem>>, vector<32x288xf32>
    %c40_139 = arith.constant 40 : index
    %c0_140 = arith.constant 0 : index
    %152 = vector.load %arg4[%c40_139, %c0_140] : memref<72x32xf32, #tpu.memory_space<vmem>>, vector<8x32xf32>
    %cst_141 = arith.constant dense<0.000000e+00> : vector<8x288xf32>
    %153 = tpu.matmul %152, %151, %cst_141 {dimension_numbers = #tpu.dot_dimension_numbers<[1], [0], [0], [1], [0, 0, 1, 1], [], []>} : vector<8x32xf32>, vector<32x288xf32>, vector<8x288xf32> -> vector<8x288xf32>
    %154 = arith.addf %150, %153 : vector<8x288xf32>
    %c0_142 = arith.constant 0 : index
    %c36_143 = arith.constant 36 : index
    %155 = vector.load %arg13[%c0_142, %c36_143] : memref<48x326xf32, #tpu.memory_space<vmem>>, vector<32x288xf32>
    %c48_144 = arith.constant 48 : index
    %c0_145 = arith.constant 0 : index
    %156 = vector.load %arg4[%c48_144, %c0_145] : memref<72x32xf32, #tpu.memory_space<vmem>>, vector<8x32xf32>
    %cst_146 = arith.constant dense<0.000000e+00> : vector<8x288xf32>
    %157 = tpu.matmul %156, %155, %cst_146 {dimension_numbers = #tpu.dot_dimension_numbers<[1], [0], [0], [1], [0, 0, 1, 1], [], []>} : vector<8x32xf32>, vector<32x288xf32>, vector<8x288xf32> -> vector<8x288xf32>
    %158 = arith.addf %154, %157 : vector<8x288xf32>
    %c0_147 = arith.constant 0 : index
    %c37_148 = arith.constant 37 : index
    %159 = vector.load %arg13[%c0_147, %c37_148] : memref<48x326xf32, #tpu.memory_space<vmem>>, vector<32x288xf32>
    %c56_149 = arith.constant 56 : index
    %c0_150 = arith.constant 0 : index
    %160 = vector.load %arg4[%c56_149, %c0_150] : memref<72x32xf32, #tpu.memory_space<vmem>>, vector<8x32xf32>
    %cst_151 = arith.constant dense<0.000000e+00> : vector<8x288xf32>
    %161 = tpu.matmul %160, %159, %cst_151 {dimension_numbers = #tpu.dot_dimension_numbers<[1], [0], [0], [1], [0, 0, 1, 1], [], []>} : vector<8x32xf32>, vector<32x288xf32>, vector<8x288xf32> -> vector<8x288xf32>
    %162 = arith.addf %158, %161 : vector<8x288xf32>
    %c0_152 = arith.constant 0 : index
    %c38_153 = arith.constant 38 : index
    %163 = vector.load %arg13[%c0_152, %c38_153] : memref<48x326xf32, #tpu.memory_space<vmem>>, vector<32x288xf32>
    %c64_154 = arith.constant 64 : index
    %c0_155 = arith.constant 0 : index
    %164 = vector.load %arg4[%c64_154, %c0_155] : memref<72x32xf32, #tpu.memory_space<vmem>>, vector<8x32xf32>
    %cst_156 = arith.constant dense<0.000000e+00> : vector<8x288xf32>
    %165 = tpu.matmul %164, %163, %cst_156 {dimension_numbers = #tpu.dot_dimension_numbers<[1], [0], [0], [1], [0, 0, 1, 1], [], []>} : vector<8x32xf32>, vector<32x288xf32>, vector<8x288xf32> -> vector<8x288xf32>
    %166 = arith.addf %162, %165 : vector<8x288xf32>
    %167 = vector.broadcast %131 : vector<8x1xf32> to vector<8x288xf32>
    %168 = arith.addf %166, %167 : vector<8x288xf32>
    %cst_157 = arith.constant 0.000000e+00 : f32
    %169 = vector.broadcast %cst_157 : f32 to vector<8x288xf32>
    %170 = arith.cmpf oge, %168, %169 : vector<8x288xf32>
    %cst_158 = arith.constant 2.000000e-01 : f32
    %171 = vector.broadcast %cst_158 : f32 to vector<8x288xf32>
    %172 = arith.mulf %168, %171 : vector<8x288xf32>
    %173 = arith.select %170, %168, %172 : vector<8x288xi1>, vector<8x288xf32>
    %174 = vector.broadcast %35 : vector<1x288xf32> to vector<8x288xf32>
    %175 = arith.mulf %173, %174 : vector<8x288xf32>
    %c32_159 = arith.constant 32 : index
    %c19_160 = arith.constant 19 : index
    %176 = vector.load %arg13[%c32_159, %c19_160] : memref<48x326xf32, #tpu.memory_space<vmem>>, vector<8x288xf32>
    tpu.vector_store %arg13[%c32_159, %c19_160], %175 {strides = array<i32>} : memref<48x326xf32, #tpu.memory_space<vmem>>, vector<8x288xf32>,
    %c24_161 = arith.constant 24 : index
    %c0_162 = arith.constant 0 : index
    %177 = vector.load %arg11[%c24_161, %c0_162] : memref<80x1xf32, #tpu.memory_space<vmem>>, vector<8x1xf32>
    %c0_163 = arith.constant 0 : index
    %c0_164 = arith.constant 0 : index
    %178 = vector.load %arg13[%c0_163, %c0_164] : memref<48x326xf32, #tpu.memory_space<vmem>>, vector<40x288xf32>
    %c0_165 = arith.constant 0 : index
    %c0_166 = arith.constant 0 : index
    %179 = vector.load %arg5[%c0_165, %c0_166] : memref<72x40xf32, #tpu.memory_space<vmem>>, vector<8x40xf32>
    %cst_167 = arith.constant dense<0.000000e+00> : vector<8x288xf32>
    %180 = tpu.matmul %179, %178, %cst_167 {dimension_numbers = #tpu.dot_dimension_numbers<[1], [0], [0], [1], [0, 0, 1, 1], [], []>} : vector<8x40xf32>, vector<40x288xf32>, vector<8x288xf32> -> vector<8x288xf32>
    %c0_168 = arith.constant 0 : index
    %c1_169 = arith.constant 1 : index
    %181 = vector.load %arg13[%c0_168, %c1_169] : memref<48x326xf32, #tpu.memory_space<vmem>>, vector<40x288xf32>
    %c8_170 = arith.constant 8 : index
    %c0_171 = arith.constant 0 : index
    %182 = vector.load %arg5[%c8_170, %c0_171] : memref<72x40xf32, #tpu.memory_space<vmem>>, vector<8x40xf32>
    %cst_172 = arith.constant dense<0.000000e+00> : vector<8x288xf32>
    %183 = tpu.matmul %182, %181, %cst_172 {dimension_numbers = #tpu.dot_dimension_numbers<[1], [0], [0], [1], [0, 0, 1, 1], [], []>} : vector<8x40xf32>, vector<40x288xf32>, vector<8x288xf32> -> vector<8x288xf32>
    %184 = arith.addf %180, %183 : vector<8x288xf32>
    %c0_173 = arith.constant 0 : index
    %c2_174 = arith.constant 2 : index
    %185 = vector.load %arg13[%c0_173, %c2_174] : memref<48x326xf32, #tpu.memory_space<vmem>>, vector<40x288xf32>
    %c16_175 = arith.constant 16 : index
    %c0_176 = arith.constant 0 : index
    %186 = vector.load %arg5[%c16_175, %c0_176] : memref<72x40xf32, #tpu.memory_space<vmem>>, vector<8x40xf32>
    %cst_177 = arith.constant dense<0.000000e+00> : vector<8x288xf32>
    %187 = tpu.matmul %186, %185, %cst_177 {dimension_numbers = #tpu.dot_dimension_numbers<[1], [0], [0], [1], [0, 0, 1, 1], [], []>} : vector<8x40xf32>, vector<40x288xf32>, vector<8x288xf32> -> vector<8x288xf32>
    %188 = arith.addf %184, %187 : vector<8x288xf32>
    %c0_178 = arith.constant 0 : index
    %c18_179 = arith.constant 18 : index
    %189 = vector.load %arg13[%c0_178, %c18_179] : memref<48x326xf32, #tpu.memory_space<vmem>>, vector<40x288xf32>
    %c24_180 = arith.constant 24 : index
    %c0_181 = arith.constant 0 : index
    %190 = vector.load %arg5[%c24_180, %c0_181] : memref<72x40xf32, #tpu.memory_space<vmem>>, vector<8x40xf32>
    %cst_182 = arith.constant dense<0.000000e+00> : vector<8x288xf32>
    %191 = tpu.matmul %190, %189, %cst_182 {dimension_numbers = #tpu.dot_dimension_numbers<[1], [0], [0], [1], [0, 0, 1, 1], [], []>} : vector<8x40xf32>, vector<40x288xf32>, vector<8x288xf32> -> vector<8x288xf32>
    %192 = arith.addf %188, %191 : vector<8x288xf32>
    %c0_183 = arith.constant 0 : index
    %c19_184 = arith.constant 19 : index
    %193 = vector.load %arg13[%c0_183, %c19_184] : memref<48x326xf32, #tpu.memory_space<vmem>>, vector<40x288xf32>
    %c32_185 = arith.constant 32 : index
    %c0_186 = arith.constant 0 : index
    %194 = vector.load %arg5[%c32_185, %c0_186] : memref<72x40xf32, #tpu.memory_space<vmem>>, vector<8x40xf32>
    %cst_187 = arith.constant dense<0.000000e+00> : vector<8x288xf32>
    %195 = tpu.matmul %194, %193, %cst_187 {dimension_numbers = #tpu.dot_dimension_numbers<[1], [0], [0], [1], [0, 0, 1, 1], [], []>} : vector<8x40xf32>, vector<40x288xf32>, vector<8x288xf32> -> vector<8x288xf32>
    %196 = arith.addf %192, %195 : vector<8x288xf32>
    %c0_188 = arith.constant 0 : index
    %c20_189 = arith.constant 20 : index
    %197 = vector.load %arg13[%c0_188, %c20_189] : memref<48x326xf32, #tpu.memory_space<vmem>>, vector<40x288xf32>
    %c40_190 = arith.constant 40 : index
    %c0_191 = arith.constant 0 : index
    %198 = vector.load %arg5[%c40_190, %c0_191] : memref<72x40xf32, #tpu.memory_space<vmem>>, vector<8x40xf32>
    %cst_192 = arith.constant dense<0.000000e+00> : vector<8x288xf32>
    %199 = tpu.matmul %198, %197, %cst_192 {dimension_numbers = #tpu.dot_dimension_numbers<[1], [0], [0], [1], [0, 0, 1, 1], [], []>} : vector<8x40xf32>, vector<40x288xf32>, vector<8x288xf32> -> vector<8x288xf32>
    %200 = arith.addf %196, %199 : vector<8x288xf32>
    %c0_193 = arith.constant 0 : index
    %c36_194 = arith.constant 36 : index
    %201 = vector.load %arg13[%c0_193, %c36_194] : memref<48x326xf32, #tpu.memory_space<vmem>>, vector<40x288xf32>
    %c48_195 = arith.constant 48 : index
    %c0_196 = arith.constant 0 : index
    %202 = vector.load %arg5[%c48_195, %c0_196] : memref<72x40xf32, #tpu.memory_space<vmem>>, vector<8x40xf32>
    %cst_197 = arith.constant dense<0.000000e+00> : vector<8x288xf32>
    %203 = tpu.matmul %202, %201, %cst_197 {dimension_numbers = #tpu.dot_dimension_numbers<[1], [0], [0], [1], [0, 0, 1, 1], [], []>} : vector<8x40xf32>, vector<40x288xf32>, vector<8x288xf32> -> vector<8x288xf32>
    %204 = arith.addf %200, %203 : vector<8x288xf32>
    %c0_198 = arith.constant 0 : index
    %c37_199 = arith.constant 37 : index
    %205 = vector.load %arg13[%c0_198, %c37_199] : memref<48x326xf32, #tpu.memory_space<vmem>>, vector<40x288xf32>
    %c56_200 = arith.constant 56 : index
    %c0_201 = arith.constant 0 : index
    %206 = vector.load %arg5[%c56_200, %c0_201] : memref<72x40xf32, #tpu.memory_space<vmem>>, vector<8x40xf32>
    %cst_202 = arith.constant dense<0.000000e+00> : vector<8x288xf32>
    %207 = tpu.matmul %206, %205, %cst_202 {dimension_numbers = #tpu.dot_dimension_numbers<[1], [0], [0], [1], [0, 0, 1, 1], [], []>} : vector<8x40xf32>, vector<40x288xf32>, vector<8x288xf32> -> vector<8x288xf32>
    %208 = arith.addf %204, %207 : vector<8x288xf32>
    %c0_203 = arith.constant 0 : index
    %c38_204 = arith.constant 38 : index
    %209 = vector.load %arg13[%c0_203, %c38_204] : memref<48x326xf32, #tpu.memory_space<vmem>>, vector<40x288xf32>
    %c64_205 = arith.constant 64 : index
    %c0_206 = arith.constant 0 : index
    %210 = vector.load %arg5[%c64_205, %c0_206] : memref<72x40xf32, #tpu.memory_space<vmem>>, vector<8x40xf32>
    %cst_207 = arith.constant dense<0.000000e+00> : vector<8x288xf32>
    %211 = tpu.matmul %210, %209, %cst_207 {dimension_numbers = #tpu.dot_dimension_numbers<[1], [0], [0], [1], [0, 0, 1, 1], [], []>} : vector<8x40xf32>, vector<40x288xf32>, vector<8x288xf32> -> vector<8x288xf32>
    %212 = arith.addf %208, %211 : vector<8x288xf32>
    %213 = vector.broadcast %177 : vector<8x1xf32> to vector<8x288xf32>
    %214 = arith.addf %212, %213 : vector<8x288xf32>
    %cst_208 = arith.constant 0.000000e+00 : f32
    %215 = vector.broadcast %cst_208 : f32 to vector<8x288xf32>
    %216 = arith.cmpf oge, %214, %215 : vector<8x288xf32>
    %cst_209 = arith.constant 2.000000e-01 : f32
    %217 = vector.broadcast %cst_209 : f32 to vector<8x288xf32>
    %218 = arith.mulf %214, %217 : vector<8x288xf32>
    %219 = arith.select %216, %214, %218 : vector<8x288xi1>, vector<8x288xf32>
    %220 = vector.broadcast %35 : vector<1x288xf32> to vector<8x288xf32>
    %221 = arith.mulf %219, %220 : vector<8x288xf32>
    %c40_210 = arith.constant 40 : index
    %c19_211 = arith.constant 19 : index
    %222 = vector.load %arg13[%c40_210, %c19_211] : memref<48x326xf32, #tpu.memory_space<vmem>>, vector<8x288xf32>
    tpu.vector_store %arg13[%c40_210, %c19_211], %221 {strides = array<i32>} : memref<48x326xf32, #tpu.memory_space<vmem>>, vector<8x288xf32>,
    %c0_212 = arith.constant 0 : index
    %c19_213 = arith.constant 19 : index
    %223 = vector.load %arg13[%c0_212, %c19_213] : memref<48x326xf32, #tpu.memory_space<vmem>>, vector<48x288xf32>
    %c0_214 = arith.constant 0 : index
    %c0_215 = arith.constant 0 : index
    %224 = vector.load %arg6[%c0_214, %c0_215] : memref<16x48xf32, #tpu.memory_space<vmem>>, vector<16x48xf32>
    %cst_216 = arith.constant dense<0.000000e+00> : vector<16x288xf32>
    %225 = tpu.matmul %224, %223, %cst_216 {dimension_numbers = #tpu.dot_dimension_numbers<[1], [0], [0], [1], [0, 0, 1, 1], [], []>} : vector<16x48xf32>, vector<48x288xf32>, vector<16x288xf32> -> vector<16x288xf32>
    %c32_217 = arith.constant 32 : index
    %c0_218 = arith.constant 0 : index
    %226 = vector.load %arg11[%c32_217, %c0_218] : memref<80x1xf32, #tpu.memory_space<vmem>>, vector<16x1xf32>
    %227 = vector.broadcast %226 : vector<16x1xf32> to vector<16x288xf32>
    %228 = arith.addf %225, %227 : vector<16x288xf32>
    %229 = vector.broadcast %35 : vector<1x288xf32> to vector<16x288xf32>
    %230 = arith.mulf %228, %229 : vector<16x288xf32>
    %c0_219 = arith.constant 0 : index
    %c19_220 = arith.constant 19 : index
    %231 = vector.load %arg14[%c0_219, %c19_220] : memref<16x326xf32, #tpu.memory_space<vmem>>, vector<16x288xf32>
    tpu.vector_store %arg14[%c0_219, %c19_220], %230 {strides = array<i32>} : memref<16x326xf32, #tpu.memory_space<vmem>>, vector<16x288xf32>,
    %c48_221 = arith.constant 48 : index
    %c0_222 = arith.constant 0 : index
    %232 = vector.load %arg11[%c48_221, %c0_222] : memref<80x1xf32, #tpu.memory_space<vmem>>, vector<16x1xf32>
    %c0_223 = arith.constant 0 : index
    %c0_224 = arith.constant 0 : index
    %233 = vector.load %arg14[%c0_223, %c0_224] : memref<16x326xf32, #tpu.memory_space<vmem>>, vector<16x288xf32>
    %c0_225 = arith.constant 0 : index
    %c0_226 = arith.constant 0 : index
    %234 = vector.load %arg7[%c0_225, %c0_226] : memref<144x16xf32, #tpu.memory_space<vmem>>, vector<16x16xf32>
    %cst_227 = arith.constant dense<0.000000e+00> : vector<16x288xf32>
    %235 = tpu.matmul %234, %233, %cst_227 {dimension_numbers = #tpu.dot_dimension_numbers<[1], [0], [0], [1], [0, 0, 1, 1], [], []>} : vector<16x16xf32>, vector<16x288xf32>, vector<16x288xf32> -> vector<16x288xf32>
    %c0_228 = arith.constant 0 : index
    %c1_229 = arith.constant 1 : index
    %236 = vector.load %arg14[%c0_228, %c1_229] : memref<16x326xf32, #tpu.memory_space<vmem>>, vector<16x288xf32>
    %c16_230 = arith.constant 16 : index
    %c0_231 = arith.constant 0 : index
    %237 = vector.load %arg7[%c16_230, %c0_231] : memref<144x16xf32, #tpu.memory_space<vmem>>, vector<16x16xf32>
    %cst_232 = arith.constant dense<0.000000e+00> : vector<16x288xf32>
    %238 = tpu.matmul %237, %236, %cst_232 {dimension_numbers = #tpu.dot_dimension_numbers<[1], [0], [0], [1], [0, 0, 1, 1], [], []>} : vector<16x16xf32>, vector<16x288xf32>, vector<16x288xf32> -> vector<16x288xf32>
    %239 = arith.addf %235, %238 : vector<16x288xf32>
    %c0_233 = arith.constant 0 : index
    %c2_234 = arith.constant 2 : index
    %240 = vector.load %arg14[%c0_233, %c2_234] : memref<16x326xf32, #tpu.memory_space<vmem>>, vector<16x288xf32>
    %c32_235 = arith.constant 32 : index
    %c0_236 = arith.constant 0 : index
    %241 = vector.load %arg7[%c32_235, %c0_236] : memref<144x16xf32, #tpu.memory_space<vmem>>, vector<16x16xf32>
    %cst_237 = arith.constant dense<0.000000e+00> : vector<16x288xf32>
    %242 = tpu.matmul %241, %240, %cst_237 {dimension_numbers = #tpu.dot_dimension_numbers<[1], [0], [0], [1], [0, 0, 1, 1], [], []>} : vector<16x16xf32>, vector<16x288xf32>, vector<16x288xf32> -> vector<16x288xf32>
    %243 = arith.addf %239, %242 : vector<16x288xf32>
    %c0_238 = arith.constant 0 : index
    %c18_239 = arith.constant 18 : index
    %244 = vector.load %arg14[%c0_238, %c18_239] : memref<16x326xf32, #tpu.memory_space<vmem>>, vector<16x288xf32>
    %c48_240 = arith.constant 48 : index
    %c0_241 = arith.constant 0 : index
    %245 = vector.load %arg7[%c48_240, %c0_241] : memref<144x16xf32, #tpu.memory_space<vmem>>, vector<16x16xf32>
    %cst_242 = arith.constant dense<0.000000e+00> : vector<16x288xf32>
    %246 = tpu.matmul %245, %244, %cst_242 {dimension_numbers = #tpu.dot_dimension_numbers<[1], [0], [0], [1], [0, 0, 1, 1], [], []>} : vector<16x16xf32>, vector<16x288xf32>, vector<16x288xf32> -> vector<16x288xf32>
    %247 = arith.addf %243, %246 : vector<16x288xf32>
    %c0_243 = arith.constant 0 : index
    %c19_244 = arith.constant 19 : index
    %248 = vector.load %arg14[%c0_243, %c19_244] : memref<16x326xf32, #tpu.memory_space<vmem>>, vector<16x288xf32>
    %c64_245 = arith.constant 64 : index
    %c0_246 = arith.constant 0 : index
    %249 = vector.load %arg7[%c64_245, %c0_246] : memref<144x16xf32, #tpu.memory_space<vmem>>, vector<16x16xf32>
    %cst_247 = arith.constant dense<0.000000e+00> : vector<16x288xf32>
    %250 = tpu.matmul %249, %248, %cst_247 {dimension_numbers = #tpu.dot_dimension_numbers<[1], [0], [0], [1], [0, 0, 1, 1], [], []>} : vector<16x16xf32>, vector<16x288xf32>, vector<16x288xf32> -> vector<16x288xf32>
    %251 = arith.addf %247, %250 : vector<16x288xf32>
    %c0_248 = arith.constant 0 : index
    %c20_249 = arith.constant 20 : index
    %252 = vector.load %arg14[%c0_248, %c20_249] : memref<16x326xf32, #tpu.memory_space<vmem>>, vector<16x288xf32>
    %c80 = arith.constant 80 : index
    %c0_250 = arith.constant 0 : index
    %253 = vector.load %arg7[%c80, %c0_250] : memref<144x16xf32, #tpu.memory_space<vmem>>, vector<16x16xf32>
    %cst_251 = arith.constant dense<0.000000e+00> : vector<16x288xf32>
    %254 = tpu.matmul %253, %252, %cst_251 {dimension_numbers = #tpu.dot_dimension_numbers<[1], [0], [0], [1], [0, 0, 1, 1], [], []>} : vector<16x16xf32>, vector<16x288xf32>, vector<16x288xf32> -> vector<16x288xf32>
    %255 = arith.addf %251, %254 : vector<16x288xf32>
    %c0_252 = arith.constant 0 : index
    %c36_253 = arith.constant 36 : index
    %256 = vector.load %arg14[%c0_252, %c36_253] : memref<16x326xf32, #tpu.memory_space<vmem>>, vector<16x288xf32>
    %c96 = arith.constant 96 : index
    %c0_254 = arith.constant 0 : index
    %257 = vector.load %arg7[%c96, %c0_254] : memref<144x16xf32, #tpu.memory_space<vmem>>, vector<16x16xf32>
    %cst_255 = arith.constant dense<0.000000e+00> : vector<16x288xf32>
    %258 = tpu.matmul %257, %256, %cst_255 {dimension_numbers = #tpu.dot_dimension_numbers<[1], [0], [0], [1], [0, 0, 1, 1], [], []>} : vector<16x16xf32>, vector<16x288xf32>, vector<16x288xf32> -> vector<16x288xf32>
    %259 = arith.addf %255, %258 : vector<16x288xf32>
    %c0_256 = arith.constant 0 : index
    %c37_257 = arith.constant 37 : index
    %260 = vector.load %arg14[%c0_256, %c37_257] : memref<16x326xf32, #tpu.memory_space<vmem>>, vector<16x288xf32>
    %c112 = arith.constant 112 : index
    %c0_258 = arith.constant 0 : index
    %261 = vector.load %arg7[%c112, %c0_258] : memref<144x16xf32, #tpu.memory_space<vmem>>, vector<16x16xf32>
    %cst_259 = arith.constant dense<0.000000e+00> : vector<16x288xf32>
    %262 = tpu.matmul %261, %260, %cst_259 {dimension_numbers = #tpu.dot_dimension_numbers<[1], [0], [0], [1], [0, 0, 1, 1], [], []>} : vector<16x16xf32>, vector<16x288xf32>, vector<16x288xf32> -> vector<16x288xf32>
    %263 = arith.addf %259, %262 : vector<16x288xf32>
    %c0_260 = arith.constant 0 : index
    %c38_261 = arith.constant 38 : index
    %264 = vector.load %arg14[%c0_260, %c38_261] : memref<16x326xf32, #tpu.memory_space<vmem>>, vector<16x288xf32>
    %c128 = arith.constant 128 : index
    %c0_262 = arith.constant 0 : index
    %265 = vector.load %arg7[%c128, %c0_262] : memref<144x16xf32, #tpu.memory_space<vmem>>, vector<16x16xf32>
    %cst_263 = arith.constant dense<0.000000e+00> : vector<16x288xf32>
    %266 = tpu.matmul %265, %264, %cst_263 {dimension_numbers = #tpu.dot_dimension_numbers<[1], [0], [0], [1], [0, 0, 1, 1], [], []>} : vector<16x16xf32>, vector<16x288xf32>, vector<16x288xf32> -> vector<16x288xf32>
    %267 = arith.addf %263, %266 : vector<16x288xf32>
    %268 = vector.broadcast %232 : vector<16x1xf32> to vector<16x288xf32>
    %269 = arith.addf %267, %268 : vector<16x288xf32>
    %cst_264 = arith.constant 0.000000e+00 : f32
    %270 = vector.broadcast %cst_264 : f32 to vector<16x288xf32>
    %271 = arith.cmpf oge, %269, %270 : vector<16x288xf32>
    %cst_265 = arith.constant 2.000000e-01 : f32
    %272 = vector.broadcast %cst_265 : f32 to vector<16x288xf32>
    %273 = arith.mulf %269, %272 : vector<16x288xf32>
    %274 = arith.select %271, %269, %273 : vector<16x288xi1>, vector<16x288xf32>
    %275 = vector.broadcast %35 : vector<1x288xf32> to vector<16x288xf32>
    %276 = arith.mulf %274, %275 : vector<16x288xf32>
    %c0_266 = arith.constant 0 : index
    %c19_267 = arith.constant 19 : index
    %277 = vector.load %arg15[%c0_266, %c19_267] : memref<16x326xf32, #tpu.memory_space<vmem>>, vector<16x288xf32>
    tpu.vector_store %arg15[%c0_266, %c19_267], %276 {strides = array<i32>} : memref<16x326xf32, #tpu.memory_space<vmem>>, vector<16x288xf32>,
    %c64_268 = arith.constant 64 : index
    %c0_269 = arith.constant 0 : index
    %278 = vector.load %arg11[%c64_268, %c0_269] : memref<80x1xf32, #tpu.memory_space<vmem>>, vector<16x1xf32>
    %c0_270 = arith.constant 0 : index
    %c0_271 = arith.constant 0 : index
    %279 = vector.load %arg15[%c0_270, %c0_271] : memref<16x326xf32, #tpu.memory_space<vmem>>, vector<16x288xf32>
    %c0_272 = arith.constant 0 : index
    %c0_273 = arith.constant 0 : index
    %280 = vector.load %arg8[%c0_272, %c0_273] : memref<144x16xf32, #tpu.memory_space<vmem>>, vector<16x16xf32>
    %cst_274 = arith.constant dense<0.000000e+00> : vector<16x288xf32>
    %281 = tpu.matmul %280, %279, %cst_274 {dimension_numbers = #tpu.dot_dimension_numbers<[1], [0], [0], [1], [0, 0, 1, 1], [], []>} : vector<16x16xf32>, vector<16x288xf32>, vector<16x288xf32> -> vector<16x288xf32>
    %c0_275 = arith.constant 0 : index
    %c1_276 = arith.constant 1 : index
    %282 = vector.load %arg15[%c0_275, %c1_276] : memref<16x326xf32, #tpu.memory_space<vmem>>, vector<16x288xf32>
    %c16_277 = arith.constant 16 : index
    %c0_278 = arith.constant 0 : index
    %283 = vector.load %arg8[%c16_277, %c0_278] : memref<144x16xf32, #tpu.memory_space<vmem>>, vector<16x16xf32>
    %cst_279 = arith.constant dense<0.000000e+00> : vector<16x288xf32>
    %284 = tpu.matmul %283, %282, %cst_279 {dimension_numbers = #tpu.dot_dimension_numbers<[1], [0], [0], [1], [0, 0, 1, 1], [], []>} : vector<16x16xf32>, vector<16x288xf32>, vector<16x288xf32> -> vector<16x288xf32>
    %285 = arith.addf %281, %284 : vector<16x288xf32>
    %c0_280 = arith.constant 0 : index
    %c2_281 = arith.constant 2 : index
    %286 = vector.load %arg15[%c0_280, %c2_281] : memref<16x326xf32, #tpu.memory_space<vmem>>, vector<16x288xf32>
    %c32_282 = arith.constant 32 : index
    %c0_283 = arith.constant 0 : index
    %287 = vector.load %arg8[%c32_282, %c0_283] : memref<144x16xf32, #tpu.memory_space<vmem>>, vector<16x16xf32>
    %cst_284 = arith.constant dense<0.000000e+00> : vector<16x288xf32>
    %288 = tpu.matmul %287, %286, %cst_284 {dimension_numbers = #tpu.dot_dimension_numbers<[1], [0], [0], [1], [0, 0, 1, 1], [], []>} : vector<16x16xf32>, vector<16x288xf32>, vector<16x288xf32> -> vector<16x288xf32>
    %289 = arith.addf %285, %288 : vector<16x288xf32>
    %c0_285 = arith.constant 0 : index
    %c18_286 = arith.constant 18 : index
    %290 = vector.load %arg15[%c0_285, %c18_286] : memref<16x326xf32, #tpu.memory_space<vmem>>, vector<16x288xf32>
    %c48_287 = arith.constant 48 : index
    %c0_288 = arith.constant 0 : index
    %291 = vector.load %arg8[%c48_287, %c0_288] : memref<144x16xf32, #tpu.memory_space<vmem>>, vector<16x16xf32>
    %cst_289 = arith.constant dense<0.000000e+00> : vector<16x288xf32>
    %292 = tpu.matmul %291, %290, %cst_289 {dimension_numbers = #tpu.dot_dimension_numbers<[1], [0], [0], [1], [0, 0, 1, 1], [], []>} : vector<16x16xf32>, vector<16x288xf32>, vector<16x288xf32> -> vector<16x288xf32>
    %293 = arith.addf %289, %292 : vector<16x288xf32>
    %c0_290 = arith.constant 0 : index
    %c19_291 = arith.constant 19 : index
    %294 = vector.load %arg15[%c0_290, %c19_291] : memref<16x326xf32, #tpu.memory_space<vmem>>, vector<16x288xf32>
    %c64_292 = arith.constant 64 : index
    %c0_293 = arith.constant 0 : index
    %295 = vector.load %arg8[%c64_292, %c0_293] : memref<144x16xf32, #tpu.memory_space<vmem>>, vector<16x16xf32>
    %cst_294 = arith.constant dense<0.000000e+00> : vector<16x288xf32>
    %296 = tpu.matmul %295, %294, %cst_294 {dimension_numbers = #tpu.dot_dimension_numbers<[1], [0], [0], [1], [0, 0, 1, 1], [], []>} : vector<16x16xf32>, vector<16x288xf32>, vector<16x288xf32> -> vector<16x288xf32>
    %297 = arith.addf %293, %296 : vector<16x288xf32>
    %c0_295 = arith.constant 0 : index
    %c20_296 = arith.constant 20 : index
    %298 = vector.load %arg15[%c0_295, %c20_296] : memref<16x326xf32, #tpu.memory_space<vmem>>, vector<16x288xf32>
    %c80_297 = arith.constant 80 : index
    %c0_298 = arith.constant 0 : index
    %299 = vector.load %arg8[%c80_297, %c0_298] : memref<144x16xf32, #tpu.memory_space<vmem>>, vector<16x16xf32>
    %cst_299 = arith.constant dense<0.000000e+00> : vector<16x288xf32>
    %300 = tpu.matmul %299, %298, %cst_299 {dimension_numbers = #tpu.dot_dimension_numbers<[1], [0], [0], [1], [0, 0, 1, 1], [], []>} : vector<16x16xf32>, vector<16x288xf32>, vector<16x288xf32> -> vector<16x288xf32>
    %301 = arith.addf %297, %300 : vector<16x288xf32>
    %c0_300 = arith.constant 0 : index
    %c36_301 = arith.constant 36 : index
    %302 = vector.load %arg15[%c0_300, %c36_301] : memref<16x326xf32, #tpu.memory_space<vmem>>, vector<16x288xf32>
    %c96_302 = arith.constant 96 : index
    %c0_303 = arith.constant 0 : index
    %303 = vector.load %arg8[%c96_302, %c0_303] : memref<144x16xf32, #tpu.memory_space<vmem>>, vector<16x16xf32>
    %cst_304 = arith.constant dense<0.000000e+00> : vector<16x288xf32>
    %304 = tpu.matmul %303, %302, %cst_304 {dimension_numbers = #tpu.dot_dimension_numbers<[1], [0], [0], [1], [0, 0, 1, 1], [], []>} : vector<16x16xf32>, vector<16x288xf32>, vector<16x288xf32> -> vector<16x288xf32>
    %305 = arith.addf %301, %304 : vector<16x288xf32>
    %c0_305 = arith.constant 0 : index
    %c37_306 = arith.constant 37 : index
    %306 = vector.load %arg15[%c0_305, %c37_306] : memref<16x326xf32, #tpu.memory_space<vmem>>, vector<16x288xf32>
    %c112_307 = arith.constant 112 : index
    %c0_308 = arith.constant 0 : index
    %307 = vector.load %arg8[%c112_307, %c0_308] : memref<144x16xf32, #tpu.memory_space<vmem>>, vector<16x16xf32>
    %cst_309 = arith.constant dense<0.000000e+00> : vector<16x288xf32>
    %308 = tpu.matmul %307, %306, %cst_309 {dimension_numbers = #tpu.dot_dimension_numbers<[1], [0], [0], [1], [0, 0, 1, 1], [], []>} : vector<16x16xf32>, vector<16x288xf32>, vector<16x288xf32> -> vector<16x288xf32>
    %309 = arith.addf %305, %308 : vector<16x288xf32>
    %c0_310 = arith.constant 0 : index
    %c38_311 = arith.constant 38 : index
    %310 = vector.load %arg15[%c0_310, %c38_311] : memref<16x326xf32, #tpu.memory_space<vmem>>, vector<16x288xf32>
    %c128_312 = arith.constant 128 : index
    %c0_313 = arith.constant 0 : index
    %311 = vector.load %arg8[%c128_312, %c0_313] : memref<144x16xf32, #tpu.memory_space<vmem>>, vector<16x16xf32>
    %cst_314 = arith.constant dense<0.000000e+00> : vector<16x288xf32>
    %312 = tpu.matmul %311, %310, %cst_314 {dimension_numbers = #tpu.dot_dimension_numbers<[1], [0], [0], [1], [0, 0, 1, 1], [], []>} : vector<16x16xf32>, vector<16x288xf32>, vector<16x288xf32> -> vector<16x288xf32>
    %313 = arith.addf %309, %312 : vector<16x288xf32>
    %314 = vector.broadcast %278 : vector<16x1xf32> to vector<16x288xf32>
    %315 = arith.addf %313, %314 : vector<16x288xf32>
    %316 = vector.broadcast %35 : vector<1x288xf32> to vector<16x288xf32>
    %317 = arith.mulf %315, %316 : vector<16x288xf32>
    %cst_315 = arith.constant dense<0.000000e+00> : vector<16xf32>
    %318 = vector.multi_reduction <add>, %317, %cst_315 [1] : vector<16x288xf32> to vector<16xf32>
    %319 = vector.shape_cast %318 : vector<16xf32> to vector<16x1xf32>
    %cst_316 = arith.constant 3.906250e-03 : f32
    %320 = vector.broadcast %cst_316 : f32 to vector<16x1xf32>
    %321 = arith.mulf %319, %320 : vector<16x1xf32>
    %cst_317 = arith.constant -3.40282347E+38 : f32
    %322 = vector.shape_cast %33 : vector<1x288xi1> to vector<1x288xi1>
    %323 = vector.broadcast %322 : vector<1x288xi1> to vector<16x288xi1>
    %324 = vector.broadcast %cst_317 : f32 to vector<16x288xf32>
    %325 = arith.select %323, %315, %324 : vector<16x288xi1>, vector<16x288xf32>
    %cst_318 = arith.constant dense<0xFF800000> : vector<16xf32>
    %326 = vector.multi_reduction <maximumf>, %325, %cst_318 [1] : vector<16x288xf32> to vector<16xf32>
    %327 = vector.shape_cast %326 : vector<16xf32> to vector<16x1xf32>
    %c0_319 = arith.constant 0 : index
    %c0_320 = arith.constant 0 : index
    %328 = vector.load %arg9[%c0_319, %c0_320] : memref<1x16xf32, #tpu.memory_space<vmem>>, vector<1x16xf32>
    %c0_321 = arith.constant 0 : index
    %c0_322 = arith.constant 0 : index
    %329 = vector.load %arg10[%c0_321, %c0_322] : memref<16x1xf32, #tpu.memory_space<vmem>>, vector<16x1xf32>
    %cst_323 = arith.constant dense<0.000000e+00> : vector<1x1xf32>
    %330 = tpu.matmul %328, %321, %cst_323 {dimension_numbers = #tpu.dot_dimension_numbers<[1], [0], [0], [1], [0, 0, 1, 1], [], []>} : vector<1x16xf32>, vector<16x1xf32>, vector<1x1xf32> -> vector<1x1xf32>
    %cst_324 = arith.constant 0.000000e+00 : f32
    %331 = vector.broadcast %cst_324 : f32 to vector<1x1xf32>
    %332 = arith.maximumf %330, %331 : vector<1x1xf32>
    %cst_325 = arith.constant dense<0.000000e+00> : vector<16x1xf32>
    %333 = tpu.matmul %329, %332, %cst_325 {dimension_numbers = #tpu.dot_dimension_numbers<[1], [0], [0], [1], [0, 0, 1, 1], [], []>} : vector<16x1xf32>, vector<1x1xf32>, vector<16x1xf32> -> vector<16x1xf32>
    %cst_326 = arith.constant dense<0.000000e+00> : vector<1x1xf32>
    %334 = tpu.matmul %328, %327, %cst_326 {dimension_numbers = #tpu.dot_dimension_numbers<[1], [0], [0], [1], [0, 0, 1, 1], [], []>} : vector<1x16xf32>, vector<16x1xf32>, vector<1x1xf32> -> vector<1x1xf32>
    %cst_327 = arith.constant 0.000000e+00 : f32
    %335 = vector.broadcast %cst_327 : f32 to vector<1x1xf32>
    %336 = arith.maximumf %334, %335 : vector<1x1xf32>
    %cst_328 = arith.constant dense<0.000000e+00> : vector<16x1xf32>
    %337 = tpu.matmul %329, %336, %cst_328 {dimension_numbers = #tpu.dot_dimension_numbers<[1], [0], [0], [1], [0, 0, 1, 1], [], []>} : vector<16x1xf32>, vector<1x1xf32>, vector<16x1xf32> -> vector<16x1xf32>
    %338 = arith.addf %333, %337 : vector<16x1xf32>
    %339 = arith.negf %338 : vector<16x1xf32>
    %340 = math.exp %339 : vector<16x1xf32>
    %cst_329 = arith.constant 1.000000e+00 : f32
    %341 = vector.broadcast %cst_329 : f32 to vector<16x1xf32>
    %342 = arith.addf %341, %340 : vector<16x1xf32>
    %343 = arith.divf %341, %342 : vector<16x1xf32>
    %c0_330 = arith.constant 0 : index
    %c19_331 = arith.constant 19 : index
    %344 = vector.load %arg13[%c0_330, %c19_331] : memref<48x326xf32, #tpu.memory_space<vmem>>, vector<16x288xf32>
    %345 = arith.addf %344, %230 : vector<16x288xf32>
    %346 = vector.broadcast %343 : vector<16x1xf32> to vector<16x288xf32>
    %347 = arith.mulf %317, %346 : vector<16x288xf32>
    %348 = arith.addf %345, %347 : vector<16x288xf32>
    %c0_332 = arith.constant 0 : index
    %c0_333 = arith.constant 0 : index
    %c0_334 = arith.constant 0 : index
    %349 = vector.load %arg12[%c0_332, %c0_333, %c0_334] : memref<1x16x288xf32, #tpu.memory_space<vmem>>, vector<1x16x288xf32>
    %350 = vector.shape_cast %349 : vector<1x16x288xf32> to vector<16x288xf32>
    %351 = vector.shape_cast %348 : vector<16x288xf32> to vector<1x16x288xf32>
    tpu.vector_store %arg12[%c0_332, %c0_333, %c0_334], %351 {strides = array<i32>} : memref<1x16x288xf32, #tpu.memory_space<vmem>>, vector<1x16x288xf32>,
    return
  }
  func.func @transform_0(%arg0: i32) -> (i32, i32, i32) {
    %c0_i32 = arith.constant 0 : i32
    %c0_i32_0 = arith.constant 0 : i32
    %c0_i32_1 = arith.constant 0 : i32
    return %arg0, %c0_i32, %c0_i32_0 : i32, i32, i32
  }
  func.func @transform_1(%arg0: i32) -> (i32, i32) {
    %c0_i32 = arith.constant 0 : i32
    %c0_i32_0 = arith.constant 0 : i32
    %c0_i32_1 = arith.constant 0 : i32
    return %c0_i32, %c0_i32_0 : i32, i32
  }
  func.func @transform_2(%arg0: i32) -> (i32, i32) {
    %c0_i32 = arith.constant 0 : i32
    %c0_i32_0 = arith.constant 0 : i32
    %c0_i32_1 = arith.constant 0 : i32
    return %c0_i32, %c0_i32_0 : i32, i32
  }
  func.func @transform_3(%arg0: i32) -> (i32, i32) {
    %c0_i32 = arith.constant 0 : i32
    %c0_i32_0 = arith.constant 0 : i32
    %c0_i32_1 = arith.constant 0 : i32
    return %c0_i32, %c0_i32_0 : i32, i32
  }
  func.func @transform_4(%arg0: i32) -> (i32, i32) {
    %c0_i32 = arith.constant 0 : i32
    %c0_i32_0 = arith.constant 0 : i32
    %c0_i32_1 = arith.constant 0 : i32
    return %c0_i32, %c0_i32_0 : i32, i32
  }
  func.func @transform_5(%arg0: i32) -> (i32, i32) {
    %c0_i32 = arith.constant 0 : i32
    %c0_i32_0 = arith.constant 0 : i32
    %c0_i32_1 = arith.constant 0 : i32
    return %c0_i32, %c0_i32_0 : i32, i32
  }
  func.func @transform_6(%arg0: i32) -> (i32, i32) {
    %c0_i32 = arith.constant 0 : i32
    %c0_i32_0 = arith.constant 0 : i32
    %c0_i32_1 = arith.constant 0 : i32
    return %c0_i32, %c0_i32_0 : i32, i32
  }
  func.func @transform_7(%arg0: i32) -> (i32, i32) {
    %c0_i32 = arith.constant 0 : i32
    %c0_i32_0 = arith.constant 0 : i32
    %c0_i32_1 = arith.constant 0 : i32
    return %c0_i32, %c0_i32_0 : i32, i32
  }
  func.func @transform_8(%arg0: i32) -> (i32, i32) {
    %c0_i32 = arith.constant 0 : i32
    %c0_i32_0 = arith.constant 0 : i32
    %c0_i32_1 = arith.constant 0 : i32
    return %c0_i32, %c0_i32_0 : i32, i32
  }
  func.func @transform_9(%arg0: i32) -> (i32, i32) {
    %c0_i32 = arith.constant 0 : i32
    %c0_i32_0 = arith.constant 0 : i32
    %c0_i32_1 = arith.constant 0 : i32
    return %c0_i32, %c0_i32_0 : i32, i32
  }
  func.func @transform_10(%arg0: i32) -> (i32, i32) {
    %c0_i32 = arith.constant 0 : i32
    %c0_i32_0 = arith.constant 0 : i32
    %c0_i32_1 = arith.constant 0 : i32
    return %c0_i32, %c0_i32_0 : i32, i32
  }
  func.func @transform_11(%arg0: i32) -> (i32, i32, i32) {
    %c0_i32 = arith.constant 0 : i32
    %c0_i32_0 = arith.constant 0 : i32
    %c0_i32_1 = arith.constant 0 : i32
    return %arg0, %c0_i32, %c0_i32_0 : i32, i32, i32
  }
}

</mosaic_0001>

<bundles_post_ra>
// kernel: tpu_custom_call.1
= control target key start
LH: loop header
LB: loop body
LE: loop exit
PB: predicated region body
PF: predicated region fallthrough
CT: control target
= control target key end

     0   :  { %16 = vsyncpa [#allocation6], 0  ;;  %s16804_s0 = inlined_call_operand.vmem [shape: f32[2,16,324], index: 0, kind: input, shape index: {}]   ;;  %s16805_s1 = inlined_call_operand.vmem [shape: f32[72,16], index: 1, kind: input, shape index: {}]   ;;  %s16806_s2 = inlined_call_operand.vmem [shape: f32[72,24], index: 2, kind: input, shape index: {}]   ;;  %s16807_s3 = inlined_call_operand.vmem [shape: f32[72,32], index: 3, kind: input, shape index: {}]   ;;  %s16808_s4 = inlined_call_operand.vmem [shape: f32[72,40], index: 4, kind: input, shape index: {}]   ;;  %s16809_s5 = inlined_call_operand.vmem [shape: f32[16,48], index: 5, kind: input, shape index: {}]   ;;  %s16810_s6 = inlined_call_operand.vmem [shape: f32[144,16], index: 6, kind: input, shape index: {}]   ;;  %s16811_s7 = inlined_call_operand.vmem [shape: f32[144,16], index: 7, kind: input, shape index: {}]   ;;  %s16812_s8 = inlined_call_operand.vmem [shape: f32[1,16], index: 8, kind: input, shape index: {}]   ;;  %s16813_s9 = inlined_call_operand.vmem [shape: f32[16,1], index: 9, kind: input, shape index: {}]   ;;  %s16814_s10 = inlined_call_operand.vmem [shape: f32[80,1], index: 10, kind: input, shape index: {}]   ;;  %s16815_s11 = inlined_call_operand.hbm [shape: f32[2,16,288], index: 11, kind: output, shape index: {}]  }
   0x1   :  { %18 = vsyncpa [#allocation6 + $0x1], 0  ;;  %s14484_s17 = smov 0   ;;  %s14486_s18 = smov 0  }
   0x2   :  { %s14488_s19 = smov 0   ;;  %s14490_s20 = smov 0  }
   0x3 LB: > { %s14505_s21 = sadd.s32 4294967295, %s14405_s20   ;;  %s11584_s22 = sadd.s32 4294967294, %s14405_s20   ;;  %s14405_s20 = sphi %s14490_s20, %s17102_s20   ;;  %s14401_s19 = sphi %s14488_s19, %s17101_s19   ;;  %s14397_s18 = sphi %s14486_s18, %s17100_s18   ;;  %s14393_s17 = sphi %s14484_s17, %s17099_s17  }
   0x4   : > { %s14509_s23 = sadd.s32 1, %s14405_s20   ;;  %s267_s24 = sadd.s32 1, %s14401_s19 }
   0x5   : > { %s264_s25 = ssub.s32 %s14405_s20, %s14509_s23  ;;  %p277_p0 = scmp.ne.s32.totalorder %s14401_s19, %s14397_s18 }
   0x6   : > { %p265_p1 = scmp.eq.s32.totalorder %s264_s25, 0  ;;  %p278_p2 = scmp.eq.s32.totalorder %s14505_s21, 1 }
   0x7   : > { %p283_p3 = scmp.ne.s32.totalorder %s14397_s18, %s14393_s17  ;;  %p284_p4 = scmp.eq.s32.totalorder %s11584_s22, 1 }
   0x8   : > { %s14520_s26 = scalar_select %p265_p1, %s14401_s19, %s267_s24  }
   0x9   : > { %p14522_p5 = por %p278_p2, %p277_p0  ;;  %p14526_p6 = por %p284_p4, %p283_p3 }
   0xa   : > { %p11587_p7 = scmp.ge.s32.totalorder %s14405_s20, 1  ;;  %p340_p8 = scmp.lt.s32.totalorder %s14405_s20, 3 }
   0xc   : > { %p341_p9 = pnand %p11587_p7, %p340_p8 }
   0xd   : > { %p380_p10 = scmp.lt.s32.totalorder (!%p341_p9), %s14505_s21, 1  ;;  %vm385_vm0 = vcmask (!%p341_p9), 154624   ;;  %vm392_vm1 = vcmask (!%p341_p9), 572824   ;;  %v14407_v0 = vmov (!%p341_p9), 0.0   ;;  %s14408_s15 = smov (!%p341_p9), 1   ;;  %vm509_vm2 = vcmask (!%p341_p9), 1047560  }
   0xe   : > { %344 = sbr.rel (%p341_p9) target bundleno = 4807 (0x12c7), region = 64  ;;  %386 = vst.msk [vmem:[#allocation2] sm:$0xff] (!%p341_p9), %vm385_vm0, %v14407_v0  ;;  %387 = vst.msk [vmem:[#allocation2 + $0x18] sm:$0xff] (!%p341_p9), %vm385_vm0, %v14407_v0  ;;  %623 = vmatprep.mubr.f32.mxu0 (!%p341_p9), %v14407_v0  ;;  %vm16816_vm3 = vcmask (!%p341_p9), 7168   ;;  %vm512_vm4 = vcmask (!%p341_p9), 564224   ;;  %v14409_v15 = vmov (!%p341_p9), 0.0|0.0  }
   0xf   : > { %388 = vst.msk [vmem:[#allocation2 + $0x30] sm:$0xff] (!%p341_p9), %vm385_vm0, %v14407_v0  ;;  %389 = vst.msk [vmem:[#allocation2 + $0x48] sm:$0xff] (!%p341_p9), %vm385_vm0, %v14407_v0  ;;  %12536 = vmatprep.subr.bf16.mxu1 (!%p341_p9), %v14409_v15  ;;  %vm14410_vm5 = vmmov (!%p341_p9), 0   ;;  %s14411_s16 = smov (!%p341_p9), 127   ;;  %s16839_s22 = smov (!%p341_p9), 126   ;;  %v517_v41 = vld [vmem:[%s16814_s10] sm:$0xff] (!%p341_p9) }
  0x10   : > { %390 = vst.msk [vmem:[#allocation2 + $0x60] sm:$0xff] (!%p341_p9), %vm385_vm0, %v14407_v0  ;;  %391 = vst.msk [vmem:[#allocation2 + $0x78] sm:$0xff] (!%p341_p9), %vm385_vm0, %v14407_v0  ;;  %12011 = vmatprep.mubr.msk.f32.mxu1 (!%p341_p9), %vm14410_vm5, %v14407_v0  ;;  %s16837_s24 = smov (!%p341_p9), 110   ;;  %s16835_s25 = smov (!%p341_p9), 109   ;;  %v14419_v42 = vmov (!%p341_p9), 0   ;;  %vm544_vm6 = vcmask (!%p341_p9), 1039360  }
  0x11   : > { %399 = vst.msk [vmem:[#allocation3] sm:$0xff] (!%p341_p9), %vm385_vm0, %v14407_v0  ;;  %400 = vst.msk [vmem:[#allocation3 + $0x18] sm:$0xff] (!%p341_p9), %vm385_vm0, %v14407_v0  ;;  %s16827_s12 = smov (!%p341_p9), 91   ;;  %s16831_s13 = smov (!%p341_p9), 90   ;;  %13430 = vset.pattern.permute.xlu0 (!%p341_p9), %v14419_v42  ;;  %13551 = vset.pattern.permute.xlu1 (!%p341_p9), %v14419_v42  ;;  %vm857_vm7 = vcmask (!%p341_p9), 1031168   ;;  %vm16817_vm8 = vcmask (!%p341_p9), 130048  }
  0x12   : > { %403 = vst.msk [vmem:[#allocation4] sm:$0xff] (!%p341_p9), %vm385_vm0, %v14407_v0  ;;  %404 = vst.msk [vmem:[#allocation4 + $0x18] sm:$0xff] (!%p341_p9), %vm385_vm0, %v14407_v0  ;;  %vm16830_vm9 = vcmask (!%p341_p9), 900096   ;;  %vm16824_vm10 = vcmask (!%p341_p9), 891904   ;;  %vm16821_vm11 = vcmask (!%p341_p9), 883712   ;;  %vm16820_vm12 = vcmask (!%p341_p9), 752640  }
  0x13   : > { %393 = vst.msk [vmem:[#allocation2 + $0x10] sm:$0xff] (!%p341_p9), %vm392_vm1, %v14407_v0  ;;  %394 = vst.msk [vmem:[#allocation2 + $0x28] sm:$0xff] (!%p341_p9), %vm392_vm1, %v14407_v0  ;;  %vm16819_vm13 = vcmask (!%p341_p9), 744448   ;;  %vm16818_vm14 = vcmask (!%p341_p9), 736256  }
  0x14   : > { %395 = vst.msk [vmem:[#allocation2 + $0x40] sm:$0xff] (!%p341_p9), %vm392_vm1, %v14407_v0  ;;  %396 = vst.msk [vmem:[#allocation2 + $0x58] sm:$0xff] (!%p341_p9), %vm392_vm1, %v14407_v0 }
  0x15   : > { %397 = vst.msk [vmem:[#allocation2 + $0x70] sm:$0xff] %vm392_vm1, %v14407_v0  ;;  %398 = vst.msk [vmem:[#allocation2 + $0x88] sm:$0xff] %vm392_vm1, %v14407_v0  ;;  %s381_s29 = scalar_select %p380_p10, %s14505_s21, 1 }
  0x16   : > { %401 = vst.msk [vmem:[#allocation3 + $0x10] sm:$0xff] %vm392_vm1, %v14407_v0  ;;  %402 = vst.msk [vmem:[#allocation3 + $0x28] sm:$0xff] %vm392_vm1, %v14407_v0 }
  0x17   : > { %405 = vst.msk [vmem:[#allocation4 + $0x10] sm:$0xff] %vm392_vm1, %v14407_v0  ;;  %406 = vst.msk [vmem:[#allocation4 + $0x28] sm:$0xff] %vm392_vm1, %v14407_v0  ;;  %s13247_s30 = smul.u32 48, %s381_s29  ;;  %s16833_s29 = smov 108  }
  0x19   : > { %s384_s14 = scalar_lea.vmem %s16804_s0, %s13247_s30  ;;  %s16825_s30 = smov 92  }
  0x1a   : > { %v476_v1 = vld [vmem:[%s384_s14 + $0x10] sm:$0xff]  ;;  %v474_v2 = vld [vmem:[%s384_s14] sm:$0xff]  ;;  %v477_v3 = vld [vmem:[%s384_s14 + $0x18] sm:$0xff] }
  0x1b   : > { %490 = vrot.lane.b32.xlu1 %v476_v1, %s14408_s15  ;;  %486 = vrot.lane.b32.xlu0 %v474_v2, %s14408_s15  ;;  %v475_v4 = vld [vmem:[%s384_s14 + $0x8] sm:$0xff]  ;;  %v478_v6 = vld [vmem:[%s384_s14 + $0x20] sm:$0xff] }
  0x1c   : > { %v479_v5 = vld [vmem:[%s384_s14 + $0x28] sm:$0xff]  ;;  %s16822_s14 = smov 19  }
  0x1d   : > { %v525_v2 = vld [vmem:[%s16805_s1 + $0x8] sm:$0xff] }
  0x1f   : > { %492 = vrot.lane.b32.xlu1 %v477_v3, %s14408_s15  ;;  %488 = vrot.lane.b32.xlu0 %v475_v4, %s14408_s15 }
  0x23   : > { %496 = vrot.lane.b32.xlu1 %v479_v5, %s14408_s15  ;;  %494 = vrot.lane.b32.xlu0 %v478_v6, %s14408_s15  ;;  %s16966_s15 = smov 91  }
  0x8d   : > { %v491_v7 = vpop.permute.xlu1 %490  ;;  %v487_v8 = vpop.permute.xlu0 %486 }
  0x8e   : > { %510 = vst.msk [vmem:[#allocation2] sm:$0xff] %vm509_vm2, %v487_v8 }
  0x91   : > { %v493_v9 = vpop.permute.xlu1 %492  ;;  %v489_v10 = vpop.permute.xlu0 %488 }
  0x92   : > { %514 = vst.msk [vmem:[#allocation2 + $0x18] sm:$0xff] %vm509_vm2, %v493_v9  ;;  %v499_v11 = vsel %vm16816_vm3, %v487_v8, %v489_v10  ;;  %v500_v12 = vsel %vm16816_vm3, %v489_v10, %v491_v7  ;;  %v524_v7 = vld [vmem:[%s16805_s1] sm:$0xff] }
  0x93   : > { %511 = vst [vmem:[#allocation2 + $0x8] sm:$0xff] %v499_v11  ;;  %513 = vst.msk [vmem:[#allocation2 + $0x10] sm:$0xff] %vm512_vm4, %v500_v12 }
  0x95   : > { %v497_v13 = vpop.permute.xlu1 %496  ;;  %v495_v14 = vpop.permute.xlu0 %494  ;;  %v518_v19 = vld [vmem:[#allocation2] sm:$0xff] }
  0x96   : > { %v501_v16 = vsel %vm16816_vm3, %v493_v9, %v495_v14  ;;  %v502_v17 = vsel %vm16816_vm3, %v495_v14, %v497_v13  ;;  %v3728_v26 = vld [vmem:[#allocation2] sm:$0xff] }
  0x97   : > { %515 = vst [vmem:[#allocation2 + $0x20] sm:$0xff] %v501_v16  ;;  %516 = vst.msk [vmem:[#allocation2 + $0x28] sm:$0xff] %vm512_vm4, %v502_v17  ;;  %v14585_v18 = vpack.c.bf16 %v501_v16, %v499_v11 }
  0x99   : > { %v521_v20 = vld [vmem:[#allocation2 + $0x18] sm:$0xff] }
  0x9a   : > { %v3731_v21 = vld [vmem:[#allocation2 + $0x18] sm:$0xff]  ;;  %v520_v22 = vld [vmem:[#allocation2 + $0x10] sm:$0xff]  ;;  %v14587_v23 = vpack.c.bf16 %v521_v20, %v518_v19  ;;  %v14589_v24 = vpack.i.bf16 %v521_v20, %v518_v19  ;;  %v3729_v29 = vld [vmem:[#allocation2 + $0x8] sm:$0xff] }
  0x9b   : > { %v14591_v25 = vpack.i.bf16 %v520_v22, %v499_v11  ;;  %v14595_v27 = vpack.c.bf16 %v3731_v21, %v3728_v26  ;;  %v14597_v28 = vpack.i.bf16 %v3731_v21, %v3728_v26  ;;  %v14607_v35 = vld [vmem:[#allocation2 + $0x10] sm:$0xff] }
  0x9c   : > { %v14609_v36 = vld [vmem:[#allocation2 + $0x10] sm:$0xff] }
  0x9d   : > { %13311 = vrot.lane.b32.xlu0 %v14591_v25, %s14411_s16  ;;  %v844_v20 = vld [vmem:[%s16805_s1 + $0x10] sm:$0xff] }
  0x9e   : > { %v523_v30 = vld [vmem:[#allocation2 + $0x28] sm:$0xff]  ;;  %v3732_v31 = vld [vmem:[#allocation2 + $0x20] sm:$0xff] }
  0x9f   : > { %v14601_v32 = vld [vmem:[#allocation2 + $0x28] sm:$0xff]  ;;  %v14603_v33 = vpack.i.bf16 %v523_v30, %v501_v16  ;;  %v14605_v34 = vpack.c.bf16 %v523_v30, %v520_v22  ;;  %v14613_v38 = vpack.c.bf16 %v3732_v31, %v3729_v29 }
  0xa0   : > { %v14611_v37 = vld [vmem:[#allocation2 + $0x28] sm:$0xff]  ;;  %v12681_v39 = vpack.c.bf16 %v14601_v32, %v14607_v35 }
  0xa1   : > { %v12807_v40 = vpack.c.bf16 %v14611_v37, %v14609_v36  ;;  %13321 = vrot.lane.b32.xlu0 %v14589_v24, %s14411_s16  ;;  %13316 = vrot.lane.b32.xlu1 %v14603_v33, %s14411_s16 }
  0xa5   : > { %13331 = vrot.lane.b32.xlu0 %v14603_v33, %s16839_s22  ;;  %13326 = vrot.lane.b32.xlu1 %v14591_v25, %s16839_s22 }
  0xa9   : > { %13341 = vrot.lane.b32.xlu0 %v14591_v25, %s16837_s24  ;;  %13336 = vrot.lane.b32.xlu1 %v14589_v24, %s16839_s22 }
  0xad   : > { %13351 = vrot.lane.b32.xlu0 %v14589_v24, %s16837_s24  ;;  %13346 = vrot.lane.b32.xlu1 %v14603_v33, %s16837_s24 }
  0xb1   : > { %13361 = vrot.lane.b32.xlu0 %v14603_v33, %s16835_s25  ;;  %13356 = vrot.lane.b32.xlu1 %v14591_v25, %s16835_s25 }
  0xb5   : > { %13371 = vrot.lane.b32.xlu0 %v14591_v25, %s16833_s29  ;;  %13366 = vrot.lane.b32.xlu1 %v14589_v24, %s16835_s25 }
  0xb9   : > { %13381 = vrot.lane.b32.xlu0 %v14589_v24, %s16833_s29  ;;  %13376 = vrot.lane.b32.xlu1 %v14603_v33, %s16833_s29 }
  0xbd   : > { %13391 = vrot.lane.b32.xlu0 %v14603_v33, %s16825_s30  ;;  %13386 = vrot.lane.b32.xlu1 %v14591_v25, %s16825_s30 }
  0xc1   : > { %13401 = vrot.lane.b32.xlu0 %v14591_v25, %s16827_s12  ;;  %13396 = vrot.lane.b32.xlu1 %v14589_v24, %s16825_s30 }
  0xc5   : > { %13411 = vrot.lane.b32.xlu0 %v14589_v24, %s16827_s12  ;;  %13406 = vrot.lane.b32.xlu1 %v14603_v33, %s16827_s12 }
  0xc9   : > { %13421 = vrot.lane.b32.xlu0 %v14603_v33, %s16831_s13  ;;  %13416 = vrot.lane.b32.xlu1 %v14591_v25, %s16831_s13 }
  0xcd   : > { %13426 = vrot.lane.b32.xlu1 %v14589_v24, %s16831_s13  ;;  %2043 = vperm.xlu0 %13430, %v517_v41  }
 0x10f   : > { %v13312_v43 = vpop.permute.xlu0 %13311 }
 0x110   : > { %v13313_v44 = vunpack.i.l.bf16 %v13312_v43  ;;  %v13314_v45 = vunpack.i.h.bf16 %v13312_v43 }
 0x112   : > { %v546_v52 = vsel %vm544_vm6, %v13313_v44, %v13314_v45 }
 0x113   : > { %v13317_v46 = vpop.permute.xlu1 %13316  ;;  %v13322_v47 = vpop.permute.xlu0 %13321 }
 0x114   : > { %v13318_v48 = vunpack.i.l.bf16 %v13317_v46  ;;  %v13324_v49 = vunpack.i.h.bf16 %v13322_v47  ;;  %v13323_v50 = vunpack.i.l.bf16 %v13322_v47  ;;  %v13319_v51 = vunpack.i.h.bf16 %v13317_v46  ;;  %v1015_v46 = vld [vmem:[%s16805_s1 + $0x18] sm:$0xff] }
 0x116   : > { %v12537_v53 = vpack.c.bf16 %v13319_v51, %v13314_v45  ;;  %v548_v54 = vsel %vm544_vm6, %v13318_v48, %v13319_v51  ;;  %v545_v55 = vsel %vm544_vm6, %v13323_v50, %v13313_v44  ;;  %v547_v56 = vsel %vm544_vm6, %v13324_v49, %v13318_v48 }
 0x117   : > { %v13327_v57 = vpop.permute.xlu1 %13326  ;;  %v13332_v58 = vpop.permute.xlu0 %13331  ;;  %v12532_v59 = vpack.c.bf16 %v548_v54, %v546_v52  ;;  %v12534_v60 = vpack.c.bf16 %v547_v56, %v545_v55  ;;  %v14718_v54 = vld [vmem:[%s16805_s1 + $0x20] sm:$0xff] }
 0x118   : > { %v13329_v61 = vunpack.i.h.bf16 %v13327_v57  ;;  %v13328_v62 = vunpack.i.l.bf16 %v13327_v57  ;;  %v13334_v63 = vunpack.i.h.bf16 %v13332_v58  ;;  %v13333_v1 = vunpack.i.l.bf16 %v13332_v58  ;;  %12538 = vmatpush3.bf16.msra.mxu1 %v12537_v53 }
 0x119   : > { %12533 = vmatprep.subr.bf16.mxu0 %v12532_v59  ;;  %12543 = vmatprep.subr.bf16.mxu1 %v14409_v15 }
 0x11a   : > { %12535 = vmatpush1.bf16.msra.mxu0 %v12534_v60  ;;  %v859_v3 = vsel %vm857_vm7, %v13328_v62, %v13329_v61  ;;  %v861_v4 = vsel %vm857_vm7, %v13333_v1, %v13334_v63  ;;  %v12551_v11 = vpack.c.bf16 %v13334_v63, %v13329_v61 }
 0x11b   : > { %v13337_v5 = vpop.permute.xlu1 %13336  ;;  %v13342_v6 = vpop.permute.xlu0 %13341  ;;  %12540 = vmatprep.subr.bf16.mxu0 %v14585_v18  ;;  %12012 = vmatmul.mubr.msk.f32.vlgmr.msra.gmra.mrb[0].mxu1 %vm16817_vm8, %v525_v2  ;;  %v12546_v10 = vpack.c.bf16 %v861_v4, %v859_v3 }
 0x11c   : > { %12545 = vmatpush3.bf16.msra.mxu1 %v14605_v34  ;;  %12018 = vmatprep.mubr.msk.f32.mxu1 %vm14410_vm5, %v14407_v0  ;;  %v13339_v8 = vunpack.i.h.bf16 %v13337_v5  ;;  %v13338_v9 = vunpack.i.l.bf16 %v13337_v5  ;;  %v13344_v12 = vunpack.i.h.bf16 %v13342_v6  ;;  %v13343_v13 = vunpack.i.l.bf16 %v13342_v6 }
 0x11d   : > { %11592 = vmatmul.mubr.msk.f32.vlgmr.msra.gmra.mrb[0].mxu0 %vm16817_vm8, %v525_v2  ;;  %12550 = vmatprep.subr.bf16.mxu1 %v14409_v15 }
 0x11e   : > { %12542 = vmatpush1.bf16.msra.mxu0 %v14587_v23  ;;  %767 = vmatprep.mubr.f32.mxu0 %v14407_v0  ;;  %v858_v21 = vsel %vm857_vm7, %v13338_v9, %v13328_v62  ;;  %v860_v22 = vsel %vm857_vm7, %v13339_v8, %v13333_v1  ;;  %v1030_v29 = vsel %vm16830_vm9, %v13343_v13, %v13344_v12 }
 0x11f   : > { %v13347_v14 = vpop.permute.xlu1 %13346  ;;  %v13352_v16 = vpop.permute.xlu0 %13351  ;;  %12547 = vmatprep.subr.bf16.mxu0 %v12546_v10  ;;  %12019 = vmatmul.mubr.msk.f32.vlgmr.msra.gmra.mrb[2].mxu1 %vm16817_vm8, %v524_v7  ;;  %v12548_v45 = vpack.c.bf16 %v860_v22, %v858_v21  ;;  %v14758_v22 = vld [vmem:[%s16805_s1 + $0x30] sm:$0xff] }
 0x120   : > { %v13349_v17 = vunpack.i.h.bf16 %v13347_v14  ;;  %v13348_v19 = vunpack.i.l.bf16 %v13347_v14  ;;  %12552 = vmatpush3.bf16.msra.mxu1 %v12551_v11  ;;  %12025 = vmatprep.mubr.msk.f32.mxu1 %vm14410_vm5, %v14407_v0  ;;  %v13354_v47 = vunpack.i.h.bf16 %v13352_v16  ;;  %v13353_v48 = vunpack.i.l.bf16 %v13352_v16  ;;  %v14742_v11 = vld [vmem:[%s16805_s1 + $0x28] sm:$0xff] }
 0x121   : > { %12557 = vmatprep.subr.bf16.mxu1 %v14409_v15 }
 0x122   : > { %v12558_v26 = vpack.c.bf16 %v13349_v17, %v13344_v12  ;;  %v1032_v30 = vsel %vm16830_vm9, %v13348_v19, %v13349_v17  ;;  %v1031_v55 = vsel %vm16830_vm9, %v13354_v47, %v13348_v19  ;;  %v1029_v56 = vsel %vm16830_vm9, %v13353_v48, %v13343_v13 }
 0x123   : > { %v13357_v31 = vpop.permute.xlu1 %13356  ;;  %v13362_v41 = vpop.permute.xlu0 %13361  ;;  %12026 = vmatmul.mubr.msk.f32.vlgmr.msra.gmra.mrb[4].mxu1 %vm16817_vm8, %v844_v20  ;;  %v12553_v42 = vpack.c.bf16 %v1032_v30, %v1030_v29  ;;  %v12555_v63 = vpack.c.bf16 %v1031_v55, %v1029_v56 }
 0x124   : > { %v13359_v43 = vunpack.i.h.bf16 %v13357_v31  ;;  %v13364_v44 = vunpack.i.h.bf16 %v13362_v41  ;;  %12559 = vmatpush3.bf16.msra.mxu1 %v12558_v26  ;;  %12032 = vmatprep.mubr.msk.f32.mxu1 %vm14410_vm5, %v14407_v0  ;;  %v13358_v49 = vunpack.i.l.bf16 %v13357_v31  ;;  %v13363_v51 = vunpack.i.l.bf16 %v13362_v41 }
 0x125   : > { %11594 = vmatmul.mubr.msk.f32.vlgmr.msra.gmra.mrb[0].mxu0 %vm16817_vm8, %v524_v7  ;;  %12564 = vmatprep.subr.bf16.mxu1 %v14409_v15 }
 0x126   : > { %v12565_v50 = vpack.c.bf16 %v13364_v44, %v13359_v43  ;;  %12549 = vmatpush1.bf16.msra.mxu0 %v12548_v45  ;;  %935 = vmatprep.mubr.f32.mxu0 %v14407_v0  ;;  %v1201_v57 = vsel %vm16824_vm10, %v13358_v49, %v13359_v43  ;;  %v1203_v58 = vsel %vm16824_vm10, %v13363_v51, %v13364_v44 }
 0x127   : > { %12554 = vmatprep.subr.bf16.mxu0 %v12553_v42  ;;  %v13367_v52 = vpop.permute.xlu1 %13366  ;;  %v14710_v53 = vpop.permute.xlu0 %13371  ;;  %12033 = vmatmul.mubr.msk.f32.vlgmr.msra.gmra.mrb[6].mxu1 %vm16817_vm8, %v1015_v46  ;;  %v12560_v3 = vpack.c.bf16 %v1203_v58, %v1201_v57  ;;  %v1699_v57 = vld [vmem:[%s16805_s1 + $0x38] sm:$0xff] }
 0x128   : > { %12566 = vmatpush3.bf16.msra.mxu1 %v12565_v50  ;;  %12039 = vmatprep.mubr.msk.f32.mxu1 %vm14410_vm5, %v14407_v0  ;;  %v13374_v61 = vunpack.i.h.bf16 %v14710_v53  ;;  %v13369_v1 = vunpack.i.h.bf16 %v13367_v52  ;;  %v13368_v2 = vunpack.i.l.bf16 %v13367_v52  ;;  %v13373_v8 = vunpack.i.l.bf16 %v14710_v53 }
 0x129   : > { %12571 = vmatprep.subr.bf16.mxu1 %v14409_v15 }
 0x12a   : > { %v1200_v12 = vsel %vm16824_vm10, %v13368_v2, %v13358_v49  ;;  %v1202_v13 = vsel %vm16824_vm10, %v13369_v1, %v13363_v51  ;;  %v1372_v21 = vsel %vm16821_vm11, %v13373_v8, %v13374_v61 }
 0x12b   : > { %v13377_v59 = vpop.permute.xlu1 %13376  ;;  %v13382_v60 = vpop.permute.xlu0 %13381  ;;  %12040 = vmatmul.mubr.msk.f32.vlgmr.msra.gmra.mrb[8].mxu1 %vm16817_vm8, %v14718_v54 }
 0x12c   : > { %v13379_v62 = vunpack.i.h.bf16 %v13377_v59  ;;  %12046 = vmatprep.mubr.msk.f32.mxu1 %vm14410_vm5, %v14407_v0  ;;  %v13378_v4 = vunpack.i.l.bf16 %v13377_v59  ;;  %v13384_v26 = vunpack.i.h.bf16 %v13382_v60  ;;  %v13383_v29 = vunpack.i.l.bf16 %v13382_v60 }
 0x12d   : > { %11596 = vmatmul.mubr.msk.f32.vlgmr.msra.gmra.mrb[0].mxu0 %vm16817_vm8, %v844_v20  ;;  %v12562_v20 = vpack.c.bf16 %v1202_v13, %v1200_v12 }
 0x12e   : > { %v12572_v5 = vpack.c.bf16 %v13379_v62, %v13374_v61  ;;  %12556 = vmatpush1.bf16.msra.mxu0 %v12555_v63  ;;  %1106 = vmatprep.mubr.f32.mxu0 %v14407_v0  ;;  %v1374_v16 = vsel %vm16821_vm11, %v13378_v4, %v13379_v62  ;;  %v1371_v47 = vsel %vm16821_vm11, %v13383_v29, %v13373_v8 }
 0x12f   : > { %12561 = vmatprep.subr.bf16.mxu0 %v12560_v3  ;;  %v14732_v6 = vpop.permute.xlu1 %13386  ;;  %v14734_v7 = vpop.permute.xlu0 %13391  ;;  %v12567_v30 = vpack.c.bf16 %v1374_v16, %v1372_v21 }
 0x130   : > { %v13389_v9 = vunpack.i.h.bf16 %v14732_v6  ;;  %v13394_v10 = vunpack.i.h.bf16 %v14734_v7  ;;  %12573 = vmatpush3.bf16.msra.mxu1 %v12572_v5  ;;  %v13388_v31 = vunpack.i.l.bf16 %v14732_v6  ;;  %v13393_v41 = vunpack.i.l.bf16 %v14734_v7 }
 0x131   : > { %12578 = vmatprep.subr.bf16.mxu1 %v14409_v15 }
 0x132   : > { %v12579_v14 = vpack.c.bf16 %v13394_v10, %v13389_v9  ;;  %v1543_v49 = vsel %vm16820_vm12, %v13388_v31, %v13389_v9  ;;  %v1545_v50 = vsel %vm16820_vm12, %v13393_v41, %v13394_v10 }
 0x133   : > { %v13397_v17 = vpop.permute.xlu1 %13396  ;;  %v14748_v19 = vpop.permute.xlu0 %13401  ;;  %12047 = vmatmul.mubr.msk.f32.vlgmr.msra.gmra.mrb[10].mxu1 %vm16817_vm8, %v14742_v11  ;;  %v12574_v60 = vpack.c.bf16 %v1545_v50, %v1543_v49 }
 0x134   : > { %12580 = vmatpush3.bf16.msra.mxu1 %v12579_v14  ;;  %12053 = vmatprep.mubr.msk.f32.mxu1 %vm14410_vm5, %v14407_v0  ;;  %v13404_v44 = vunpack.i.h.bf16 %v14748_v19  ;;  %v13399_v58 = vunpack.i.h.bf16 %v13397_v17  ;;  %v13398_v59 = vunpack.i.l.bf16 %v13397_v17  ;;  %v13403_v63 = vunpack.i.l.bf16 %v14748_v19 }
 0x135   : > { %11598 = vmatmul.mubr.msk.f32.vlgmr.msra.gmra.mrb[0].mxu0 %vm16817_vm8, %v1015_v46  ;;  %12585 = vmatprep.subr.bf16.mxu1 %v14409_v15  ;;  %v1373_v46 = vsel %vm16821_vm11, %v13384_v26, %v13378_v4 }
 0x136   : > { %12563 = vmatpush1.bf16.msra.mxu0 %v12562_v20  ;;  %1277 = vmatprep.mubr.f32.mxu0 %v14407_v0  ;;  %v12569_v56 = vpack.c.bf16 %v1373_v46, %v1371_v47  ;;  %v1542_v1 = vsel %vm16820_vm12, %v13398_v59, %v13388_v31  ;;  %v1544_v2 = vsel %vm16820_vm12, %v13399_v58, %v13393_v41 }
 0x137   : > { %12568 = vmatprep.subr.bf16.mxu0 %v12567_v30  ;;  %v13407_v42 = vpop.permute.xlu1 %13406  ;;  %v13412_v43 = vpop.permute.xlu0 %13411  ;;  %12054 = vmatmul.mubr.msk.f32.vlgmr.msra.gmra.mrb[12].mxu1 %vm16817_vm8, %v14758_v22  ;;  %v12576_v4 = vpack.c.bf16 %v1544_v2, %v1542_v1  ;;  %v1714_v5 = vsel %vm16819_vm13, %v13403_v63, %v13404_v44 }
 0x138   : > { %v13409_v45 = vunpack.i.h.bf16 %v13407_v42  ;;  %12060 = vmatprep.mubr.msk.f32.mxu1 %vm14410_vm5, %v14407_v0  ;;  %v13408_v61 = vunpack.i.l.bf16 %v13407_v42  ;;  %v13414_v6 = vunpack.i.h.bf16 %v13412_v43  ;;  %v13413_v7 = vunpack.i.l.bf16 %v13412_v43 }
 0x13a   : > { %v12586_v48 = vpack.c.bf16 %v13409_v45, %v13404_v44  ;;  %v1716_v3 = vsel %vm16819_vm13, %v13408_v61, %v13409_v45  ;;  %v1715_v12 = vsel %vm16819_vm13, %v13414_v6, %v13408_v61  ;;  %v1713_v13 = vsel %vm16819_vm13, %v13413_v7, %v13403_v63 }
 0x13b   : > { %v13417_v51 = vpop.permute.xlu1 %13416  ;;  %v13422_v52 = vpop.permute.xlu0 %13421  ;;  %v12581_v8 = vpack.c.bf16 %v1716_v3, %v1714_v5  ;;  %v12583_v19 = vpack.c.bf16 %v1715_v12, %v1713_v13 }
 0x13c   : > { %v13419_v53 = vunpack.i.h.bf16 %v13417_v51  ;;  %v13424_v55 = vunpack.i.h.bf16 %v13422_v52  ;;  %12587 = vmatpush3.bf16.msra.mxu1 %v12586_v48  ;;  %v13418_v9 = vunpack.i.l.bf16 %v13417_v51  ;;  %v13423_v10 = vunpack.i.l.bf16 %v13422_v52 }
 0x13d   : > { %11600 = vmatmul.mubr.msk.f32.vlgmr.msra.gmra.mrb[0].mxu0 %vm16817_vm8, %v14718_v54  ;;  %12592 = vmatprep.subr.bf16.mxu1 %v14409_v15  ;;  %v1870_v54 = vld [vmem:[%s16805_s1 + $0x40] sm:$0xff] }
 0x13e   : > { %v12593_v62 = vpack.c.bf16 %v13424_v55, %v13419_v53  ;;  %12570 = vmatpush1.bf16.msra.mxu0 %v12569_v56  ;;  %1448 = vmatprep.mubr.f32.mxu0 %v14407_v0  ;;  %v1885_v16 = vsel %vm16818_vm14, %v13418_v9, %v13419_v53  ;;  %v1887_v17 = vsel %vm16818_vm14, %v13423_v10, %v13424_v55 }
 0x13f   : > { %12575 = vmatprep.subr.bf16.mxu0 %v12574_v60  ;;  %12061 = vmatmul.mubr.msk.f32.vlgmr.msra.gmra.mrb[14].mxu1 %vm16817_vm8, %v1699_v57  ;;  %v13427_v14 = vpop.permute.xlu1 %13426  ;;  %v12588_v21 = vpack.c.bf16 %v1887_v17, %v1885_v16 }
 0x140   : > { %12594 = vmatpush3.bf16.msra.mxu1 %v12593_v62  ;;  %12067 = vmatprep.mubr.msk.f32.mxu1 %vm14410_vm5, %v14407_v0  ;;  %v13429_v20 = vunpack.i.h.bf16 %v13427_v14 }
 0x142   : > { %v1886_v29 = vsel %vm16818_vm14, %v13429_v20, %v13423_v10 }
 0x143   : > { %12068 = vmatmul.mubr.msk.f32.vlgmr.msra.gmra.mrb[16].mxu1 %vm16817_vm8, %v1870_v54 }
 0x144   : > { %2202 = vmatprep.mubr.f32.mxu1 %v14407_v0 }
 0x145   : > { %11602 = vmatmul.mubr.msk.f32.vlgmr.msra.gmra.mrb[0].mxu0 %vm16817_vm8, %v14742_v11  ;;  %v13428_v11 = vunpack.i.l.bf16 %v13427_v14 }
 0x146   : > { %12577 = vmatpush1.bf16.msra.mxu0 %v12576_v4  ;;  %1619 = vmatprep.mubr.f32.mxu0 %v14407_v0 }
 0x147   : > { %12582 = vmatprep.subr.bf16.mxu0 %v12581_v8  ;;  %v1884_v26 = vsel %vm16818_vm14, %v13428_v11, %v13418_v9 }
 0x148   : > { %v12590_v30 = vpack.c.bf16 %v1886_v29, %v1884_v26 }
 0x14c   : > { %v2044_v14 = vpop.permute.xlu0 %2043 }
 0x14d   : > { %11604 = vmatmul.mubr.msk.f32.vlgmr.msra.gmra.mrb[0].mxu0 %vm16817_vm8, %v14758_v22  ;;  %v407_v22 = vlaneseq }
 0x14e   : > { %12584 = vmatpush1.bf16.msra.mxu0 %v12583_v19  ;;  %1790 = vmatprep.mubr.f32.mxu0 %v14407_v0 }
 0x14f   : > { %12589 = vmatprep.subr.bf16.mxu0 %v12588_v21  ;;  %v408_v42 = vand.u32 127, %v407_v22 }
 0x151   : > { %v410_v46 = vadd.s32 256, %v408_v42  ;;  %v14816_v3 = vmul.u32.u64.low 3817748708, %v408_v42  ;;  %v14817_v4 = vmul.u32.u64.high 3817748708, %v408_v42, %v14816_v3  ;;  %v409_v5 = vadd.s32 128, %v408_v42 }
 0x153   : > { %v14812_v50 = vmul.u32.u64.low 3817748708, %v410_v46  ;;  %v14813_v51 = vmul.u32.u64.high 3817748708, %v410_v46, %v14812_v50  ;;  %v14819_v10 = vmul.u32.u64.low 3817748708, %v409_v5  ;;  %v14820_v12 = vmul.u32.u64.high 3817748708, %v409_v5, %v14819_v10 }
 0x154   : > { %v417_v20 = vshrl.u32 %v14817_v4, 4 }
 0x155   : > { %11606 = vmatmul.mubr.msk.f32.vlgmr.msra.gmra.mrb[0].mxu0 %vm16817_vm8, %v1699_v57  ;;  %v439_v57 = vshrl.u32 %v14813_v51, 4 }
 0x156   : > { %12591 = vmatpush1.bf16.msra.mxu0 %v12590_v30  ;;  %1961 = vmatprep.mubr.f32.mxu0 %v14407_v0  ;;  %v418_v29 = vmul.u32 18, %v417_v20  ;;  %v428_v30 = vshrl.u32 %v14820_v12, 4 }
 0x157   : > { %12603 = vmatprep.subr.bf16.mxu0 %v14585_v18  ;;  %v440_v58 = vmul.u32 18, %v439_v57 }
 0x159   : > { %v441_v62 = vsub.s32 %v410_v46, %v440_v58 }
 0x15b   : > { %vm446_vm15 = vcmp.ne.s32.totalorder %v441_v62, 0  ;;  %vm449_vm1 = vcmp.lt.s32.totalorder %v441_v62, 0  ;;  %v455_v2 = vadd.s32 18, %v441_v62 }
 0x15c   : > { %vm452_vm2 = vmand %vm449_vm1, %vm446_vm15 }
 0x15d   : > { %11608 = vmatmul.mubr.msk.f32.vlgmr.msra.gmra.mrb[0].mxu0 %vm16817_vm8, %v1870_v54  ;;  %v458_v7 = vsel %vm452_vm2, %v455_v2, %v441_v62 }
 0x15e   : > { %12605 = vmatpush1.bf16.msra.mxu0 %v14587_v23  ;;  %2346 = vmatprep.mubr.f32.mxu0 %v14407_v0  ;;  %vm461_vm4 = vcmp.ge.s32.totalorder %v458_v7, 1  ;;  %vm464_vm3 = vcmp.le.s32.totalorder %v458_v7, 16 }
 0x15f   : > { %vm14822_vm8 = vmand %vm461_vm4, %vm464_vm3 }
 0x160   : > { %v14830_v21 = vsel %vm14822_vm8, 1.0, %v14407_v0 }
 0x1ee   : > { %v696_v31 = vpop.f32.mrb[0].mxu1 }
 0x1ef   : > { %v12013_v41 = vpop.f32.mrb[1].mxu1 }
 0x1f0   : > { %v419_v41 = vsub.s32 %v408_v42, %v418_v29 }
 0x1f2   : > { %v840_v43 = vpop.f32.mrb[2].mxu1  ;;  %vm444_vm3 = vcmp.ne.s32.totalorder %v419_v41, 0  ;;  %vm447_vm1 = vcmp.lt.s32.totalorder %v419_v41, 0 }
 0x1f3   : > { %v841_v44 = vadd.f32 %v840_v43, %v696_v31  ;;  %v12020_v45 = vpop.f32.mrb[3].mxu1  ;;  %v429_v43 = vmul.u32 18, %v428_v30  ;;  %vm450_vm2 = vmand %vm447_vm1, %vm444_vm3 }
 0x1f4   : > { %v453_v45 = vadd.s32 18, %v419_v41 }
 0x1f6   : > { %v1008_v47 = vpop.f32.mrb[4].mxu1  ;;  %v456_v46 = vsel %vm450_vm2, %v453_v45, %v419_v41 }
 0x1f7   : > { %v1014_v48 = vadd.f32 %v1008_v47, %v841_v44  ;;  %v12027_v49 = vpop.f32.mrb[5].mxu1  ;;  %v430_v44 = vsub.s32 %v409_v5, %v429_v43  ;;  %vm459_vm13 = vcmp.ge.s32.totalorder %v456_v46, 1  ;;  %vm462_vm12 = vcmp.le.s32.totalorder %v456_v46, 16 }
 0x1f8   : > { %vm14843_vm11 = vmand %vm459_vm13, %vm462_vm12  ;;  %vm2075_vm13 = vcmask 1047704  }
 0x1f9   : > { %vm445_vm4 = vcmp.ne.s32.totalorder %v430_v44, 0  ;;  %v454_v47 = vadd.s32 18, %v430_v44 }
 0x1fa   : > { %v1179_v18 = vpop.f32.mrb[6].mxu1 }
 0x1fb   : > { %v1185_v52 = vadd.f32 %v1179_v18, %v1014_v48  ;;  %v12034_v53 = vpop.f32.mrb[7].mxu1 }
 0x1fc   : > { %v14850_v53 = vsel %vm14843_vm11, 1.0, %v14407_v0 }
 0x1fe   : > { %v1350_v23 = vpop.f32.mrb[8].mxu1 }
 0x1ff   : > { %v1356_v55 = vadd.f32 %v1350_v23, %v1185_v52  ;;  %v12041_v56 = vpop.f32.mrb[9].mxu1 }
 0x206   : > { %v1521_v59 = vpop.f32.mrb[10].mxu1 }
 0x207   : > { %v1527_v60 = vadd.f32 %v1521_v59, %v1356_v55  ;;  %v12048_v61 = vpop.f32.mrb[11].mxu1 }
 0x20a   : > { %v1692_v63 = vpop.f32.mrb[12].mxu1 }
 0x20b   : > { %v1698_v54 = vadd.f32 %v1692_v63, %v1527_v60  ;;  %v12055_v1 = vpop.f32.mrb[13].mxu1 }
 0x212   : > { %v1863_v6 = vpop.f32.mrb[14].mxu1 }
 0x213   : > { %v1869_v8 = vadd.f32 %v1863_v6, %v1698_v54  ;;  %v12062_v9 = vpop.f32.mrb[15].mxu1 }
 0x216   : > { %v2034_v13 = vpop.f32.mrb[16].mxu1 }
 0x217   : > { %v2040_v16 = vadd.f32 %v2034_v13, %v1869_v8  ;;  %v12069_v17 = vpop.f32.mrb[17].mxu1  ;;  %v14900_v8 = vld [vmem:[%s16806_s2] sm:$0xff] }
 0x219   : > { %v2048_v11 = vadd.f32 %v2044_v14, %v2040_v16 }
 0x21b   : > { %vm2051_vm15 = vcmp.ge.f32.partialorder %v2048_v11, 0.0  ;;  %v2054_v26 = vmul.f32 0.2, %v2048_v11 }
 0x21d   : > { %v2057_v22 = vsel %vm2051_vm15, %v2048_v11, %v2054_v26  ;;  %vm448_vm15 = vcmp.lt.s32.totalorder %v430_v44, 0 }
 0x21e   : > { %v2060_v31 = vmul.f32 %v14830_v21, %v2057_v22  ;;  %vm451_vm14 = vmand %vm448_vm15, %vm445_vm4  ;;  %vm2078_vm4 = vcmask 416768   ;;  %vm2134_vm15 = vcmask 195584  }
 0x21f   : > { %v457_v42 = vsel %vm451_vm14, %v454_v47, %v430_v44 }
 0x220   : > { %2068 = vrot.lane.b32.xlu0 %v2060_v31, %s16822_s14  ;;  %vm460_vm3 = vcmp.ge.s32.totalorder %v457_v42, 1  ;;  %vm463_vm1 = vcmp.le.s32.totalorder %v457_v42, 16 }
 0x221   : > { %vm14854_vm12 = vmand %vm460_vm3, %vm463_vm1  ;;  %vm16849_vm3 = vcmask 883712  }
 0x222   : > { %v14862_v58 = vsel %vm14854_vm12, 1.0, %v14407_v0  ;;  %vm16850_vm1 = vmmov %vm16849_vm3 }
 0x224   : > { %13437 = vrot.lane.b32.xlu0 %v14603_v33, %s14411_s16 }
 0x228   : > { %13447 = vrot.lane.b32.xlu0 %v14591_v25, %s16839_s22 }
 0x22c   : > { %13457 = vrot.lane.b32.xlu0 %v14589_v24, %s16839_s22 }
 0x230   : > { %13467 = vrot.lane.b32.xlu0 %v14603_v33, %s16837_s24  ;;  %v1963_v48 = vpop.f32.mrb[0].mxu0 }
 0x231   : > { %v2046_v50 = vadd.f32 %v2044_v14, %v1963_v48  ;;  %v1965_v51 = vpop.f32.mrb[1].mxu0 }
 0x232   : > { %v2047_v18 = vadd.f32 %v2044_v14, %v1965_v51 }
 0x233   : > { %vm2049_vm2 = vcmp.ge.f32.partialorder %v2046_v50, 0.0  ;;  %v2052_v52 = vmul.f32 0.2, %v2046_v50 }
 0x234   : > { %vm2050_vm14 = vcmp.ge.f32.partialorder %v2047_v18, 0.0  ;;  %v2053_v23 = vmul.f32 0.2, %v2047_v18  ;;  %13482 = vrot.lane.b32.xlu0 %v14603_v33, %s16835_s25 }
 0x235   : > { %v2055_v56 = vsel %vm2049_vm2, %v2046_v50, %v2052_v52  ;;  %vm16851_vm2 = vmmov %vm16850_vm1 }
 0x236   : > { %v2058_v57 = vmul.f32 %v14850_v53, %v2055_v56  ;;  %v2056_v59 = vsel %vm2050_vm14, %v2047_v18, %v2053_v23  ;;  %vm16852_vm14 = vmmov %vm16850_vm1 }
 0x237   : > { %v2059_v60 = vmul.f32 %v14862_v58, %v2056_v59 }
 0x238   : > { %13497 = vrot.lane.b32.xlu0 %v14603_v33, %s16833_s29  ;;  %2064 = vrot.lane.b32.xlu1 %v2058_v57, %s16822_s14 }
 0x23c   : > { %2066 = vrot.lane.b32.xlu1 %v2059_v60, %s16822_s14  ;;  %s16871_s14 = smov 19  }
 0x240   : > { %13432 = vrot.lane.b32.xlu1 %v14591_v25, %s14411_s16 }
 0x244   : > { %13442 = vrot.lane.b32.xlu1 %v14589_v24, %s14411_s16 }
 0x248   : > { %13452 = vrot.lane.b32.xlu1 %v14603_v33, %s16839_s22 }
 0x24c   : > { %13462 = vrot.lane.b32.xlu1 %v14591_v25, %s16837_s24 }
 0x250   : > { %13472 = vrot.lane.b32.xlu1 %v14589_v24, %s16837_s24 }
 0x254   : > { %13477 = vrot.lane.b32.xlu1 %v14591_v25, %s16835_s25 }
 0x258   : > { %13487 = vrot.lane.b32.xlu1 %v14589_v24, %s16835_s25 }
 0x25c   : > { %13492 = vrot.lane.b32.xlu1 %v14591_v25, %s16833_s29 }
 0x260   : > { %13502 = vrot.lane.b32.xlu1 %v14589_v24, %s16833_s29 }
 0x292   : > { %v2069_v61 = vpop.permute.xlu0 %2068 }
 0x296   : > { %v13438_v62 = vpop.permute.xlu0 %13437 }
 0x297   : > { %v13440_v4 = vunpack.i.h.bf16 %v13438_v62  ;;  %v13439_v5 = vunpack.i.l.bf16 %v13438_v62 }
 0x299   : > { %v2122_v14 = vsel %vm544_vm6, %v13439_v5, %v13440_v4 }
 0x29a   : > { %v13448_v3 = vpop.permute.xlu0 %13447 }
 0x29b   : > { %v13450_v30 = vunpack.i.h.bf16 %v13448_v3  ;;  %v13449_v22 = vunpack.i.l.bf16 %v13448_v3 }
 0x29d   : > { %v2443_v48 = vsel %vm857_vm7, %v13449_v22, %v13450_v30 }
 0x29e   : > { %v13458_v16 = vpop.permute.xlu0 %13457 }
 0x29f   : > { %v13459_v31 = vunpack.i.l.bf16 %v13458_v16  ;;  %v13460_v46 = vunpack.i.h.bf16 %v13458_v16 }
 0x2a1   : > { %v2442_v50 = vsel %vm857_vm7, %v13459_v31, %v13449_v22  ;;  %v2091_v31 = vld [vmem:[%s16806_s2 + $0x8] sm:$0xff] }
 0x2a2   : > { %v14993_v60 = vpop.permute.xlu0 %13467 }
 0x2a6   : > { %v14997_v62 = vpop.permute.xlu0 %13482 }
 0x2aa   : > { %v2065_v63 = vpop.permute.xlu1 %2064 }
 0x2ab   : > { %2076 = vst.msk [vmem:[#allocation2 + $0x30] sm:$0xff] %vm2075_vm13, %v2065_v63 }
 0x2ae   : > { %v2067_v54 = vpop.permute.xlu1 %2066 }
 0x2af   : > { %v14889_v1 = vsel %vm385_vm0, %v2065_v63, %v2067_v54  ;;  %v2071_v2 = vsel %vm385_vm0, %v2067_v54, %v2069_v61 }
 0x2b0   : > { %2077 = vst [vmem:[#allocation2 + $0x38] sm:$0xff] %v14889_v1  ;;  %2079 = vst.msk [vmem:[#allocation2 + $0x40] sm:$0xff] %vm2078_vm4, %v2071_v2  ;;  %2286 = vmatprep.subr.mxu0 %v14889_v1 }
 0x2b2   : > { %v13433_v6 = vpop.permute.xlu1 %13432  ;;  %v14895_v7 = vld [vmem:[#allocation2 + $0x30] sm:$0xff] }
 0x2b3   : > { %v13435_v9 = vunpack.i.h.bf16 %v13433_v6  ;;  %v13434_v10 = vunpack.i.l.bf16 %v13433_v6  ;;  %2436 = vrot.lane.b32.xlu0 %v14895_v7, %s16839_s22  ;;  %2113 = vrot.lane.b32.xlu1 %v14895_v7, %s14411_s16 }
 0x2b4   : > { %2287 = vmatpush1.msra.mxu0 %v14895_v7 }
 0x2b5   : > { %v14907_v12 = vpack.c.bf16 %v13440_v4, %v13435_v9  ;;  %v2120_v13 = vsel %vm544_vm6, %v13434_v10, %v13435_v9  ;;  %11612 = vmatmul.mubr.msk.f32.vlgmr.msra.gmra.mrb[2].mxu0 %vm2134_vm15, %v14900_v8 }
 0x2b6   : > { %v13443_v17 = vpop.permute.xlu1 %13442  ;;  %v12595_v20 = vpack.c.bf16 %v2122_v14, %v2120_v13  ;;  %2524 = vmatprep.mubr.f32.mxu0 %v14407_v0 }
 0x2b7   : > { %v13445_v11 = vunpack.i.h.bf16 %v13443_v17  ;;  %v13444_v26 = vunpack.i.l.bf16 %v13443_v17  ;;  %2617 = vrot.lane.b32.xlu0 %v14895_v7, %s16837_s24  ;;  %v14916_v29 = vld [vmem:[#allocation2 + $0x40] sm:$0xff] }
 0x2b8   : > { %2117 = vrot.lane.b32.xlu1 %v14916_v29, %s14411_s16  ;;  %12596 = vmatprep.subr.bf16.mxu1 %v12595_v20  ;;  %v13470_v20 = vunpack.i.h.bf16 %v14993_v60 }
 0x2b9   : > { %v2121_v41 = vsel %vm544_vm6, %v13445_v11, %v13439_v5  ;;  %v2119_v43 = vsel %vm544_vm6, %v13444_v26, %v13434_v10  ;;  %v13469_v11 = vunpack.i.l.bf16 %v14993_v60 }
 0x2ba   : > { %v13453_v44 = vpop.permute.xlu1 %13452  ;;  %v12597_v45 = vpack.c.bf16 %v2121_v41, %v2119_v43 }
 0x2bb   : > { %v13455_v47 = vunpack.i.h.bf16 %v13453_v44  ;;  %v13454_v42 = vunpack.i.l.bf16 %v13453_v44  ;;  %2798 = vrot.lane.b32.xlu0 %v14895_v7, %s16835_s25 }
 0x2bc   : > { %2440 = vrot.lane.b32.xlu1 %v14916_v29, %s16839_s22  ;;  %12598 = vmatpush1.bf16.msra.mxu1 %v12597_v45 }
 0x2bd   : > { %v14928_v51 = vpack.c.bf16 %v13455_v47, %v13450_v30  ;;  %v2444_v18 = vsel %vm857_vm7, %v13460_v46, %v13454_v42  ;;  %v2445_v52 = vsel %vm857_vm7, %v13454_v42, %v13455_v47 }
 0x2be   : > { %v12609_v23 = vpack.c.bf16 %v2445_v52, %v2443_v48  ;;  %v12611_v56 = vpack.c.bf16 %v2444_v18, %v2442_v50  ;;  %v2626_v48 = vsel %vm16830_vm9, %v13469_v11, %v13470_v20  ;;  %v15039_v50 = vld [vmem:[%s16806_s2 + $0x10] sm:$0xff] }
 0x2bf   : > { %2115 = vrot.lane.b32.xlu0 %v14889_v1, %s14411_s16 }
 0x2c0   : > { %13507 = vrot.lane.b32.xlu1 %v14591_v25, %s16825_s30  ;;  %12610 = vmatprep.subr.bf16.mxu0 %v12609_v23 }
 0x2c1   : > { %12612 = vmatpush1.bf16.msra.mxu0 %v12611_v56  ;;  %v13485_v56 = vunpack.i.h.bf16 %v14997_v62 }
 0x2c3   : > { %2438 = vrot.lane.b32.xlu0 %v14889_v1, %s16839_s22 }
 0x2c4   : > { %2621 = vrot.lane.b32.xlu1 %v14916_v29, %s16837_s24 }
 0x2c7   : > { %2979 = vrot.lane.b32.xlu0 %v14895_v7, %s16833_s29 }
 0x2c8   : > { %13517 = vrot.lane.b32.xlu1 %v14589_v24, %s16825_s30 }
 0x2cb   : > { %2619 = vrot.lane.b32.xlu0 %v14889_v1, %s16837_s24 }
 0x2cc   : > { %2802 = vrot.lane.b32.xlu1 %v14916_v29, %s16835_s25 }
 0x2cf   : > { %13512 = vrot.lane.b32.xlu0 %v14603_v33, %s16825_s30 }
 0x2d0   : > { %13522 = vrot.lane.b32.xlu1 %v14591_v25, %s16827_s12 }
 0x2d3   : > { %2800 = vrot.lane.b32.xlu0 %v14889_v1, %s16835_s25 }
 0x2d4   : > { %2983 = vrot.lane.b32.xlu1 %v14916_v29, %s16833_s29 }
 0x2d7   : > { %3160 = vrot.lane.b32.xlu0 %v14895_v7, %s16825_s30 }
 0x2d8   : > { %13532 = vrot.lane.b32.xlu1 %v14589_v24, %s16827_s12 }
 0x2db   : > { %2981 = vrot.lane.b32.xlu0 %v14889_v1, %s16833_s29 }
 0x2dc   : > { %3164 = vrot.lane.b32.xlu1 %v14916_v29, %s16825_s30 }
 0x2df   : > { %13527 = vrot.lane.b32.xlu0 %v14603_v33, %s16827_s12 }
 0x2e0   : > { %13537 = vrot.lane.b32.xlu1 %v14591_v25, %s16831_s13  ;;  %v2080_v25 = vld [vmem:[%s16814_s10 + $0x8] sm:$0xff] }
 0x2e3   : > { %3162 = vrot.lane.b32.xlu0 %v14889_v1, %s16825_s30 }
 0x2e4   : > { %3345 = vrot.lane.b32.xlu1 %v14916_v29, %s16827_s12 }
 0x2e7   : > { %3341 = vrot.lane.b32.xlu0 %v14895_v7, %s16827_s12 }
 0x2e8   : > { %13547 = vrot.lane.b32.xlu1 %v14589_v24, %s16831_s13  ;;  %v14989_v24 = vpop.permute.xlu1 %13462 }
 0x2e9   : > { %v13465_v10 = vunpack.i.h.bf16 %v14989_v24  ;;  %v13464_v13 = vunpack.i.l.bf16 %v14989_v24 }
 0x2eb   : > { %3343 = vrot.lane.b32.xlu0 %v14889_v1, %s16827_s12  ;;  %v2624_v41 = vsel %vm16830_vm9, %v13464_v13, %v13465_v10 }
 0x2ec   : > { %3526 = vrot.lane.b32.xlu1 %v14916_v29, %s16831_s13  ;;  %v13473_v57 = vpop.permute.xlu1 %13472 }
 0x2ed   : > { %v13475_v14 = vunpack.i.h.bf16 %v13473_v57  ;;  %v13474_v16 = vunpack.i.l.bf16 %v13473_v57 }
 0x2ef   : > { %13542 = vrot.lane.b32.xlu0 %v14603_v33, %s16831_s13  ;;  %v15001_v33 = vpop.permute.xlu0 %13497  ;;  %v2625_v43 = vsel %vm16830_vm9, %v13475_v14, %v13469_v11  ;;  %v2623_v44 = vsel %vm16830_vm9, %v13474_v16, %v13464_v13 }
 0x2f0   : > { %3692 = vperm.xlu1 %13551, %v2080_v25   ;;  %v14991_v59 = vpop.permute.xlu1 %13477  ;;  %v12618_v23 = vpack.c.bf16 %v2625_v43, %v2623_v44  ;;  %v13484_v25 = vunpack.i.l.bf16 %v14997_v62 }
 0x2f1   : > { %v13480_v18 = vunpack.i.h.bf16 %v14991_v59  ;;  %v13479_v52 = vunpack.i.l.bf16 %v14991_v59 }
 0x2f3   : > { %3524 = vrot.lane.b32.xlu0 %v14889_v1, %s16831_s13  ;;  %v2805_v14 = vsel %vm16824_vm10, %v13479_v52, %v13480_v18 }
 0x2f4   : > { %v14995_v61 = vpop.permute.xlu1 %13487 }
 0x2f7   : > { %3522 = vrot.lane.b32.xlu0 %v14895_v7, %s16831_s13 }
 0x2f8   : > { %v14999_v63 = vpop.permute.xlu1 %13492 }
 0x2f9   : > { %v13494_v43 = vunpack.i.l.bf16 %v14999_v63 }
 0x2fc   : > { %v15003_v54 = vpop.permute.xlu1 %13502 }
 0x325   : > { %v2437_v2 = vpop.permute.xlu0 %2436  ;;  %v2114_v3 = vpop.permute.xlu1 %2113 }
 0x329   : > { %v2618_v4 = vpop.permute.xlu0 %2617 }
 0x32a   : > { %v2118_v5 = vpop.permute.xlu1 %2117 }
 0x32d   : > { %v15005_v6 = vpop.permute.xlu0 %2798 }
 0x32e   : > { %v15007_v9 = vpop.permute.xlu1 %2440 }
 0x331   : > { %v2116_v17 = vpop.permute.xlu0 %2115 }
 0x332   : > { %v15013_v26 = vpop.permute.xlu1 %13507  ;;  %v2124_v30 = vsel %vm544_vm6, %v2116_v17, %v2118_v5  ;;  %v2123_v22 = vsel %vm544_vm6, %v2114_v3, %v2116_v17  ;;  %v13489_v3 = vunpack.i.l.bf16 %v14995_v61 }
 0x333   : > { %2142 = vmatprep.subr.mxu1 %v2124_v30  ;;  %v13510_v60 = vunpack.i.h.bf16 %v15013_v26 }
 0x334   : > { %2143 = vmatpush1.msra.mxu1 %v2123_v22 }
 0x335   : > { %v2439_v45 = vpop.permute.xlu0 %2438  ;;  %12599 = vmatprep.subr.bf16.mxu1 %v14409_v15  ;;  %11610 = vmatmul.mubr.msk.f32.vlgmr.msra.gmra.mrb[18].mxu1 %vm2134_vm15, %v2091_v31 }
 0x336   : > { %v15027_v46 = vpop.permute.xlu1 %2621  ;;  %12601 = vmatpush3.bf16.msra.mxu1 %v14907_v12  ;;  %v2447_v47 = vsel %vm857_vm7, %v2439_v45, %v15007_v9  ;;  %v2446_v42 = vsel %vm857_vm7, %v2437_v2, %v2439_v45  ;;  %12076 = vmatprep.mubr.msk.f32.mxu1 %vm14410_vm5, %v14407_v0  ;;  %v12616_v12 = vpack.c.bf16 %v2626_v48, %v2624_v41  ;;  %v13490_v2 = vunpack.i.h.bf16 %v14995_v61 }
 0x337   : > { %2464 = vmatprep.subr.mxu0 %v2447_v47  ;;  %12074 = vmatprep.subr.mxu1 %v14407_v0  ;;  %v2807_v61 = vsel %vm16824_vm10, %v13484_v25, %v13485_v56  ;;  %v13495_v41 = vunpack.i.h.bf16 %v14999_v63  ;;  %v13504_v47 = vunpack.i.l.bf16 %v15003_v54  ;;  %v13500_v48 = vunpack.i.h.bf16 %v15001_v33 }
 0x338   : > { %2465 = vmatpush1.msra.mxu0 %v2446_v42  ;;  %v12623_v22 = vpack.c.bf16 %v2807_v61, %v2805_v14 }
 0x339   : > { %v15048_v57 = vpop.permute.xlu0 %2979  ;;  %12617 = vmatprep.subr.bf16.mxu0 %v12616_v12  ;;  %11614 = vmatmul.mubr.msk.f32.vlgmr.msra.gmra.mrb[2].mxu0 %vm2134_vm15, %v15039_v50  ;;  %v13499_v12 = vunpack.i.l.bf16 %v15001_v33 }
 0x33a   : > { %v15054_v13 = vpop.permute.xlu1 %13517  ;;  %12075 = vmatpush3.msra.mxu1 %v2118_v5  ;;  %12619 = vmatpush1.bf16.msra.mxu0 %v12618_v23  ;;  %v2806_v5 = vsel %vm16824_vm10, %v13490_v2, %v13484_v25  ;;  %v2985_v23 = vsel %vm16851_vm2, %v13504_v47, %v13494_v43 }
 0x33b   : > { %12606 = vmatprep.subr.bf16.mxu1 %v14409_v15  ;;  %12077 = vmatmul.mubr.msk.f32.vlgmr.msra.gmra.mrb[20].mxu1 %vm2134_vm15, %v2091_v31  ;;  %v2604_v31 = vld [vmem:[%s16806_s2 + $0x18] sm:$0xff]  ;;  %v2988_v14 = vsel %vm16852_vm14, %v13499_v12, %v13500_v48 }
 0x33c   : > { %12608 = vmatpush3.bf16.msra.mxu1 %v14605_v34  ;;  %12085 = vmatprep.mubr.msk.f32.mxu1 %vm14410_vm5, %v14407_v0  ;;  %v2804_v34 = vsel %vm16824_vm10, %v13489_v3, %v13479_v52  ;;  %v12621_v3 = vpack.c.bf16 %v13470_v20, %v13465_v10 }
 0x33d   : > { %v2620_v16 = vpop.permute.xlu0 %2619  ;;  %12083 = vmatprep.subr.mxu1 %v14407_v0  ;;  %2705 = vmatprep.mubr.f32.mxu0 %v14407_v0  ;;  %v12625_v45 = vpack.c.bf16 %v2806_v5, %v2804_v34  ;;  %v13519_v34 = vunpack.i.l.bf16 %v15054_v13 }
 0x33e   : > { %v15071_v17 = vpop.permute.xlu1 %2802  ;;  %v2628_v11 = vsel %vm16830_vm9, %v2620_v16, %v15027_v46  ;;  %v2627_v30 = vsel %vm16830_vm9, %v2618_v4, %v2620_v16  ;;  %v13505_v4 = vunpack.i.h.bf16 %v15003_v54  ;;  %v2785_v16 = vld [vmem:[%s16806_s2 + $0x20] sm:$0xff] }
 0x33f   : > { %2645 = vmatprep.subr.mxu0 %v2628_v11 }
 0x340   : > { %12084 = vmatpush3.msra.mxu1 %v14916_v29  ;;  %2646 = vmatpush1.msra.mxu0 %v2627_v30  ;;  %v2987_v52 = vsel %vm16850_vm1, %v13505_v4, %v13499_v12  ;;  %v12628_v30 = vpack.c.bf16 %v13485_v56, %v13480_v18  ;;  %v2966_v18 = vld [vmem:[%s16806_s2 + $0x28] sm:$0xff] }
 0x341   : > { %v15082_v44 = vpop.permute.xlu0 %13512  ;;  %12613 = vmatprep.subr.bf16.mxu1 %v14409_v15  ;;  %12624 = vmatprep.subr.bf16.mxu0 %v12623_v22  ;;  %v12632_v20 = vpack.c.bf16 %v2987_v52, %v2985_v23  ;;  %v12635_v52 = vpack.c.bf16 %v13500_v48, %v13495_v41 }
 0x342   : > { %v15087_v42 = vpop.permute.xlu1 %13522  ;;  %12086 = vmatmul.mubr.msk.f32.vlgmr.msra.gmra.mrb[22].mxu1 %vm2134_vm15, %v14900_v8  ;;  %11616 = vmatmul.mubr.msk.f32.vlgmr.msra.gmra.mrb[2].mxu0 %vm2134_vm15, %v2604_v31  ;;  %v2986_v8 = vsel %vm16849_vm3, %v13494_v43, %v13495_v41  ;;  %v13515_v61 = vunpack.i.h.bf16 %v15082_v44  ;;  %vm16853_vm3 = vcmask 752640  }
 0x343   : > { %12615 = vmatpush3.bf16.msra.mxu1 %v14928_v51  ;;  %12626 = vmatpush1.bf16.msra.mxu0 %v12625_v45  ;;  %v12630_v24 = vpack.c.bf16 %v2988_v14, %v2986_v8  ;;  %vm16854_vm1 = vmmov %vm16853_vm3  ;;  %v13524_v47 = vunpack.i.l.bf16 %v15087_v42  ;;  %v3147_v14 = vld [vmem:[%s16806_s2 + $0x30] sm:$0xff] }
 0x344   : > { %12092 = vmatprep.subr.mxu1 %v14407_v0  ;;  %12094 = vmatprep.mubr.msk.f32.mxu1 %vm14410_vm5, %v14407_v0  ;;  %vm16855_vm2 = vmmov %vm16854_vm1 }
 0x345   : > { %v2801_v54 = vpop.permute.xlu0 %2800  ;;  %2886 = vmatprep.mubr.f32.mxu0 %v14407_v0 }
 0x346   : > { %v15104_v25 = vpop.permute.xlu1 %2983  ;;  %v2809_v51 = vsel %vm16824_vm10, %v2801_v54, %v15071_v17  ;;  %v2808_v2 = vsel %vm16824_vm10, %v15005_v6, %v2801_v54  ;;  %v13514_v6 = vunpack.i.l.bf16 %v15082_v44 }
 0x347   : > { %12093 = vmatpush3.msra.mxu1 %v15007_v9  ;;  %2826 = vmatprep.subr.mxu0 %v2809_v51  ;;  %v13509_v9 = vunpack.i.l.bf16 %v15013_v26 }
 0x348   : > { %12095 = vmatmul.mubr.msk.f32.vlgmr.msra.gmra.mrb[24].mxu1 %vm2134_vm15, %v15039_v50  ;;  %12620 = vmatprep.subr.bf16.mxu1 %v14409_v15  ;;  %v13520_v50 = vunpack.i.h.bf16 %v15054_v13  ;;  %v3169_v11 = vsel %vm16853_vm3, %v13514_v6, %v13515_v61  ;;  %vm16856_vm3 = vmmov %vm16852_vm14 }
 0x349   : > { %12622 = vmatpush3.bf16.msra.mxu1 %v12621_v3  ;;  %2827 = vmatpush1.msra.mxu0 %v2808_v2  ;;  %v3161_v10 = vpop.permute.xlu0 %3160  ;;  %v3167_v13 = vsel %vm16854_vm1, %v13509_v9, %v13510_v60  ;;  %v3166_v56 = vsel %vm16854_vm1, %v13519_v34, %v13509_v9 }
 0x34a   : > { %12631 = vmatprep.subr.bf16.mxu0 %v12630_v24  ;;  %v13533_v5 = vpop.permute.xlu1 %13532  ;;  %11618 = vmatmul.mubr.msk.f32.vlgmr.msra.gmra.mrb[2].mxu0 %vm2134_vm15, %v2785_v16  ;;  %v3168_v43 = vsel %vm16855_vm2, %v13520_v50, %v13514_v6  ;;  %vm16857_vm2 = vcmask 744448   ;;  %v3328_v50 = vld [vmem:[%s16806_s2 + $0x38] sm:$0xff] }
 0x34b   : > { %12633 = vmatpush1.bf16.msra.mxu0 %v12632_v20  ;;  %12101 = vmatprep.subr.mxu1 %v14407_v0  ;;  %v12639_v4 = vpack.c.bf16 %v3168_v43, %v3166_v56  ;;  %v13535_v23 = vunpack.i.h.bf16 %v13533_v5  ;;  %v13534_v51 = vunpack.i.l.bf16 %v13533_v5 }
 0x34c   : > { %12103 = vmatprep.mubr.msk.f32.mxu1 %vm14410_vm5, %v14407_v0  ;;  %3067 = vmatprep.mubr.f32.mxu0 %v14407_v0 }
 0x34d   : > { %12102 = vmatpush3.msra.mxu1 %v15027_v46  ;;  %v2982_v22 = vpop.permute.xlu0 %2981  ;;  %v12637_v46 = vpack.c.bf16 %v3169_v11, %v3167_v13 }
 0x34e   : > { %12104 = vmatmul.mubr.msk.f32.vlgmr.msra.gmra.mrb[26].mxu1 %vm2134_vm15, %v2604_v31  ;;  %12627 = vmatprep.subr.bf16.mxu1 %v14409_v15  ;;  %v3165_v45 = vpop.permute.xlu1 %3164  ;;  %v2990_v59 = vsel %vm16852_vm14, %v2982_v22, %v15104_v25  ;;  %v2989_v62 = vsel %vm16856_vm3, %v15048_v57, %v2982_v22  ;;  %v13525_v57 = vunpack.i.h.bf16 %v15087_v42  ;;  %vm16858_vm14 = vmmov %vm16854_vm1 }
 0x34f   : > { %12629 = vmatpush3.bf16.msra.mxu1 %v12628_v30  ;;  %3007 = vmatprep.subr.mxu0 %v2990_v59  ;;  %vm16859_vm3 = vmmov %vm16854_vm1 }
 0x350   : > { %3008 = vmatpush1.msra.mxu0 %v2989_v62  ;;  %12110 = vmatprep.subr.mxu1 %v14407_v0  ;;  %vm16860_vm1 = vmmov %vm16857_vm2 }
 0x351   : > { %v13528_v31 = vpop.permute.xlu0 %13527  ;;  %12638 = vmatprep.subr.bf16.mxu0 %v12637_v46  ;;  %12112 = vmatprep.mubr.msk.f32.mxu1 %vm14410_vm5, %v14407_v0  ;;  %vm16861_vm10 = vmmov %vm16860_vm1 }
 0x352   : > { %v13530_v12 = vunpack.i.h.bf16 %v13528_v31  ;;  %v13529_v54 = vunpack.i.l.bf16 %v13528_v31  ;;  %v15162_v8 = vpop.permute.xlu1 %13537  ;;  %11620 = vmatmul.mubr.msk.f32.vlgmr.msra.gmra.mrb[2].mxu0 %vm2134_vm15, %v2966_v18 }
 0x353   : > { %12111 = vmatpush3.msra.mxu1 %v15071_v17  ;;  %12640 = vmatpush1.bf16.msra.mxu0 %v12639_v4  ;;  %v3348_v17 = vsel %vm16860_vm1, %v13524_v47, %v13525_v57  ;;  %v13539_v20 = vunpack.i.l.bf16 %v15162_v8 }
 0x354   : > { %12113 = vmatmul.mubr.msk.f32.vlgmr.msra.gmra.mrb[28].mxu1 %vm2134_vm15, %v2785_v16  ;;  %12634 = vmatprep.subr.bf16.mxu1 %v14409_v15  ;;  %v3350_v42 = vsel %vm16857_vm2, %v13529_v54, %v13530_v12  ;;  %v3349_v41 = vsel %vm16861_vm10, %v13535_v23, %v13529_v54  ;;  %v12642_v16 = vpack.c.bf16 %v13515_v61, %v13510_v60  ;;  %vm16862_vm2 = vmmov %vm16860_vm1 }
 0x355   : > { %12636 = vmatpush3.bf16.msra.mxu1 %v12635_v52  ;;  %v3163_v2 = vpop.permute.xlu0 %3162  ;;  %12121 = vmatprep.mubr.msk.f32.mxu1 %vm14410_vm5, %v14407_v0  ;;  %v12644_v3 = vpack.c.bf16 %v3350_v42, %v3348_v17  ;;  %v3347_v6 = vsel %vm16862_vm2, %v13534_v51, %v13524_v47  ;;  %vm16863_vm10 = vmmov %vm16860_vm1  ;;  %v12649_v60 = vpack.c.bf16 %v13530_v12, %v13525_v57  ;;  %v3509_v47 = vld [vmem:[%s16806_s2 + $0x40] sm:$0xff] }
 0x356   : > { %12119 = vmatprep.subr.mxu1 %v14407_v0  ;;  %v3171_v63 = vsel %vm16858_vm14, %v3163_v2, %v3165_v45  ;;  %v3170_v33 = vsel %vm16859_vm3, %v3161_v10, %v3163_v2  ;;  %3248 = vmatprep.mubr.f32.mxu0 %v14407_v0  ;;  %v3346_v48 = vpop.permute.xlu1 %3345  ;;  %v12646_v9 = vpack.c.bf16 %v3349_v41, %v3347_v6  ;;  %vm16864_vm14 = vmmov %vm16860_vm1  ;;  %v13540_v10 = vunpack.i.h.bf16 %v15162_v8 }
 0x357   : > { %3188 = vmatprep.subr.mxu0 %v3171_v63  ;;  %vm16865_vm3 = vcmask 736256  }
 0x358   : > { %3189 = vmatpush1.msra.mxu0 %v3170_v33  ;;  %v3529_v13 = vsel %vm16865_vm3, %v13539_v20, %v13540_v10  ;;  %vm16866_vm1 = vmmov %vm16865_vm3 }
 0x359   : > { %12120 = vmatpush3.msra.mxu1 %v15104_v25  ;;  %v3342_v24 = vpop.permute.xlu0 %3341  ;;  %12645 = vmatprep.subr.bf16.mxu0 %v12644_v3  ;;  %vm16867_vm2 = vmmov %vm16866_vm1 }
 0x35a   : > { %12122 = vmatmul.mubr.msk.f32.vlgmr.msra.gmra.mrb[30].mxu1 %vm2134_vm15, %v2966_v18  ;;  %12641 = vmatprep.subr.bf16.mxu1 %v14409_v15  ;;  %v13548_v26 = vpop.permute.xlu1 %13547  ;;  %vm16870_vm3 = vmmov %vm16866_vm1 }
 0x35b   : > { %11622 = vmatmul.mubr.msk.f32.vlgmr.msra.gmra.mrb[2].mxu0 %vm2134_vm15, %v3147_v14  ;;  %12643 = vmatpush3.bf16.msra.mxu1 %v12642_v16  ;;  %v13549_v5 = vunpack.i.l.bf16 %v13548_v26  ;;  %v13550_v11 = vunpack.i.h.bf16 %v13548_v26 }
 0x35c   : > { %12647 = vmatpush1.bf16.msra.mxu0 %v12646_v9  ;;  %12128 = vmatprep.subr.mxu1 %v14407_v0 }
 0x35d   : > { %v3344_v44 = vpop.permute.xlu0 %3343  ;;  %12130 = vmatprep.mubr.msk.f32.mxu1 %vm14410_vm5, %v14407_v0  ;;  %3429 = vmatprep.mubr.f32.mxu0 %v14407_v0  ;;  %v3528_v43 = vsel %vm16866_vm1, %v13549_v5, %v13539_v20 }
 0x35e   : > { %v3352_v25 = vsel %vm16863_vm10, %v3344_v44, %v3346_v48  ;;  %v3351_v61 = vsel %vm16864_vm14, %v3342_v24, %v3344_v44  ;;  %vm16868_vm10 = vmmov %vm16866_vm1  ;;  %v3527_v31 = vpop.permute.xlu1 %3526 }
 0x35f   : > { %12129 = vmatpush3.msra.mxu1 %v3165_v45  ;;  %3369 = vmatprep.subr.mxu0 %v3352_v25  ;;  %vm16869_vm14 = vmmov %vm16866_vm1 }
 0x360   : > { %12131 = vmatmul.mubr.msk.f32.vlgmr.msra.gmra.mrb[32].mxu1 %vm2134_vm15, %v3147_v14  ;;  %12648 = vmatprep.subr.bf16.mxu1 %v14409_v15 }
 0x361   : > { %3370 = vmatpush1.msra.mxu0 %v3351_v61  ;;  %12650 = vmatpush3.bf16.msra.mxu1 %v12649_v60  ;;  %v13543_v34 = vpop.permute.xlu0 %13542 }
 0x362   : > { %v13545_v30 = vunpack.i.h.bf16 %v13543_v34  ;;  %v13544_v22 = vunpack.i.l.bf16 %v13543_v34  ;;  %12137 = vmatprep.subr.mxu1 %v14407_v0  ;;  %12139 = vmatprep.mubr.msk.f32.mxu1 %vm14410_vm5, %v14407_v0 }
 0x363   : > { %11624 = vmatmul.mubr.msk.f32.vlgmr.msra.gmra.mrb[2].mxu0 %vm2134_vm15, %v3328_v50 }
 0x364   : > { %v3530_v45 = vsel %vm16867_vm2, %v13550_v11, %v13544_v22  ;;  %v12656_v59 = vpack.c.bf16 %v13545_v30, %v13540_v10  ;;  %v3531_v62 = vsel %vm16868_vm10, %v13544_v22, %v13545_v30  ;;  %3610 = vmatprep.mubr.f32.mxu0 %v14407_v0  ;;  %vm16829_vm10 = vcmask 261120  }
 0x365   : > { %12138 = vmatpush3.msra.mxu1 %v3346_v48  ;;  %v3525_v46 = vpop.permute.xlu0 %3524  ;;  %v12651_v18 = vpack.c.bf16 %v3531_v62, %v3529_v13  ;;  %v12653_v56 = vpack.c.bf16 %v3530_v45, %v3528_v43 }
 0x366   : > { %12140 = vmatmul.mubr.msk.f32.vlgmr.msra.gmra.mrb[34].mxu1 %vm2134_vm15, %v3328_v50  ;;  %12655 = vmatprep.subr.bf16.mxu1 %v14409_v15  ;;  %v3533_v4 = vsel %vm16869_vm14, %v3525_v46, %v3527_v31  ;;  %vm16872_vm14 = vcmask 891904  }
 0x367   : > { %12657 = vmatpush3.bf16.msra.mxu1 %v12656_v59  ;;  %12652 = vmatprep.subr.bf16.mxu0 %v12651_v18 }
 0x368   : > { %12654 = vmatpush1.bf16.msra.mxu0 %v12653_v56  ;;  %12146 = vmatprep.subr.mxu1 %v14407_v0 }
 0x369   : > { %v3523_v57 = vpop.permute.xlu0 %3522  ;;  %3550 = vmatprep.subr.mxu0 %v3533_v4  ;;  %12148 = vmatprep.mubr.msk.f32.mxu1 %vm14410_vm5, %v14407_v0 }
 0x36a   : > { %v3532_v12 = vsel %vm16870_vm3, %v3523_v57, %v3525_v46  ;;  %vm16873_vm3 = vmmov %vm16872_vm14 }
 0x36b   : > { %12147 = vmatpush3.msra.mxu1 %v3527_v31 }
 0x36c   : > { %12149 = vmatmul.mubr.msk.f32.vlgmr.msra.gmra.mrb[36].mxu1 %vm2134_vm15, %v3509_v47  ;;  %3551 = vmatpush1.msra.mxu0 %v3532_v12 }
 0x36d   : > { %11626 = vmatmul.mubr.msk.f32.vlgmr.msra.gmra.mrb[2].mxu0 %vm2134_vm15, %v3509_v47  ;;  %12666 = vmatprep.subr.bf16.mxu1 %v14409_v15 }
 0x36e   : > { %12159 = vmatprep.mubr.msk.f32.mxu1 %vm14410_vm5, %v14407_v0  ;;  %3866 = vmatprep.mubr.f32.mxu0 %v14407_v0 }
 0x36f   : > { %v3693_v50 = vpop.permute.xlu1 %3692 }
 0x408   : > { %v2204_v54 = vpop.f32.mrb[18].mxu1 }
 0x409   : > { %v2206_v8 = vpop.f32.mrb[19].mxu1 }
 0x40e   : > { %v2275_v52 = vpop.f32.mrb[20].mxu1 }
 0x40f   : > { %v12078_v42 = vpop.f32.mrb[21].mxu1 }
 0x415   : > { %v2419_v23 = vpop.f32.mrb[22].mxu1 }
 0x416   : > { %v2420_v51 = vadd.f32 %v2419_v23, %v2275_v52  ;;  %v12087_v2 = vpop.f32.mrb[23].mxu1  ;;  %v14326_v52 = vld [vmem:[#allocation2 + $0x10] sm:$0xff]  ;;  %v15244_v23 = vld [vmem:[#allocation2 + $0x20] sm:$0xff] }
 0x41b   : > { %v2597_v63 = vpop.f32.mrb[24].mxu1 }
 0x41c   : > { %v2603_v33 = vadd.f32 %v2597_v63, %v2420_v51  ;;  %v12096_v17 = vpop.f32.mrb[25].mxu1  ;;  %v14328_v51 = vld [vmem:[#allocation2 + $0x28] sm:$0xff]  ;;  %v14329_v63 = vld [vmem:[#allocation2 + $0x18] sm:$0xff] }
 0x41d   : > { %v15247_v2 = vpack.i.bf16 %v14328_v51, %v15244_v23 }
 0x421   : > { %v2778_v41 = vpop.f32.mrb[26].mxu1 }
 0x422   : > { %v2784_v48 = vadd.f32 %v2778_v41, %v2603_v33  ;;  %v12105_v3 = vpop.f32.mrb[27].mxu1  ;;  %v14330_v33 = vld [vmem:[#allocation2] sm:$0xff]  ;;  %v15257_v41 = vpack.i.bf16 %v14916_v29, %v14889_v1 }
 0x423   : > { %v15249_v17 = vpack.i.bf16 %v14329_v63, %v14330_v33 }
 0x427   : > { %v2959_v14 = vpop.f32.mrb[28].mxu1 }
 0x428   : > { %v2965_v16 = vadd.f32 %v2959_v14, %v2784_v48  ;;  %v12114_v6 = vpop.f32.mrb[29].mxu1 }
 0x42d   : > { %v3140_v24 = vpop.f32.mrb[30].mxu1 }
 0x42e   : > { %v3146_v9 = vadd.f32 %v3140_v24, %v2965_v16  ;;  %v12123_v26 = vpop.f32.mrb[31].mxu1 }
 0x433   : > { %v3321_v44 = vpop.f32.mrb[32].mxu1 }
 0x434   : > { %v3327_v25 = vadd.f32 %v3321_v44, %v3146_v9  ;;  %v12132_v61 = vpop.f32.mrb[33].mxu1 }
 0x439   : > { %v3502_v60 = vpop.f32.mrb[34].mxu1 }
 0x43a   : > { %v3508_v10 = vadd.f32 %v3502_v60, %v3327_v25  ;;  %v12141_v20 = vpop.f32.mrb[35].mxu1 }
 0x43f   : > { %v3683_v5 = vpop.f32.mrb[36].mxu1 }
 0x440   : > { %v3689_v34 = vadd.f32 %v3683_v5, %v3508_v10  ;;  %v3612_v11 = vpop.f32.mrb[2].mxu0  ;;  %v12150_v30 = vpop.f32.mrb[37].mxu1  ;;  %v15292_v5 = vld [vmem:[#allocation2 + $0x30] sm:$0xff] }
 0x441   : > { %v13084_v22 = vadd.f32 %v3612_v11, %v2204_v54  ;;  %v3614_v13 = vpop.f32.mrb[3].mxu0 }
 0x442   : > { %v3697_v43 = vadd.f32 %v3693_v50, %v3689_v34  ;;  %v13085_v45 = vadd.f32 %v3614_v13, %v2206_v8  ;;  %v15236_v8 = vld [vmem:[#allocation2 + $0x8] sm:$0xff] }
 0x443   : > { %v3695_v59 = vadd.f32 %v13084_v22, %v3693_v50  ;;  %v15239_v42 = vpack.i.bf16 %v14326_v52, %v15236_v8 }
 0x444   : > { %v3696_v62 = vadd.f32 %v13085_v45, %v3693_v50  ;;  %v3703_v18 = vmul.f32 0.2, %v3697_v43  ;;  %vm3700_vm2 = vcmp.ge.f32.partialorder %v3697_v43, 0.0 }
 0x445   : > { %vm3698_vm15 = vcmp.ge.f32.partialorder %v3695_v59, 0.0  ;;  %v3701_v46 = vmul.f32 0.2, %v3695_v59 }
 0x446   : > { %vm3699_vm1 = vcmp.ge.f32.partialorder %v3696_v62, 0.0  ;;  %v3702_v56 = vmul.f32 0.2, %v3696_v62  ;;  %v3706_v12 = vsel %vm3700_vm2, %v3697_v43, %v3703_v18  ;;  %v3727_v18 = vld [vmem:[%s16814_s10 + $0x10] sm:$0xff] }
 0x447   : > { %v3704_v31 = vsel %vm3698_vm15, %v3695_v59, %v3701_v46  ;;  %v3709_v54 = vmul.f32 %v14830_v21, %v3706_v12  ;;  %vm16874_vm15 = vmmov %vm16873_vm3 }
 0x448   : > { %v3707_v4 = vmul.f32 %v14850_v53, %v3704_v31  ;;  %v3705_v57 = vsel %vm3699_vm1, %v3696_v62, %v3702_v56  ;;  %vm16875_vm1 = vmmov %vm16873_vm3 }
 0x449   : > { %v3708_v47 = vmul.f32 %v14862_v58, %v3705_v57  ;;  %vm16876_vm2 = vmmov %vm16875_vm1 }
 0x44a   : > { %3713 = vrot.lane.b32.xlu0 %v3707_v4, %s16871_s14 }
 0x44b   : > { %3715 = vrot.lane.b32.xlu1 %v3708_v47, %s16871_s14 }
 0x44e   : > { %3717 = vrot.lane.b32.xlu0 %v3709_v54, %s16871_s14 }
 0x44f   : > { %13553 = vrot.lane.b32.xlu1 %v15239_v42, %s14411_s16 }
 0x452   : > { %13558 = vrot.lane.b32.xlu0 %v15247_v2, %s14411_s16 }
 0x453   : > { %13563 = vrot.lane.b32.xlu1 %v15249_v17, %s14411_s16 }
 0x456   : > { %13568 = vrot.lane.b32.xlu0 %v15257_v41, %s14411_s16 }
 0x457   : > { %13573 = vrot.lane.b32.xlu1 %v15239_v42, %s16839_s22 }
 0x45a   : > { %13578 = vrot.lane.b32.xlu0 %v15247_v2, %s16839_s22 }
 0x45b   : > { %13583 = vrot.lane.b32.xlu1 %v15249_v17, %s16839_s22 }
 0x45e   : > { %13588 = vrot.lane.b32.xlu0 %v15257_v41, %s16839_s22 }
 0x45f   : > { %13593 = vrot.lane.b32.xlu1 %v15239_v42, %s16837_s24 }
 0x462   : > { %13598 = vrot.lane.b32.xlu0 %v15247_v2, %s16837_s24 }
 0x463   : > { %13603 = vrot.lane.b32.xlu1 %v15249_v17, %s16837_s24 }
 0x466   : > { %13608 = vrot.lane.b32.xlu0 %v15257_v41, %s16837_s24 }
 0x467   : > { %13613 = vrot.lane.b32.xlu1 %v15239_v42, %s16835_s25 }
 0x46a   : > { %13618 = vrot.lane.b32.xlu0 %v15247_v2, %s16835_s25 }
 0x4bc   : > { %v3714_v48 = vpop.permute.xlu0 %3713 }
 0x4bd   : > { %3724 = vst.msk [vmem:[#allocation2 + $0x48] sm:$0xff] %vm2075_vm13, %v3714_v48  ;;  %v3716_v3 = vpop.permute.xlu1 %3715 }
 0x4be   : > { %v15283_v14 = vsel %vm385_vm0, %v3714_v48, %v3716_v3 }
 0x4bf   : > { %3725 = vst [vmem:[#allocation2 + $0x50] sm:$0xff] %v15283_v14 }
 0x4c0   : > { %v3718_v16 = vpop.permute.xlu0 %3717 }
 0x4c1   : > { %v3720_v6 = vsel %vm385_vm0, %v3716_v3, %v3718_v16  ;;  %v13554_v24 = vpop.permute.xlu1 %13553 }
 0x4c2   : > { %3726 = vst.msk [vmem:[#allocation2 + $0x58] sm:$0xff] %vm2078_vm4, %v3720_v6  ;;  %v13556_v9 = vunpack.i.h.bf16 %v13554_v24  ;;  %v13555_v26 = vunpack.i.l.bf16 %v13554_v24 }
 0x4c4   : > { %v13559_v44 = vpop.permute.xlu0 %13558  ;;  %v15288_v25 = vld [vmem:[#allocation2 + $0x48] sm:$0xff]  ;;  %v3779_v22 = vsel %vm544_vm6, %v13555_v26, %v13556_v9 }
 0x4c5   : > { %v13561_v61 = vunpack.i.h.bf16 %v13559_v44  ;;  %v13560_v60 = vunpack.i.l.bf16 %v13559_v44  ;;  %v13564_v10 = vpop.permute.xlu1 %13563  ;;  %v13622_v20 = vpack.i.bf16 %v15288_v25, %v14895_v7  ;;  %v15296_v11 = vpack.i.bf16 %v15288_v25, %v15292_v5 }
 0x4c6   : > { %v13566_v50 = vunpack.i.h.bf16 %v13564_v10  ;;  %v13565_v34 = vunpack.i.l.bf16 %v13564_v10 }
 0x4c7   : > { %v12667_v30 = vpack.c.bf16 %v13561_v61, %v13556_v9  ;;  %13623 = vrot.lane.b32.xlu0 %v13622_v20, %s14411_s16  ;;  %v3781_v13 = vsel %vm544_vm6, %v13560_v60, %v13561_v61 }
 0x4c8   : > { %v3778_v43 = vsel %vm544_vm6, %v13565_v34, %v13555_v26  ;;  %v3780_v45 = vsel %vm544_vm6, %v13566_v50, %v13560_v60  ;;  %v12658_v7 = vpack.c.bf16 %v3781_v13, %v3779_v22  ;;  %v13569_v56 = vpop.permute.xlu0 %13568 }
 0x4c9   : > { %12668 = vmatpush3.bf16.msra.mxu1 %v12667_v30  ;;  %v12660_v59 = vpack.c.bf16 %v3780_v45, %v3778_v43  ;;  %v15303_v62 = vld [vmem:[#allocation2 + $0x58] sm:$0xff]  ;;  %v15374_v4 = vpop.permute.xlu1 %13573  ;;  %v13571_v33 = vunpack.i.h.bf16 %v13569_v56  ;;  %v3741_v30 = vld [vmem:[%s16807_s3 + $0x8] sm:$0xff] }
 0x4ca   : > { %12659 = vmatprep.subr.bf16.mxu0 %v12658_v7  ;;  %v15307_v46 = vpack.i.bf16 %v15303_v62, %v15283_v14  ;;  %12669 = vmatprep.subr.bf16.mxu1 %v14409_v15  ;;  %v13576_v45 = vunpack.i.h.bf16 %v15374_v4  ;;  %v13575_v7 = vunpack.i.l.bf16 %v15374_v4  ;;  %v12684_v32 = vpack.c.bf16 %v15303_v62, %v14916_v29  ;;  %v3740_v29 = vld [vmem:[%s16807_s3] sm:$0xff] }
 0x4cb   : > { %13628 = vrot.lane.b32.xlu0 %v13622_v20, %s16839_s22  ;;  %12661 = vmatpush1.bf16.msra.mxu0 %v12660_v59 }
 0x4cc   : > { %13638 = vrot.lane.b32.xlu1 %v15307_v46, %s14411_s16  ;;  %v15372_v31 = vpop.permute.xlu0 %13578 }
 0x4cd   : > { %v13584_v47 = vpop.permute.xlu1 %13583  ;;  %v13581_v22 = vunpack.i.h.bf16 %v15372_v31  ;;  %v13580_v13 = vunpack.i.l.bf16 %v15372_v31  ;;  %v12676_v31 = vpack.c.bf16 %v15283_v14, %v14889_v1  ;;  %v4113_v1 = vsel %vm857_vm7, %v13575_v7, %v13576_v45 }
 0x4cf   : > { %13633 = vrot.lane.b32.xlu0 %v13622_v20, %s16837_s24  ;;  %v4115_v4 = vsel %vm857_vm7, %v13580_v13, %v13581_v22 }
 0x4d0   : > { %13643 = vrot.lane.b32.xlu1 %v15249_v17, %s16835_s25  ;;  %v15376_v57 = vpop.permute.xlu0 %13588  ;;  %v12686_v62 = vpack.c.bf16 %v4115_v4, %v4113_v1 }
 0x4d1   : > { %v15380_v54 = vpop.permute.xlu1 %13593 }
 0x4d3   : > { %13648 = vrot.lane.b32.xlu0 %v15257_v41, %s16835_s25 }
 0x4d4   : > { %13658 = vrot.lane.b32.xlu1 %v15239_v42, %s16833_s29  ;;  %v15378_v12 = vpop.permute.xlu0 %13598 }
 0x4d7   : > { %13653 = vrot.lane.b32.xlu0 %v13622_v20, %s16835_s25 }
 0x4d8   : > { %13668 = vrot.lane.b32.xlu1 %v15249_v17, %s16833_s29  ;;  %v15382_v52 = vpop.permute.xlu0 %13608 }
 0x4d9   : > { %v13611_v1 = vunpack.i.h.bf16 %v15382_v52 }
 0x4db   : > { %13663 = vrot.lane.b32.xlu0 %v15247_v2, %s16833_s29 }
 0x4dc   : > { %13683 = vrot.lane.b32.xlu1 %v15307_v46, %s16839_s22  ;;  %v15386_v51 = vpop.permute.xlu0 %13618 }
 0x4df   : > { %13673 = vrot.lane.b32.xlu0 %v15257_v41, %s16833_s29 }
 0x4e0   : > { %13688 = vrot.lane.b32.xlu1 %v15239_v42, %s16825_s30 }
 0x4e3   : > { %13678 = vrot.lane.b32.xlu0 %v13622_v20, %s16833_s29 }
 0x4e4   : > { %13698 = vrot.lane.b32.xlu1 %v15307_v46, %s16837_s24 }
 0x4e7   : > { %13693 = vrot.lane.b32.xlu0 %v15247_v2, %s16825_s30 }
 0x4e8   : > { %13703 = vrot.lane.b32.xlu1 %v15249_v17, %s16825_s30 }
 0x4eb   : > { %13708 = vrot.lane.b32.xlu0 %v15257_v41, %s16825_s30 }
 0x4ec   : > { %13718 = vrot.lane.b32.xlu1 %v15307_v46, %s16835_s25 }
 0x4ef   : > { %13713 = vrot.lane.b32.xlu0 %v13622_v20, %s16825_s30 }
 0x4f0   : > { %13723 = vrot.lane.b32.xlu1 %v15239_v42, %s16827_s12 }
 0x4f3   : > { %13728 = vrot.lane.b32.xlu0 %v15247_v2, %s16827_s12 }
 0x4f4   : > { %13733 = vrot.lane.b32.xlu1 %v15307_v46, %s16833_s29 }
 0x4f7   : > { %13743 = vrot.lane.b32.xlu0 %v15257_v41, %s16827_s12 }
 0x4f8   : > { %13738 = vrot.lane.b32.xlu1 %v15249_v17, %s16827_s12 }
 0x4fb   : > { %13748 = vrot.lane.b32.xlu0 %v13622_v20, %s16827_s12 }
 0x4fc   : > { %13753 = vrot.lane.b32.xlu1 %v15307_v46, %s16825_s30  ;;  %s16908_s30 = smov 92  }
 0x4ff   : > { %13763 = vrot.lane.b32.xlu0 %v15247_v2, %s16831_s13 }
 0x500   : > { %13758 = vrot.lane.b32.xlu1 %v15239_v42, %s16831_s13  ;;  %v15384_v42 = vpop.permute.xlu1 %13603 }
 0x503   : > { %13778 = vrot.lane.b32.xlu0 %v15257_v41, %s16831_s13 }
 0x504   : > { %13768 = vrot.lane.b32.xlu1 %v15307_v46, %s16827_s12  ;;  %v15388_v63 = vpop.permute.xlu1 %13613 }
 0x507   : > { %13788 = vrot.lane.b32.xlu0 %v13622_v20, %s16831_s13 }
 0x508   : > { %13773 = vrot.lane.b32.xlu1 %v15249_v17, %s16831_s13  ;;  %v13570_v17 = vunpack.i.l.bf16 %v13569_v56  ;;  %v13585_v56 = vunpack.i.l.bf16 %v13584_v47 }
 0x50a   : > { %v3783_v9 = vsel %vm544_vm6, %v13570_v17, %v13571_v33 }
 0x50c   : > { %13783 = vrot.lane.b32.xlu1 %v15307_v46, %s16831_s13 }
 0x510   : > { %5433 = vperm.xlu1 %13551, %v3727_v18   ;;  %v13586_v18 = vunpack.i.h.bf16 %v13584_v47 }
 0x539   : > { %v13624_v2 = vpop.permute.xlu0 %13623 }
 0x53a   : > { %v13625_v41 = vunpack.i.l.bf16 %v13624_v2  ;;  %v13626_v16 = vunpack.i.h.bf16 %v13624_v2 }
 0x53c   : > { %v3782_v26 = vsel %vm544_vm6, %v13625_v41, %v13570_v17  ;;  %v4114_v17 = vsel %vm857_vm7, %v13586_v18, %v13580_v13  ;;  %v13591_v41 = vunpack.i.h.bf16 %v15376_v57 }
 0x53d   : > { %v15390_v48 = vpop.permute.xlu0 %13628 }
 0x53e   : > { %v13639_v3 = vpop.permute.xlu1 %13638 }
 0x53f   : > { %v13641_v6 = vunpack.i.h.bf16 %v13639_v3  ;;  %v13640_v24 = vunpack.i.l.bf16 %v13639_v3  ;;  %v13590_v3 = vunpack.i.l.bf16 %v15376_v57 }
 0x541   : > { %v3784_v44 = vsel %vm544_vm6, %v13626_v16, %v13640_v24  ;;  %v12670_v61 = vpack.c.bf16 %v13641_v6, %v13571_v33  ;;  %v15395_v60 = vpop.permute.xlu0 %13633  ;;  %v3785_v10 = vsel %vm544_vm6, %v13640_v24, %v13641_v6  ;;  %v4112_v33 = vsel %vm857_vm7, %v13585_v56, %v13575_v7 }
 0x542   : > { %v15398_v20 = vpop.permute.xlu1 %13643  ;;  %v12662_v50 = vpack.c.bf16 %v3785_v10, %v3783_v9  ;;  %v12664_v34 = vpack.c.bf16 %v3784_v44, %v3782_v26  ;;  %v13601_v16 = vunpack.i.h.bf16 %v15378_v12  ;;  %v13600_v6 = vunpack.i.l.bf16 %v15378_v12 }
 0x543   : > { %12671 = vmatpush3.bf16.msra.mxu1 %v12670_v61  ;;  %v13630_v24 = vunpack.i.l.bf16 %v15390_v48  ;;  %v12695_v9 = vpack.c.bf16 %v13581_v22, %v13576_v45  ;;  %v13596_v44 = vunpack.i.h.bf16 %v15380_v54  ;;  %v13595_v61 = vunpack.i.l.bf16 %v15380_v54 }
 0x544   : > { %12663 = vmatprep.subr.bf16.mxu0 %v12662_v50  ;;  %12680 = vmatprep.subr.bf16.mxu1 %v14409_v15  ;;  %v13606_v10 = vunpack.i.h.bf16 %v15384_v42  ;;  %v12688_v57 = vpack.c.bf16 %v4114_v17, %v4112_v33  ;;  %v13605_v12 = vunpack.i.l.bf16 %v15384_v42  ;;  %v4117_v54 = vsel %vm857_vm7, %v13590_v3, %v13591_v41  ;;  %v4087_v33 = vld [vmem:[%s16807_s3 + $0x10] sm:$0xff] }
 0x545   : > { %v15406_v43 = vpop.permute.xlu0 %13648  ;;  %12665 = vmatpush1.bf16.msra.mxu0 %v12664_v34  ;;  %v13631_v34 = vunpack.i.h.bf16 %v15390_v48  ;;  %v4116_v13 = vsel %vm857_vm7, %v13630_v24, %v13590_v3  ;;  %v4307_v45 = vsel %vm16830_vm9, %v13600_v6, %v13601_v16  ;;  %v13635_v3 = vunpack.i.l.bf16 %v15395_v60 }
 0x546   : > { %v15410_v59 = vpop.permute.xlu1 %13658  ;;  %12673 = vmatprep.subr.bf16.mxu0 %v14613_v38  ;;  %12160 = vmatmul.mubr.msk.f32.vlgmr.msra.gmra.mrb[38].mxu1 %vm16829_vm10, %v3741_v30 }
 0x547   : > { %12682 = vmatpush3.bf16.msra.mxu1 %v12681_v39  ;;  %12170 = vmatprep.mubr.msk.f32.mxu1 %vm14410_vm5, %v14407_v0  ;;  %v14331_v39 = vld [vmem:[#allocation2 + $0x30] sm:$0xff] }
 0x548   : > { %11628 = vmatmul.mubr.msk.f32.vlgmr.msra.gmra.mrb[4].mxu0 %vm16829_vm10, %v3741_v30  ;;  %12683 = vmatprep.subr.bf16.mxu1 %v14409_v15  ;;  %v12678_v47 = vpack.c.bf16 %v15288_v25, %v14331_v39  ;;  %v4304_v39 = vsel %vm16830_vm9, %v13605_v12, %v13595_v61 }
 0x549   : > { %v15424_v2 = vpop.permute.xlu0 %13653  ;;  %12675 = vmatpush1.bf16.msra.mxu0 %v14595_v27  ;;  %4010 = vmatprep.mubr.f32.mxu0 %v14407_v0 }
 0x54a   : > { %v15430_v35 = vpop.permute.xlu1 %13668  ;;  %12677 = vmatprep.subr.bf16.mxu0 %v12676_v31 }
 0x54b   : > { %12685 = vmatpush3.bf16.msra.mxu1 %v12684_v32  ;;  %v4305_v32 = vsel %vm16830_vm9, %v13595_v61, %v13596_v44  ;;  %v13615_v61 = vunpack.i.l.bf16 %v15388_v63 }
 0x54c   : > { %12694 = vmatprep.subr.bf16.mxu1 %v14409_v15  ;;  %v12700_v17 = vpack.c.bf16 %v4307_v45, %v4305_v32 }
 0x54d   : > { %v15445_v26 = vpop.permute.xlu0 %13663  ;;  %12679 = vmatpush1.bf16.msra.mxu0 %v12678_v47  ;;  %v4306_v47 = vsel %vm16830_vm9, %v13606_v10, %v13600_v6  ;;  %v12709_v6 = vpack.c.bf16 %v13601_v16, %v13596_v44  ;;  %v13636_v10 = vunpack.i.h.bf16 %v15395_v60 }
 0x54e   : > { %v13684_v50 = vpop.permute.xlu1 %13683  ;;  %12171 = vmatmul.mubr.msk.f32.vlgmr.msra.gmra.mrb[40].mxu1 %vm16829_vm10, %v3740_v29  ;;  %12687 = vmatprep.subr.bf16.mxu0 %v12686_v62  ;;  %v13620_v62 = vunpack.i.l.bf16 %v15386_v51 }
 0x54f   : > { %v13686_v30 = vunpack.i.h.bf16 %v13684_v50  ;;  %v13685_v22 = vunpack.i.l.bf16 %v13684_v50  ;;  %12696 = vmatpush3.bf16.msra.mxu1 %v12695_v9  ;;  %12181 = vmatprep.mubr.msk.f32.mxu1 %vm14410_vm5, %v14407_v0  ;;  %v13616_v9 = vunpack.i.h.bf16 %v15388_v63  ;;  %v13646_v50 = vunpack.i.h.bf16 %v15398_v20 }
 0x550   : > { %11630 = vmatmul.mubr.msk.f32.vlgmr.msra.gmra.mrb[4].mxu0 %vm16829_vm10, %v3740_v29  ;;  %12697 = vmatprep.subr.bf16.mxu1 %v14409_v15  ;;  %v13621_v29 = vunpack.i.h.bf16 %v15386_v51  ;;  %v12702_v51 = vpack.c.bf16 %v4306_v47, %v4304_v39  ;;  %v13650_v39 = vunpack.i.l.bf16 %v15406_v43  ;;  %v13655_v47 = vunpack.i.l.bf16 %v15424_v2 }
 0x551   : > { %v4118_v42 = vsel %vm857_vm7, %v13631_v34, %v13685_v22  ;;  %v12698_v7 = vpack.c.bf16 %v13686_v30, %v13591_v41  ;;  %v15461_v48 = vpop.permute.xlu0 %13673  ;;  %12689 = vmatpush1.bf16.msra.mxu0 %v12688_v57  ;;  %v4119_v18 = vsel %vm857_vm7, %v13685_v22, %v13686_v30  ;;  %4199 = vmatprep.mubr.f32.mxu0 %v14407_v0  ;;  %v13610_v41 = vunpack.i.l.bf16 %v15382_v52 }
 0x552   : > { %v15465_v56 = vpop.permute.xlu1 %13688  ;;  %v12690_v31 = vpack.c.bf16 %v4119_v18, %v4117_v54  ;;  %v12692_v4 = vpack.c.bf16 %v4118_v42, %v4116_v13  ;;  %v13645_v57 = vunpack.i.l.bf16 %v15398_v20  ;;  %v4499_v60 = vsel %vm16872_vm14, %v13620_v62, %v13621_v29  ;;  %vm16877_vm14 = vmmov %vm16875_vm1 }
 0x553   : > { %12699 = vmatpush3.bf16.msra.mxu1 %v12698_v7  ;;  %v4308_v44 = vsel %vm16830_vm9, %v13635_v3, %v13610_v41  ;;  %v4309_v63 = vsel %vm16830_vm9, %v13610_v41, %v13611_v1  ;;  %v4497_v42 = vsel %vm16873_vm3, %v13615_v61, %v13616_v9  ;;  %v4498_v18 = vsel %vm16875_vm1, %v13646_v50, %v13620_v62 }
 0x554   : > { %12691 = vmatprep.subr.bf16.mxu0 %v12690_v31  ;;  %12708 = vmatprep.subr.bf16.mxu1 %v14409_v15  ;;  %v4496_v7 = vsel %vm16874_vm15, %v13645_v57, %v13615_v61  ;;  %v13651_v31 = vunpack.i.h.bf16 %v15406_v43  ;;  %v12714_v32 = vpack.c.bf16 %v4499_v60, %v4497_v42  ;;  %v13661_v62 = vunpack.i.h.bf16 %v15410_v59  ;;  %vm16879_vm15 = vmmov %vm16875_vm1 }
 0x555   : > { %v15479_v24 = vpop.permute.xlu0 %13678  ;;  %12693 = vmatpush1.bf16.msra.mxu0 %v12692_v4  ;;  %v4279_v4 = vld [vmem:[%s16807_s3 + $0x18] sm:$0xff]  ;;  %v12716_v43 = vpack.c.bf16 %v4498_v18, %v4496_v7  ;;  %v13656_v61 = vunpack.i.h.bf16 %v15424_v2  ;;  %vm16878_vm3 = vcmask 883712   ;;  %v13670_v2 = vunpack.i.l.bf16 %v15430_v35 }
 0x556   : > { %v13699_v52 = vpop.permute.xlu1 %13698  ;;  %12182 = vmatmul.mubr.msk.f32.vlgmr.msra.gmra.mrb[42].mxu1 %vm16829_vm10, %v4087_v33  ;;  %12701 = vmatprep.subr.bf16.mxu0 %v12700_v17  ;;  %v12723_v17 = vpack.c.bf16 %v13621_v29, %v13616_v9  ;;  %v4500_v29 = vsel %vm16876_vm2, %v13655_v47, %v13650_v39  ;;  %v13671_v9 = vunpack.i.h.bf16 %v15430_v35  ;;  %vm16880_vm2 = vmmov %vm16878_vm3  ;;  %v13680_v42 = vunpack.i.l.bf16 %v15479_v24 }
 0x557   : > { %v13701_v12 = vunpack.i.h.bf16 %v13699_v52  ;;  %v13700_v16 = vunpack.i.l.bf16 %v13699_v52  ;;  %12710 = vmatpush3.bf16.msra.mxu1 %v12709_v6  ;;  %12192 = vmatprep.mubr.msk.f32.mxu1 %vm14410_vm5, %v14407_v0  ;;  %v13660_v6 = vunpack.i.l.bf16 %v15410_v59  ;;  %v4501_v52 = vsel %vm16877_vm14, %v13650_v39, %v13651_v31  ;;  %vm16881_vm14 = vmmov %vm16880_vm2 }
 0x558   : > { %11632 = vmatmul.mubr.msk.f32.vlgmr.msra.gmra.mrb[4].mxu0 %vm16829_vm10, %v4087_v33  ;;  %12711 = vmatprep.subr.bf16.mxu1 %v14409_v15  ;;  %v13665_v33 = vunpack.i.l.bf16 %v15445_v26 }
 0x559   : > { %v4310_v34 = vsel %vm16830_vm9, %v13636_v10, %v13700_v16  ;;  %v12712_v30 = vpack.c.bf16 %v13701_v12, %v13611_v1  ;;  %v15495_v20 = vpop.permute.xlu0 %13693  ;;  %12703 = vmatpush1.bf16.msra.mxu0 %v12702_v51  ;;  %v4311_v22 = vsel %vm16830_vm9, %v13700_v16, %v13701_v12  ;;  %4391 = vmatprep.mubr.f32.mxu0 %v14407_v0  ;;  %v13666_v1 = vunpack.i.h.bf16 %v15445_v26 }
 0x55a   : > { %v15499_v13 = vpop.permute.xlu1 %13703  ;;  %v12704_v54 = vpack.c.bf16 %v4311_v22, %v4309_v63  ;;  %v12706_v45 = vpack.c.bf16 %v4310_v34, %v4308_v44  ;;  %v13676_v16 = vunpack.i.h.bf16 %v15461_v48  ;;  %v13675_v44 = vunpack.i.l.bf16 %v15461_v48 }
 0x55b   : > { %12713 = vmatpush3.bf16.msra.mxu1 %v12712_v30  ;;  %v4691_v59 = vsel %vm16878_vm3, %v13665_v33, %v13666_v1  ;;  %v4690_v35 = vsel %vm16880_vm2, %v13671_v9, %v13665_v33  ;;  %v13691_v30 = vunpack.i.h.bf16 %v15465_v56  ;;  %v13690_v22 = vunpack.i.l.bf16 %v15465_v56  ;;  %vm16882_vm3 = vmmov %vm16880_vm2 }
 0x55c   : > { %12705 = vmatprep.subr.bf16.mxu0 %v12704_v54  ;;  %12722 = vmatprep.subr.bf16.mxu1 %v14409_v15  ;;  %v4471_v54 = vld [vmem:[%s16807_s3 + $0x20] sm:$0xff]  ;;  %v13696_v48 = vunpack.i.h.bf16 %v15495_v20  ;;  %v13695_v7 = vunpack.i.l.bf16 %v15495_v20  ;;  %v12737_v56 = vpack.c.bf16 %v13666_v1, %v13661_v62  ;;  %v13706_v20 = vunpack.i.h.bf16 %v15499_v13 }
 0x55d   : > { %v15513_v41 = vpop.permute.xlu0 %13708  ;;  %12707 = vmatpush1.bf16.msra.mxu0 %v12706_v45  ;;  %v4689_v45 = vsel %vm16881_vm14, %v13660_v6, %v13661_v62 }
 0x55e   : > { %v13719_v3 = vpop.permute.xlu1 %13718  ;;  %12193 = vmatmul.mubr.msk.f32.vlgmr.msra.gmra.mrb[44].mxu1 %vm16829_vm10, %v4279_v4  ;;  %12715 = vmatprep.subr.bf16.mxu0 %v12714_v32  ;;  %v12728_v18 = vpack.c.bf16 %v4691_v59, %v4689_v45  ;;  %v13681_v32 = vunpack.i.h.bf16 %v15479_v24 }
 0x55f   : > { %v13721_v10 = vunpack.i.h.bf16 %v13719_v3  ;;  %v13720_v26 = vunpack.i.l.bf16 %v13719_v3  ;;  %12724 = vmatpush3.bf16.msra.mxu1 %v12723_v17  ;;  %12203 = vmatprep.mubr.msk.f32.mxu1 %vm14410_vm5, %v14407_v0  ;;  %v13705_v17 = vunpack.i.l.bf16 %v15499_v13 }
 0x560   : > { %11634 = vmatmul.mubr.msk.f32.vlgmr.msra.gmra.mrb[4].mxu0 %vm16829_vm10, %v4279_v4  ;;  %12725 = vmatprep.subr.bf16.mxu1 %v14409_v15 }
 0x561   : > { %v4502_v51 = vsel %vm16879_vm15, %v13656_v61, %v13720_v26  ;;  %v12726_v50 = vpack.c.bf16 %v13721_v10, %v13651_v31  ;;  %v15529_v57 = vpop.permute.xlu0 %13713  ;;  %12717 = vmatpush1.bf16.msra.mxu0 %v12716_v43  ;;  %v4503_v12 = vsel %vm16875_vm1, %v13720_v26, %v13721_v10  ;;  %4583 = vmatprep.mubr.f32.mxu0 %v14407_v0  ;;  %vm16883_vm15 = vmmov %vm16880_vm2  ;;  %v13711_v26 = vunpack.i.h.bf16 %v15513_v41 }
 0x562   : > { %v15535_v63 = vpop.permute.xlu1 %13723  ;;  %v12718_v60 = vpack.c.bf16 %v4503_v12, %v4501_v52  ;;  %v12720_v34 = vpack.c.bf16 %v4502_v51, %v4500_v29  ;;  %v4688_v31 = vsel %vm16882_vm3, %v13670_v2, %v13660_v6  ;;  %v4693_v33 = vsel %vm16883_vm15, %v13675_v44, %v13676_v16  ;;  %vm16884_vm1 = vmmov %vm16880_vm2  ;;  %v4663_v12 = vld [vmem:[%s16807_s3 + $0x28] sm:$0xff] }
 0x563   : > { %12727 = vmatpush3.bf16.msra.mxu1 %v12726_v50  ;;  %v12730_v47 = vpack.c.bf16 %v4690_v35, %v4688_v31  ;;  %v4692_v1 = vsel %vm16884_vm1, %v13680_v42, %v13675_v44  ;;  %vm16885_vm2 = vcmask 752640   ;;  %vm16887_vm3 = vmmov %vm16884_vm1  ;;  %v13710_v29 = vunpack.i.l.bf16 %v15513_v41 }
 0x564   : > { %12719 = vmatprep.subr.bf16.mxu0 %v12718_v60  ;;  %12736 = vmatprep.subr.bf16.mxu1 %v14409_v15  ;;  %v4881_v24 = vsel %vm16885_vm2, %v13690_v22, %v13691_v30  ;;  %vm16886_vm14 = vmmov %vm16885_vm2  ;;  %v13715_v50 = vunpack.i.l.bf16 %v15529_v57  ;;  %v13726_v44 = vunpack.i.h.bf16 %v15535_v63  ;;  %v13725_v60 = vunpack.i.l.bf16 %v15535_v63 }
 0x565   : > { %v15549_v4 = vpop.permute.xlu0 %13728  ;;  %12721 = vmatpush1.bf16.msra.mxu0 %v12720_v34  ;;  %v4883_v62 = vsel %vm16886_vm14, %v13695_v7, %v13696_v48  ;;  %vm16888_vm15 = vmmov %vm16884_vm1  ;;  %v12751_v35 = vpack.c.bf16 %v13696_v48, %v13691_v30 }
 0x566   : > { %v13734_v39 = vpop.permute.xlu1 %13733  ;;  %12204 = vmatmul.mubr.msk.f32.vlgmr.msra.gmra.mrb[46].mxu1 %vm16829_vm10, %v4471_v54  ;;  %12729 = vmatprep.subr.bf16.mxu0 %v12728_v18  ;;  %vm16889_vm1 = vmmov %vm16885_vm2  ;;  %v13731_v41 = vunpack.i.h.bf16 %v15549_v4  ;;  %v13730_v34 = vunpack.i.l.bf16 %v15549_v4 }
 0x567   : > { %v13736_v3 = vunpack.i.h.bf16 %v13734_v39  ;;  %v13735_v43 = vunpack.i.l.bf16 %v13734_v39  ;;  %12738 = vmatpush3.bf16.msra.mxu1 %v12737_v56  ;;  %12214 = vmatprep.mubr.msk.f32.mxu1 %vm14410_vm5, %v14407_v0  ;;  %v4880_v2 = vsel %vm16889_vm1, %v13705_v17, %v13690_v22  ;;  %vm16890_vm2 = vmmov %vm16889_vm1 }
 0x568   : > { %11636 = vmatmul.mubr.msk.f32.vlgmr.msra.gmra.mrb[4].mxu0 %vm16829_vm10, %v4471_v54  ;;  %12739 = vmatprep.subr.bf16.mxu1 %v14409_v15  ;;  %v4882_v51 = vsel %vm16890_vm2, %v13706_v20, %v13695_v7  ;;  %v13716_v54 = vunpack.i.h.bf16 %v15529_v57  ;;  %vm16891_vm14 = vmmov %vm16889_vm1 }
 0x569   : > { %v4694_v6 = vsel %vm16887_vm3, %v13681_v32, %v13735_v43  ;;  %v12740_v61 = vpack.c.bf16 %v13736_v3, %v13676_v16  ;;  %v15564_v13 = vpop.permute.xlu0 %13743  ;;  %12731 = vmatpush1.bf16.msra.mxu0 %v12730_v47  ;;  %v4695_v10 = vsel %vm16888_vm15, %v13735_v43, %v13736_v3  ;;  %4775 = vmatprep.mubr.f32.mxu0 %v14407_v0  ;;  %vm16892_vm3 = vmmov %vm16889_vm1  ;;  %vm16893_vm15 = vcmask 744448  }
 0x56a   : > { %v13739_v9 = vpop.permute.xlu1 %13738  ;;  %v12732_v52 = vpack.c.bf16 %v4695_v10, %v4693_v33  ;;  %v12734_v59 = vpack.c.bf16 %v4694_v6, %v4692_v1  ;;  %v12742_v16 = vpack.c.bf16 %v4883_v62, %v4881_v24  ;;  %v12744_v42 = vpack.c.bf16 %v4882_v51, %v4880_v2  ;;  %vm16894_vm1 = vmmov %vm16893_vm15  ;;  %v4855_v6 = vld [vmem:[%s16807_s3 + $0x30] sm:$0xff] }
 0x56b   : > { %12741 = vmatpush3.bf16.msra.mxu1 %v12740_v61  ;;  %v4885_v7 = vsel %vm16891_vm14, %v13710_v29, %v13711_v26  ;;  %v13741_v63 = vunpack.i.h.bf16 %v13739_v9  ;;  %v13740_v18 = vunpack.i.l.bf16 %v13739_v9  ;;  %v4884_v30 = vsel %vm16892_vm3, %v13715_v50, %v13710_v29  ;;  %vm16895_vm14 = vmmov %vm16890_vm2 }
 0x56c   : > { %12733 = vmatprep.subr.bf16.mxu0 %v12732_v52  ;;  %12750 = vmatprep.subr.bf16.mxu1 %v14409_v15  ;;  %v5073_v57 = vsel %vm16893_vm15, %v13725_v60, %v13726_v44  ;;  %v5075_v48 = vsel %vm16894_vm1, %v13730_v34, %v13731_v41  ;;  %v13746_v33 = vunpack.i.h.bf16 %v15564_v13  ;;  %v13745_v20 = vunpack.i.l.bf16 %v15564_v13  ;;  %vm16896_vm3 = vmmov %vm16894_vm1 }
 0x56d   : > { %v13749_v22 = vpop.permute.xlu0 %13748  ;;  %12735 = vmatpush1.bf16.msra.mxu0 %v12734_v59  ;;  %v5072_v1 = vsel %vm16896_vm3, %v13740_v18, %v13725_v60  ;;  %vm16897_vm15 = vmmov %vm16894_vm1  ;;  %v12756_v61 = vpack.c.bf16 %v5075_v48, %v5073_v57  ;;  %v12765_v13 = vpack.c.bf16 %v13731_v41, %v13726_v44 }
 0x56e   : > { %v13754_v45 = vpop.permute.xlu1 %13753  ;;  %12215 = vmatmul.mubr.msk.f32.vlgmr.msra.gmra.mrb[48].mxu1 %vm16829_vm10, %v4663_v12  ;;  %12743 = vmatprep.subr.bf16.mxu0 %v12742_v16  ;;  %v5074_v24 = vsel %vm16897_vm15, %v13741_v63, %v13730_v34  ;;  %v13750_v62 = vunpack.i.l.bf16 %v13749_v22  ;;  %v5077_v2 = vsel %vm16894_vm1, %v13745_v20, %v13746_v33  ;;  %v13751_v51 = vunpack.i.h.bf16 %v13749_v22  ;;  %vm16901_vm15 = vmmov %vm16894_vm1 }
 0x56f   : > { %v13756_v31 = vunpack.i.h.bf16 %v13754_v45  ;;  %v13755_v56 = vunpack.i.l.bf16 %v13754_v45  ;;  %12752 = vmatpush3.bf16.msra.mxu1 %v12751_v35  ;;  %12225 = vmatprep.mubr.msk.f32.mxu1 %vm14410_vm5, %v14407_v0  ;;  %v12758_v16 = vpack.c.bf16 %v5074_v24, %v5072_v1 }
 0x570   : > { %11638 = vmatmul.mubr.msk.f32.vlgmr.msra.gmra.mrb[4].mxu0 %vm16829_vm10, %v4663_v12  ;;  %12753 = vmatprep.subr.bf16.mxu1 %v14409_v15 }
 0x571   : > { %v4886_v4 = vsel %vm16890_vm2, %v13716_v54, %v13755_v56  ;;  %v12754_v32 = vpack.c.bf16 %v13756_v31, %v13711_v26  ;;  %v13764_v39 = vpop.permute.xlu0 %13763  ;;  %12745 = vmatpush1.bf16.msra.mxu0 %v12744_v42  ;;  %v4887_v47 = vsel %vm16895_vm14, %v13755_v56, %v13756_v31  ;;  %4967 = vmatprep.mubr.f32.mxu0 %v14407_v0  ;;  %vm16898_vm2 = vmmov %vm16894_vm1  ;;  %vm16899_vm14 = vcmask 736256   ;;  %v5047_v31 = vld [vmem:[%s16807_s3 + $0x38] sm:$0xff] }
 0x572   : > { %v13759_v17 = vpop.permute.xlu1 %13758  ;;  %v12746_v3 = vpack.c.bf16 %v4887_v47, %v4885_v7  ;;  %v12748_v43 = vpack.c.bf16 %v4886_v4, %v4884_v30  ;;  %v13766_v10 = vunpack.i.h.bf16 %v13764_v39  ;;  %v13765_v26 = vunpack.i.l.bf16 %v13764_v39  ;;  %vm16900_vm3 = vmmov %vm16899_vm14 }
 0x573   : > { %12755 = vmatpush3.bf16.msra.mxu1 %v12754_v32  ;;  %v13761_v29 = vunpack.i.h.bf16 %v13759_v17  ;;  %v13760_v9 = vunpack.i.l.bf16 %v13759_v17  ;;  %v5076_v60 = vsel %vm16898_vm2, %v13750_v62, %v13745_v20  ;;  %vm16902_vm2 = vmmov %vm16900_vm3 }
 0x574   : > { %12747 = vmatprep.subr.bf16.mxu0 %v12746_v3  ;;  %12764 = vmatprep.subr.bf16.mxu1 %v14409_v15  ;;  %v5267_v41 = vsel %vm16900_vm3, %v13765_v26, %v13766_v10  ;;  %vm16904_vm3 = vmmov %vm16902_vm2 }
 0x575   : > { %v13779_v52 = vpop.permute.xlu0 %13778  ;;  %12749 = vmatpush1.bf16.msra.mxu0 %v12748_v43  ;;  %v5265_v44 = vsel %vm16899_vm14, %v13760_v9, %v13761_v29  ;;  %v12779_v4 = vpack.c.bf16 %v13766_v10, %v13761_v29  ;;  %vm16903_vm14 = vmmov %vm16902_vm2  ;;  %v15635_v29 = vld [vmem:[#allocation2 + $0x38] sm:$0xff] }
 0x576   : > { %v13769_v59 = vpop.permute.xlu1 %13768  ;;  %12226 = vmatmul.mubr.msk.f32.vlgmr.msra.gmra.mrb[50].mxu1 %vm16829_vm10, %v4855_v6  ;;  %12757 = vmatprep.subr.bf16.mxu0 %v12756_v61  ;;  %v13781_v56 = vunpack.i.h.bf16 %v13779_v52  ;;  %v13780_v30 = vunpack.i.l.bf16 %v13779_v52  ;;  %v12770_v48 = vpack.c.bf16 %v5267_v41, %v5265_v44 }
 0x577   : > { %v13771_v50 = vunpack.i.h.bf16 %v13769_v59  ;;  %v13770_v12 = vunpack.i.l.bf16 %v13769_v59  ;;  %12766 = vmatpush3.bf16.msra.mxu1 %v12765_v13  ;;  %12236 = vmatprep.mubr.msk.f32.mxu1 %vm14410_vm5, %v14407_v0  ;;  %v12804_v13 = vpack.c.bf16 %v15288_v25, %v15292_v5 }
 0x578   : > { %11640 = vmatmul.mubr.msk.f32.vlgmr.msra.gmra.mrb[4].mxu0 %vm16829_vm10, %v4855_v6  ;;  %12767 = vmatprep.subr.bf16.mxu1 %v14409_v15 }
 0x579   : > { %v5078_v34 = vsel %vm16901_vm15, %v13751_v51, %v13770_v12  ;;  %v12768_v35 = vpack.c.bf16 %v13771_v50, %v13746_v33  ;;  %v13789_v22 = vpop.permute.xlu0 %13788  ;;  %12759 = vmatpush1.bf16.msra.mxu0 %v12758_v16  ;;  %v5079_v54 = vsel %vm16894_vm1, %v13770_v12, %v13771_v50  ;;  %5159 = vmatprep.mubr.f32.mxu0 %v14407_v0  ;;  %vm16905_vm15 = vmmov %vm16902_vm2 }
 0x57a   : > { %v13774_v45 = vpop.permute.xlu1 %13773  ;;  %v12760_v42 = vpack.c.bf16 %v5079_v54, %v5077_v2  ;;  %v12762_v7 = vpack.c.bf16 %v5078_v34, %v5076_v60  ;;  %v13790_v57 = vunpack.i.l.bf16 %v13789_v22  ;;  %v13791_v20 = vunpack.i.h.bf16 %v13789_v22  ;;  %vm16906_vm1 = vmmov %vm16902_vm2 }
 0x57b   : > { %v13776_v63 = vunpack.i.h.bf16 %v13774_v45  ;;  %v13775_v18 = vunpack.i.l.bf16 %v13774_v45  ;;  %12769 = vmatpush3.bf16.msra.mxu1 %v12768_v35  ;;  %v5269_v1 = vsel %vm16905_vm15, %v13780_v30, %v13781_v56 }
 0x57c   : > { %12761 = vmatprep.subr.bf16.mxu0 %v12760_v42  ;;  %12778 = vmatprep.subr.bf16.mxu1 %v14409_v15  ;;  %v5268_v43 = vsel %vm16904_vm3, %v13790_v57, %v13780_v30 }
 0x57d   : > { %v5264_v32 = vsel %vm16902_vm2, %v13775_v18, %v13760_v9  ;;  %v5266_v39 = vsel %vm16903_vm14, %v13776_v63, %v13765_v26  ;;  %12763 = vmatpush1.bf16.msra.mxu0 %v12762_v7  ;;  %vm16907_vm2 = vmmov %vm16906_vm1  ;;  %v5239_v26 = vld [vmem:[%s16807_s3 + $0x40] sm:$0xff]  ;;  %v12802_v9 = vpack.c.bf16 %v15283_v14, %v15635_v29 }
 0x57e   : > { %v13784_v47 = vpop.permute.xlu1 %13783  ;;  %12237 = vmatmul.mubr.msk.f32.vlgmr.msra.gmra.mrb[52].mxu1 %vm16829_vm10, %v5047_v31  ;;  %12771 = vmatprep.subr.bf16.mxu0 %v12770_v48  ;;  %v12772_v33 = vpack.c.bf16 %v5266_v39, %v5264_v32 }
 0x57f   : > { %v13786_v17 = vunpack.i.h.bf16 %v13784_v47  ;;  %v13785_v3 = vunpack.i.l.bf16 %v13784_v47  ;;  %12780 = vmatpush3.bf16.msra.mxu1 %v12779_v4  ;;  %12247 = vmatprep.mubr.msk.f32.mxu1 %vm14410_vm5, %v14407_v0 }
 0x580   : > { %11642 = vmatmul.mubr.msk.f32.vlgmr.msra.gmra.mrb[4].mxu0 %vm16829_vm10, %v5047_v31  ;;  %12781 = vmatprep.subr.bf16.mxu1 %v14409_v15 }
 0x581   : > { %v5270_v24 = vsel %vm16906_vm1, %v13791_v20, %v13785_v3  ;;  %v12782_v62 = vpack.c.bf16 %v13786_v17, %v13781_v56  ;;  %12773 = vmatpush1.bf16.msra.mxu0 %v12772_v33  ;;  %v5271_v6 = vsel %vm16907_vm2, %v13785_v3, %v13786_v17  ;;  %5351 = vmatprep.mubr.f32.mxu0 %v14407_v0  ;;  %vm5556_vm1 = vcmask 326656  }
 0x582   : > { %v12774_v61 = vpack.c.bf16 %v5271_v6, %v5269_v1  ;;  %v12776_v10 = vpack.c.bf16 %v5270_v24, %v5268_v43  ;;  %v14332_v6 = vld [vmem:[#allocation2 + $0x10] sm:$0xff]  ;;  %vm16909_vm2 = vcmask 891904  }
 0x583   : > { %12783 = vmatpush3.bf16.msra.mxu1 %v12782_v62 }
 0x584   : > { %12775 = vmatprep.subr.bf16.mxu0 %v12774_v61  ;;  %v15651_v61 = vpack.i.bf16 %v14332_v6, %v15236_v8 }
 0x585   : > { %12777 = vmatpush1.bf16.msra.mxu0 %v12776_v10  ;;  %v14333_v10 = vld [vmem:[#allocation2 + $0x28] sm:$0xff] }
 0x586   : > { %12248 = vmatmul.mubr.msk.f32.vlgmr.msra.gmra.mrb[54].mxu1 %vm16829_vm10, %v5239_v26  ;;  %12799 = vmatprep.subr.bf16.mxu0 %v14613_v38 }
 0x587   : > { %5624 = vmatprep.mubr.f32.mxu1 %v14407_v0 }
 0x588   : > { %11644 = vmatmul.mubr.msk.f32.vlgmr.msra.gmra.mrb[4].mxu0 %vm16829_vm10, %v5239_v26  ;;  %v15657_v26 = vpack.i.bf16 %v14333_v10, %v15244_v23 }
 0x589   : > { %12801 = vmatpush1.bf16.msra.mxu0 %v14595_v27  ;;  %5768 = vmatprep.mubr.f32.mxu0 %v14407_v0 }
 0x58a   : > { %12803 = vmatprep.subr.bf16.mxu0 %v12802_v9  ;;  %v15659_v9 = vld [vmem:[#allocation2 + $0x40] sm:$0xff] }
 0x58b   : > { %v15667_v8 = vpack.i.bf16 %v15659_v9, %v15635_v29 }
 0x58d   : > { %12805 = vmatpush1.bf16.msra.mxu0 %v12804_v13 }
 0x58f   : > { %v5434_v30 = vpop.permute.xlu1 %5433 }
 0x619   : > { %v3939_v52 = vpop.f32.mrb[38].mxu1 }
 0x61a   : > { %v12161_v38 = vpop.f32.mrb[39].mxu1 }
 0x621   : > { %v4083_v59 = vpop.f32.mrb[40].mxu1 }
 0x622   : > { %v4084_v2 = vadd.f32 %v4083_v59, %v3939_v52  ;;  %v12172_v51 = vpop.f32.mrb[41].mxu1 }
 0x629   : > { %v4272_v50 = vpop.f32.mrb[42].mxu1 }
 0x62a   : > { %v4278_v12 = vadd.f32 %v4272_v50, %v4084_v2  ;;  %v12183_v16 = vpop.f32.mrb[43].mxu1 }
 0x62b   : > { %v15720_v16 = vld [vmem:[%s16808_s4] sm:$0xff] }
 0x631   : > { %v4464_v60 = vpop.f32.mrb[44].mxu1 }
 0x632   : > { %v4470_v44 = vadd.f32 %v4464_v60, %v4278_v12  ;;  %v12194_v14 = vpop.f32.mrb[45].mxu1 }
 0x639   : > { %v4656_v41 = vpop.f32.mrb[46].mxu1 }
 0x63a   : > { %v4662_v27 = vadd.f32 %v4656_v41, %v4470_v44  ;;  %v12205_v34 = vpop.f32.mrb[47].mxu1 }
 0x641   : > { %v4848_v35 = vpop.f32.mrb[48].mxu1 }
 0x642   : > { %v4854_v22 = vadd.f32 %v4848_v35, %v4662_v27  ;;  %v12216_v54 = vpop.f32.mrb[49].mxu1 }
 0x649   : > { %v5040_v45 = vpop.f32.mrb[50].mxu1 }
 0x64a   : > { %v5046_v25 = vadd.f32 %v5040_v45, %v4854_v22  ;;  %v12227_v5 = vpop.f32.mrb[51].mxu1 }
 0x651   : > { %v5232_v42 = vpop.f32.mrb[52].mxu1 }
 0x652   : > { %v5238_v7 = vadd.f32 %v5232_v42, %v5046_v25  ;;  %v12238_v63 = vpop.f32.mrb[53].mxu1 }
 0x659   : > { %v5424_v18 = vpop.f32.mrb[54].mxu1 }
 0x65a   : > { %v5430_v31 = vadd.f32 %v5424_v18, %v5238_v7  ;;  %v12249_v56 = vpop.f32.mrb[55].mxu1 }
 0x65b   : > { %v5353_v57 = vpop.f32.mrb[4].mxu0 }
 0x65c   : > { %v5438_v48 = vadd.f32 %v5434_v30, %v5430_v31  ;;  %v5436_v4 = vadd.f32 %v5434_v30, %v5353_v57  ;;  %v5355_v32 = vpop.f32.mrb[5].mxu0 }
 0x65d   : > { %v5437_v39 = vadd.f32 %v5434_v30, %v5355_v32 }
 0x65e   : > { %v5444_v47 = vmul.f32 0.2, %v5438_v48  ;;  %vm5439_vm14 = vcmp.ge.f32.partialorder %v5436_v4, 0.0  ;;  %v5442_v33 = vmul.f32 0.2, %v5436_v4  ;;  %vm5441_vm3 = vcmp.ge.f32.partialorder %v5438_v48, 0.0 }
 0x65f   : > { %vm5440_vm15 = vcmp.ge.f32.partialorder %v5437_v39, 0.0  ;;  %v5443_v20 = vmul.f32 0.2, %v5437_v39 }
 0x660   : > { %v5445_v17 = vsel %vm5439_vm14, %v5436_v4, %v5442_v33  ;;  %v5447_v1 = vsel %vm5441_vm3, %v5438_v48, %v5444_v47  ;;  %vm16910_vm14 = vmmov %vm16909_vm2 }
 0x661   : > { %v5448_v3 = vmul.f32 %v14850_v53, %v5445_v17  ;;  %v5446_v43 = vsel %vm5440_vm15, %v5437_v39, %v5443_v20  ;;  %v5450_v62 = vmul.f32 %v14830_v21, %v5447_v1  ;;  %vm16911_vm3 = vmmov %vm16909_vm2 }
 0x662   : > { %v5449_v24 = vmul.f32 %v14862_v58, %v5446_v43  ;;  %vm16912_vm15 = vmmov %vm16909_vm2 }
 0x663   : > { %5454 = vrot.lane.b32.xlu0 %v5448_v3, %s16871_s14 }
 0x664   : > { %5456 = vrot.lane.b32.xlu1 %v5449_v24, %s16871_s14 }
 0x667   : > { %5458 = vrot.lane.b32.xlu0 %v5450_v62, %s16871_s14 }
 0x668   : > { %13793 = vrot.lane.b32.xlu1 %v15651_v61, %s14411_s16 }
 0x66b   : > { %13798 = vrot.lane.b32.xlu0 %v15657_v26, %s14411_s16 }
 0x66c   : > { %13803 = vrot.lane.b32.xlu1 %v14597_v28, %s14411_s16 }
 0x66f   : > { %13808 = vrot.lane.b32.xlu0 %v15667_v8, %s14411_s16 }
 0x670   : > { %13813 = vrot.lane.b32.xlu1 %v15307_v46, %s14411_s16 }
 0x673   : > { %13818 = vrot.lane.b32.xlu0 %v15296_v11, %s14411_s16 }
 0x674   : > { %13828 = vrot.lane.b32.xlu1 %v15657_v26, %s16839_s22 }
 0x677   : > { %13823 = vrot.lane.b32.xlu0 %v15651_v61, %s16839_s22 }
 0x678   : > { %13838 = vrot.lane.b32.xlu1 %v15667_v8, %s16839_s22 }
 0x67b   : > { %13833 = vrot.lane.b32.xlu0 %v14597_v28, %s16839_s22 }
 0x67c   : > { %13848 = vrot.lane.b32.xlu1 %v15296_v11, %s16839_s22 }
 0x67f   : > { %13843 = vrot.lane.b32.xlu0 %v15307_v46, %s16839_s22 }
 0x680   : > { %13858 = vrot.lane.b32.xlu1 %v15657_v26, %s16837_s24 }
 0x683   : > { %13853 = vrot.lane.b32.xlu0 %v15651_v61, %s16837_s24 }
 0x684   : > { %13863 = vrot.lane.b32.xlu1 %v14597_v28, %s16837_s24 }
 0x687   : > { %13868 = vrot.lane.b32.xlu0 %v15667_v8, %s16837_s24 }
 0x688   : > { %13873 = vrot.lane.b32.xlu1 %v15307_v46, %s16837_s24 }
 0x68b   : > { %13878 = vrot.lane.b32.xlu0 %v15296_v11, %s16837_s24 }
 0x68c   : > { %13883 = vrot.lane.b32.xlu1 %v15651_v61, %s16835_s25 }
 0x68f   : > { %13888 = vrot.lane.b32.xlu0 %v15657_v26, %s16835_s25 }
 0x690   : > { %13898 = vrot.lane.b32.xlu1 %v15667_v8, %s16835_s25 }
 0x693   : > { %13893 = vrot.lane.b32.xlu0 %v14597_v28, %s16835_s25 }
 0x6d5   : > { %v5455_v23 = vpop.permute.xlu0 %5454 }
 0x6d6   : > { %5465 = vst.msk [vmem:[#allocation2 + $0x60] sm:$0xff] %vm2075_vm13, %v5455_v23  ;;  %v5457_v29 = vpop.permute.xlu1 %5456 }
 0x6d7   : > { %v15709_v13 = vsel %vm385_vm0, %v5455_v23, %v5457_v29 }
 0x6d8   : > { %5466 = vst [vmem:[#allocation2 + $0x68] sm:$0xff] %v15709_v13  ;;  %5712 = vmatprep.subr.mxu0 %v15709_v13 }
 0x6d9   : > { %v5459_v52 = vpop.permute.xlu0 %5458 }
 0x6da   : > { %v5461_v38 = vsel %vm385_vm0, %v5457_v29, %v5459_v52  ;;  %v13794_v59 = vpop.permute.xlu1 %13793 }
 0x6db   : > { %5467 = vst.msk [vmem:[#allocation2 + $0x70] sm:$0xff] %vm2078_vm4, %v5461_v38  ;;  %v13796_v2 = vunpack.i.h.bf16 %v13794_v59  ;;  %v13795_v51 = vunpack.i.l.bf16 %v13794_v59 }
 0x6dd   : > { %v13799_v50 = vpop.permute.xlu0 %13798  ;;  %v15715_v12 = vld [vmem:[#allocation2 + $0x60] sm:$0xff]  ;;  %v5532_v35 = vsel %vm544_vm6, %v13795_v51, %v13796_v2 }
 0x6de   : > { %v13801_v60 = vunpack.i.h.bf16 %v13799_v50  ;;  %v13800_v44 = vunpack.i.l.bf16 %v13799_v50  ;;  %5525 = vrot.lane.b32.xlu1 %v15715_v12, %s14411_s16  ;;  %v13804_v14 = vpop.permute.xlu1 %13803  ;;  %5870 = vrot.lane.b32.xlu0 %v15715_v12, %s16839_s22 }
 0x6df   : > { %v13806_v41 = vunpack.i.h.bf16 %v13804_v14  ;;  %v13805_v27 = vunpack.i.l.bf16 %v13804_v14  ;;  %5713 = vmatpush1.msra.mxu0 %v15715_v12 }
 0x6e0   : > { %v15727_v34 = vpack.c.bf16 %v13801_v60, %v13796_v2  ;;  %v5534_v22 = vsel %vm544_vm6, %v13800_v44, %v13801_v60  ;;  %11648 = vmatmul.mubr.msk.f32.vlgmr.msra.gmra.mrb[6].mxu0 %vm5556_vm1, %v15720_v16 }
 0x6e1   : > { %v5531_v54 = vsel %vm544_vm6, %v13805_v27, %v13795_v51  ;;  %v5533_v45 = vsel %vm544_vm6, %v13806_v41, %v13800_v44  ;;  %v13809_v25 = vpop.permute.xlu0 %13808  ;;  %v12784_v5 = vpack.c.bf16 %v5534_v22, %v5532_v35  ;;  %5968 = vmatprep.mubr.f32.mxu0 %v14407_v0 }
 0x6e2   : > { %v13811_v42 = vunpack.i.h.bf16 %v13809_v25  ;;  %v13810_v7 = vunpack.i.l.bf16 %v13809_v25  ;;  %6073 = vrot.lane.b32.xlu1 %v15715_v12, %s16837_s24  ;;  %v13814_v63 = vpop.permute.xlu1 %13813  ;;  %v15738_v18 = vld [vmem:[#allocation2 + $0x70] sm:$0xff]  ;;  %v12786_v31 = vpack.c.bf16 %v5533_v45, %v5531_v54 }
 0x6e3   : > { %v13816_v56 = vunpack.i.h.bf16 %v13814_v63  ;;  %v13815_v30 = vunpack.i.l.bf16 %v13814_v63  ;;  %5529 = vrot.lane.b32.xlu0 %v15738_v18, %s14411_s16  ;;  %12785 = vmatprep.subr.bf16.mxu1 %v12784_v5 }
 0x6e4   : > { %12787 = vmatpush1.bf16.msra.mxu1 %v12786_v31  ;;  %v5536_v57 = vsel %vm544_vm6, %v13810_v7, %v13811_v42 }
 0x6e5   : > { %v15743_v48 = vpack.c.bf16 %v13816_v56, %v13811_v42  ;;  %v13819_v4 = vpop.permute.xlu0 %13818  ;;  %v5538_v32 = vsel %vm544_vm6, %v13815_v30, %v13816_v56 }
 0x6e6   : > { %v13821_v39 = vunpack.i.h.bf16 %v13819_v4  ;;  %v13820_v47 = vunpack.i.l.bf16 %v13819_v4  ;;  %5527 = vrot.lane.b32.xlu1 %v15709_v13, %s14411_s16  ;;  %v13829_v33 = vpop.permute.xlu1 %13828  ;;  %v12788_v20 = vpack.c.bf16 %v5538_v32, %v5536_v57 }
 0x6e7   : > { %13903 = vrot.lane.b32.xlu0 %v15307_v46, %s16835_s25  ;;  %v13831_v43 = vunpack.i.h.bf16 %v13829_v33  ;;  %v13830_v1 = vunpack.i.l.bf16 %v13829_v33 }
 0x6e8   : > { %v5537_v17 = vsel %vm544_vm6, %v13821_v39, %v13815_v30  ;;  %v5535_v3 = vsel %vm544_vm6, %v13820_v47, %v13810_v7  ;;  %12789 = vmatprep.subr.bf16.mxu1 %v12788_v20 }
 0x6e9   : > { %v13824_v24 = vpop.permute.xlu0 %13823  ;;  %v12790_v62 = vpack.c.bf16 %v5537_v17, %v5535_v3  ;;  %v5879_v38 = vsel %vm857_vm7, %v13830_v1, %v13831_v43 }
 0x6ea   : > { %v13826_v6 = vunpack.i.h.bf16 %v13824_v24  ;;  %v13825_v10 = vunpack.i.l.bf16 %v13824_v24  ;;  %13908 = vrot.lane.b32.xlu1 %v15296_v11, %s16835_s25  ;;  %v13839_v23 = vpop.permute.xlu1 %13838 }
 0x6eb   : > { %13913 = vrot.lane.b32.xlu0 %v15651_v61, %s16833_s29  ;;  %12791 = vmatpush1.bf16.msra.mxu1 %v12790_v62  ;;  %v13841_v44 = vunpack.i.h.bf16 %v13839_v23  ;;  %v13840_v14 = vunpack.i.l.bf16 %v13839_v23  ;;  %v5485_v62 = vld [vmem:[%s16808_s4 + $0x8] sm:$0xff] }
 0x6ec   : > { %v15756_v29 = vpack.c.bf16 %v13831_v43, %v13826_v6  ;;  %v5877_v52 = vsel %vm857_vm7, %v13825_v10, %v13826_v6 }
 0x6ed   : > { %v13834_v59 = vpop.permute.xlu0 %13833  ;;  %v12812_v2 = vpack.c.bf16 %v5879_v38, %v5877_v52  ;;  %v5881_v42 = vsel %vm857_vm7, %v13840_v14, %v13841_v44 }
 0x6ee   : > { %v13836_v51 = vunpack.i.h.bf16 %v13834_v59  ;;  %v13835_v50 = vunpack.i.l.bf16 %v13834_v59  ;;  %13918 = vrot.lane.b32.xlu1 %v15657_v26, %s16833_s29  ;;  %v13849_v60 = vpop.permute.xlu1 %13848 }
 0x6ef   : > { %6276 = vrot.lane.b32.xlu0 %v15715_v12, %s16835_s25  ;;  %12813 = vmatprep.subr.bf16.mxu0 %v12812_v2  ;;  %v13850_v35 = vunpack.i.l.bf16 %v13849_v60  ;;  %v13851_v45 = vunpack.i.h.bf16 %v13849_v60  ;;  %v14334_v2 = vld [vmem:[#allocation2 + $0x58] sm:$0xff] }
 0x6f0   : > { %v5878_v41 = vsel %vm857_vm7, %v13836_v51, %v13830_v1  ;;  %v5876_v27 = vsel %vm857_vm7, %v13835_v50, %v13825_v10  ;;  %v12810_v51 = vpack.c.bf16 %v14334_v2, %v15659_v9 }
 0x6f1   : > { %v13844_v22 = vpop.permute.xlu0 %13843  ;;  %v12814_v54 = vpack.c.bf16 %v5878_v41, %v5876_v27  ;;  %v5880_v7 = vsel %vm857_vm7, %v13850_v35, %v13840_v14 }
 0x6f2   : > { %v13846_v25 = vunpack.i.h.bf16 %v13844_v22  ;;  %v13845_v5 = vunpack.i.l.bf16 %v13844_v22  ;;  %13923 = vrot.lane.b32.xlu1 %v14597_v28, %s16833_s29 }
 0x6f3   : > { %13928 = vrot.lane.b32.xlu0 %v15667_v8, %s16833_s29  ;;  %12815 = vmatpush1.bf16.msra.mxu0 %v12814_v54 }
 0x6f4   : > { %v15772_v63 = vpack.c.bf16 %v13846_v25, %v13841_v44  ;;  %v5882_v31 = vsel %vm857_vm7, %v13851_v45, %v13845_v5  ;;  %v5883_v56 = vsel %vm857_vm7, %v13845_v5, %v13846_v25 }
 0x6f5   : > { %v12816_v30 = vpack.c.bf16 %v5883_v56, %v5881_v42  ;;  %v12818_v57 = vpack.c.bf16 %v5882_v31, %v5880_v7  ;;  %v15842_v4 = vpop.permute.xlu0 %13853 }
 0x6f6   : > { %13933 = vrot.lane.b32.xlu1 %v15307_v46, %s16833_s29  ;;  %v13856_v36 = vunpack.i.h.bf16 %v15842_v4  ;;  %v13855_v37 = vunpack.i.l.bf16 %v15842_v4 }
 0x6f7   : > { %13938 = vrot.lane.b32.xlu0 %v15296_v11, %s16833_s29  ;;  %12817 = vmatprep.subr.bf16.mxu0 %v12816_v30  ;;  %v5845_v30 = vld [vmem:[%s16808_s4 + $0x10] sm:$0xff] }
 0x6f8   : > { %12819 = vmatpush1.bf16.msra.mxu0 %v12818_v57 }
 0x6f9   : > { %v15850_v32 = vpop.permute.xlu0 %13868 }
 0x6fa   : > { %13943 = vrot.lane.b32.xlu1 %v15651_v61, %s16908_s30  ;;  %v13871_v27 = vunpack.i.h.bf16 %v15850_v32  ;;  %v13870_v35 = vunpack.i.l.bf16 %v15850_v32 }
 0x6fb   : > { %13948 = vrot.lane.b32.xlu0 %v15657_v26, %s16908_s30 }
 0x6fc   : > { %v6084_v57 = vsel %vm16830_vm9, %v13870_v35, %v13871_v27 }
 0x6fe   : > { %6479 = vrot.lane.b32.xlu1 %v15715_v12, %s16833_s29 }
 0x6ff   : > { %5872 = vrot.lane.b32.xlu0 %v15709_v13, %s16839_s22 }
 0x702   : > { %5874 = vrot.lane.b32.xlu1 %v15738_v18, %s16839_s22 }
 0x703   : > { %13953 = vrot.lane.b32.xlu0 %v14597_v28, %s16908_s30 }
 0x706   : > { %13958 = vrot.lane.b32.xlu1 %v15667_v8, %s16908_s30 }
 0x707   : > { %13963 = vrot.lane.b32.xlu0 %v15307_v46, %s16908_s30 }
 0x70a   : > { %6075 = vrot.lane.b32.xlu1 %v15709_v13, %s16837_s24 }
 0x70b   : > { %6077 = vrot.lane.b32.xlu0 %v15738_v18, %s16837_s24 }
 0x70e   : > { %13968 = vrot.lane.b32.xlu1 %v15296_v11, %s16908_s30 }
 0x70f   : > { %13973 = vrot.lane.b32.xlu0 %v15651_v61, %s16827_s12 }
 0x712   : > { %13978 = vrot.lane.b32.xlu1 %v15657_v26, %s16827_s12 }
 0x713   : > { %6278 = vrot.lane.b32.xlu0 %v15709_v13, %s16835_s25 }
 0x716   : > { %6280 = vrot.lane.b32.xlu1 %v15738_v18, %s16835_s25 }
 0x717   : > { %6682 = vrot.lane.b32.xlu0 %v15715_v12, %s16908_s30 }
 0x71a   : > { %13983 = vrot.lane.b32.xlu1 %v14597_v28, %s16827_s12 }
 0x71b   : > { %13988 = vrot.lane.b32.xlu0 %v15667_v8, %s16827_s12 }
 0x71e   : > { %6481 = vrot.lane.b32.xlu1 %v15709_v13, %s16833_s29 }
 0x71f   : > { %6483 = vrot.lane.b32.xlu0 %v15738_v18, %s16833_s29  ;;  %s16967_s29 = smov 90  }
 0x722   : > { %13993 = vrot.lane.b32.xlu1 %v15307_v46, %s16827_s12 }
 0x723   : > { %13998 = vrot.lane.b32.xlu0 %v15296_v11, %s16827_s12 }
 0x726   : > { %14003 = vrot.lane.b32.xlu1 %v15651_v61, %s16831_s13  ;;  %v15840_v61 = vpop.permute.xlu1 %13858 }
 0x727   : > { %6684 = vrot.lane.b32.xlu0 %v15709_v13, %s16908_s30  ;;  %v13860_v44 = vunpack.i.l.bf16 %v15840_v61 }
 0x72a   : > { %6686 = vrot.lane.b32.xlu1 %v15738_v18, %s16908_s30 }
 0x72b   : > { %14008 = vrot.lane.b32.xlu0 %v15657_v26, %s16831_s13  ;;  %v15848_v26 = vpop.permute.xlu1 %13863 }
 0x72c   : > { %v13866_v14 = vunpack.i.h.bf16 %v15848_v26  ;;  %v13865_v9 = vunpack.i.l.bf16 %v15848_v26 }
 0x72e   : > { %6885 = vrot.lane.b32.xlu1 %v15715_v12, %s16827_s12  ;;  %v6079_v45 = vsel %vm16830_vm9, %v13865_v9, %v13855_v37  ;;  %v6081_v25 = vsel %vm16830_vm9, %v13866_v14, %v13860_v44 }
 0x72f   : > { %14013 = vrot.lane.b32.xlu0 %v14597_v28, %s16831_s13  ;;  %v5468_v28 = vld [vmem:[%s16814_s10 + $0x18] sm:$0xff] }
 0x732   : > { %6887 = vrot.lane.b32.xlu1 %v15709_v13, %s16827_s12 }
 0x733   : > { %6889 = vrot.lane.b32.xlu0 %v15738_v18, %s16827_s12  ;;  %s16965_s12 = smov 108  }
 0x736   : > { %14018 = vrot.lane.b32.xlu1 %v15667_v8, %s16831_s13  ;;  %v15865_v8 = vpop.permute.xlu0 %13878 }
 0x737   : > { %14023 = vrot.lane.b32.xlu0 %v15307_v46, %s16831_s13  ;;  %v15863_v46 = vpop.permute.xlu1 %13873  ;;  %v13881_v5 = vunpack.i.h.bf16 %v15865_v8  ;;  %v13880_v42 = vunpack.i.l.bf16 %v15865_v8 }
 0x738   : > { %v13875_v22 = vunpack.i.l.bf16 %v15863_v46 }
 0x73a   : > { %14028 = vrot.lane.b32.xlu1 %v15296_v11, %s16831_s13  ;;  %v15869_v11 = vpop.permute.xlu0 %13888  ;;  %v6085_v32 = vsel %vm16830_vm9, %v13881_v5, %v13875_v22 }
 0x73b   : > { %7090 = vrot.lane.b32.xlu0 %v15709_v13, %s16831_s13  ;;  %v15867_v39 = vpop.permute.xlu1 %13883 }
 0x73e   : > { %7092 = vrot.lane.b32.xlu1 %v15738_v18, %s16831_s13  ;;  %v15873_v47 = vpop.permute.xlu0 %13893 }
 0x73f   : > { %7088 = vrot.lane.b32.xlu0 %v15715_v12, %s16831_s13  ;;  %v15871_v13 = vpop.permute.xlu1 %13898  ;;  %s17023_s13 = smov 110  }
 0x742   : > { %7268 = vperm.xlu1 %13551, %v5468_v28   ;;  %v6083_v28 = vsel %vm16830_vm9, %v13880_v42, %v13870_v35 }
 0x750   : > { %v5526_v33 = vpop.permute.xlu1 %5525  ;;  %v15875_v20 = vpop.permute.xlu0 %5870 }
 0x754   : > { %v15877_v12 = vpop.permute.xlu1 %6073 }
 0x755   : > { %v5530_v17 = vpop.permute.xlu0 %5529 }
 0x758   : > { %v5528_v3 = vpop.permute.xlu1 %5527 }
 0x759   : > { %v15879_v43 = vpop.permute.xlu0 %13903  ;;  %v5540_v1 = vsel %vm544_vm6, %v5528_v3, %v5530_v17  ;;  %v5539_v24 = vsel %vm544_vm6, %v5526_v33, %v5528_v3  ;;  %v13891_v33 = vunpack.i.h.bf16 %v15869_v11  ;;  %v13895_v3 = vunpack.i.l.bf16 %v15873_v47 }
 0x75a   : > { %5568 = vmatprep.subr.mxu1 %v5540_v1  ;;  %v13905_v2 = vunpack.i.l.bf16 %v15879_v43 }
 0x75b   : > { %5569 = vmatpush1.msra.mxu1 %v5539_v24 }
 0x75c   : > { %v15886_v6 = vpop.permute.xlu1 %13908  ;;  %12792 = vmatprep.subr.bf16.mxu1 %v14409_v15  ;;  %11646 = vmatmul.mubr.msk.f32.vlgmr.msra.gmra.mrb[56].mxu1 %vm5556_vm1, %v5485_v62 }
 0x75d   : > { %v15890_v10 = vpop.permute.xlu0 %13913  ;;  %12794 = vmatpush3.bf16.msra.mxu1 %v15727_v34  ;;  %12260 = vmatprep.mubr.msk.f32.mxu1 %vm14410_vm5, %v14407_v0 }
 0x75e   : > { %12795 = vmatprep.subr.bf16.mxu1 %v14409_v15 }
 0x760   : > { %v15896_v23 = vpop.permute.xlu1 %13918 }
 0x761   : > { %v15898_v52 = vpop.permute.xlu0 %6276  ;;  %12797 = vmatpush3.bf16.msra.mxu1 %v15743_v48 }
 0x762   : > { %12258 = vmatprep.subr.mxu1 %v14407_v0 }
 0x764   : > { %v15902_v38 = vpop.permute.xlu1 %13923 }
 0x765   : > { %v15904_v59 = vpop.permute.xlu0 %13928  ;;  %12259 = vmatpush3.msra.mxu1 %v5530_v17  ;;  %v13890_v17 = vunpack.i.l.bf16 %v15869_v11  ;;  %v13885_v11 = vunpack.i.l.bf16 %v15867_v39 }
 0x766   : > { %12806 = vmatprep.subr.bf16.mxu1 %v14409_v15  ;;  %12261 = vmatmul.mubr.msk.f32.vlgmr.msra.gmra.mrb[58].mxu1 %vm5556_vm1, %v5485_v62  ;;  %v13906_v62 = vunpack.i.h.bf16 %v15879_v43 }
 0x767   : > { %12808 = vmatpush3.bf16.msra.mxu1 %v12807_v40  ;;  %12273 = vmatprep.mubr.msk.f32.mxu1 %vm14410_vm5, %v14407_v0  ;;  %v13861_v40 = vunpack.i.h.bf16 %v15840_v61  ;;  %v6282_v14 = vsel %vm16909_vm2, %v13895_v3, %v13885_v11  ;;  %v6285_v35 = vsel %vm16911_vm3, %v13890_v17, %v13891_v33  ;;  %vm16914_vm3 = vmmov %vm16909_vm2 }
 0x768   : > { %v15913_v34 = vpop.permute.xlu1 %13933  ;;  %12809 = vmatprep.subr.bf16.mxu1 %v14409_v15 }
 0x769   : > { %v15916_v48 = vpop.permute.xlu0 %13938  ;;  %v6082_v56 = vsel %vm16830_vm9, %v13860_v44, %v13861_v40  ;;  %v12835_v24 = vpack.c.bf16 %v13861_v40, %v13856_v36  ;;  %v13901_v44 = vunpack.i.h.bf16 %v15871_v13 }
 0x76b   : > { %12811 = vmatpush3.bf16.msra.mxu1 %v12810_v51  ;;  %v13886_v51 = vunpack.i.h.bf16 %v15867_v39 }
 0x76c   : > { %v15919_v50 = vpop.permute.xlu1 %13943  ;;  %12271 = vmatprep.subr.mxu1 %v14407_v0 }
 0x76d   : > { %v15922_v60 = vpop.permute.xlu0 %13948 }
 0x76f   : > { %12272 = vmatpush3.msra.mxu1 %v15738_v18  ;;  %v13876_v18 = vunpack.i.h.bf16 %v15863_v46 }
 0x770   : > { %v15931_v41 = vpop.permute.xlu1 %6479  ;;  %12274 = vmatmul.mubr.msk.f32.vlgmr.msra.gmra.mrb[60].mxu1 %vm5556_vm1, %v15720_v16  ;;  %12820 = vmatprep.subr.bf16.mxu1 %v14409_v15  ;;  %v6080_v16 = vsel %vm16830_vm9, %v13855_v37, %v13856_v36  ;;  %v12832_v37 = vpack.c.bf16 %v6085_v32, %v6083_v28  ;;  %v13900_v36 = vunpack.i.l.bf16 %v15871_v13  ;;  %v13915_v28 = vunpack.i.l.bf16 %v15890_v10 }
 0x771   : > { %v5873_v54 = vpop.permute.xlu0 %5872  ;;  %12822 = vmatpush3.bf16.msra.mxu1 %v15756_v29  ;;  %12286 = vmatprep.mubr.msk.f32.mxu1 %vm14410_vm5, %v14407_v0  ;;  %v6086_v61 = vsel %vm16830_vm9, %v13875_v22, %v13876_v18  ;;  %v12826_v26 = vpack.c.bf16 %v6082_v56, %v6080_v16  ;;  %v6289_v22 = vsel %vm16912_vm15, %v13905_v2, %v13906_v62  ;;  %v6048_v16 = vld [vmem:[%s16808_s4 + $0x18] sm:$0xff]  ;;  %vm16915_vm15 = vmmov %vm16909_vm2 }
 0x772   : > { %12823 = vmatprep.subr.bf16.mxu1 %v14409_v15  ;;  %v5884_v4 = vsel %vm857_vm7, %v15875_v20, %v5873_v54  ;;  %v12830_v8 = vpack.c.bf16 %v6086_v61, %v6084_v57  ;;  %v13896_v20 = vunpack.i.h.bf16 %v15873_v47  ;;  %v12838_v47 = vpack.c.bf16 %v13876_v18, %v13871_v27 }
 0x773   : > { %v13911_v27 = vunpack.i.h.bf16 %v15886_v6  ;;  %v13910_v18 = vunpack.i.l.bf16 %v15886_v6  ;;  %v13921_v57 = vunpack.i.h.bf16 %v15896_v23  ;;  %v13920_v61 = vunpack.i.l.bf16 %v15896_v23 }
 0x774   : > { %v5875_v7 = vpop.permute.xlu1 %5874  ;;  %v6284_v9 = vsel %vm16910_vm14, %v13896_v20, %v13890_v17  ;;  %vm16913_vm14 = vmmov %vm16909_vm2  ;;  %v13936_v23 = vunpack.i.h.bf16 %v15913_v34  ;;  %v13930_v20 = vunpack.i.l.bf16 %v15904_v59 }
 0x775   : > { %v15949_v31 = vpop.permute.xlu0 %13953  ;;  %12825 = vmatpush3.bf16.msra.mxu1 %v15772_v63  ;;  %v5885_v29 = vsel %vm857_vm7, %v5873_v54, %v5875_v7  ;;  %v12828_v63 = vpack.c.bf16 %v6081_v25, %v6079_v45  ;;  %v6283_v54 = vsel %vm16909_vm2, %v13885_v11, %v13886_v51  ;;  %v6287_v5 = vsel %vm16913_vm14, %v13900_v36, %v13901_v44 }
 0x776   : > { %5912 = vmatprep.subr.mxu0 %v5885_v29  ;;  %12284 = vmatprep.subr.mxu1 %v14407_v0  ;;  %v12840_v6 = vpack.c.bf16 %v6285_v35, %v6283_v54  ;;  %v12844_v29 = vpack.c.bf16 %v6289_v22, %v6287_v5  ;;  %v6286_v56 = vsel %vm16914_vm3, %v13910_v18, %v13900_v36  ;;  %vm16916_vm2 = vcmask 883712   ;;  %v6251_v36 = vld [vmem:[%s16808_s4 + $0x20] sm:$0xff] }
 0x777   : > { %5913 = vmatpush1.msra.mxu0 %v5884_v4  ;;  %v13925_v4 = vunpack.i.l.bf16 %v15902_v38  ;;  %v6488_v3 = vsel %vm16916_vm2, %v13920_v61, %v13921_v57  ;;  %vm16917_vm14 = vmmov %vm16916_vm2  ;;  %v13951_v18 = vunpack.i.h.bf16 %v15922_v60  ;;  %v13955_v22 = vunpack.i.l.bf16 %v15949_v31 }
 0x778   : > { %v15964_v46 = vpop.permute.xlu1 %13958  ;;  %12827 = vmatprep.subr.bf16.mxu0 %v12826_v26  ;;  %11650 = vmatmul.mubr.msk.f32.vlgmr.msra.gmra.mrb[6].mxu0 %vm5556_vm1, %v5845_v30  ;;  %v12849_v26 = vpack.c.bf16 %v13891_v33, %v13886_v51  ;;  %v13931_v33 = vunpack.i.h.bf16 %v15904_v59  ;;  %vm16918_vm3 = vmmov %vm16916_vm2  ;;  %v12852_v59 = vpack.c.bf16 %v13906_v62, %v13901_v44 }
 0x779   : > { %v15971_v1 = vpop.permute.xlu0 %13963  ;;  %12285 = vmatpush3.msra.mxu1 %v5875_v7  ;;  %12829 = vmatpush1.bf16.msra.mxu0 %v12828_v63  ;;  %v12842_v7 = vpack.c.bf16 %v6284_v9, %v6282_v14  ;;  %v13916_v63 = vunpack.i.h.bf16 %v15890_v10  ;;  %v6485_v10 = vsel %vm16917_vm14, %v13925_v4, %v13915_v28  ;;  %vm16919_vm14 = vmmov %vm16916_vm2  ;;  %v13961_v5 = vunpack.i.h.bf16 %v15964_v46 }
 0x77a   : > { %12287 = vmatmul.mubr.msk.f32.vlgmr.msra.gmra.mrb[62].mxu1 %vm5556_vm1, %v5845_v30  ;;  %12831 = vmatprep.subr.bf16.mxu0 %v12830_v8  ;;  %v6288_v30 = vsel %vm16915_vm15, %v13911_v27, %v13905_v2  ;;  %v13935_v8 = vunpack.i.l.bf16 %v15913_v34  ;;  %v13940_v2 = vunpack.i.l.bf16 %v15916_v48  ;;  %vm16921_vm10 = vmmov %vm16916_vm2 }
 0x77b   : > { %12834 = vmatprep.subr.bf16.mxu1 %v14409_v15  ;;  %6171 = vmatprep.mubr.f32.mxu0 %v14407_v0  ;;  %v12846_v17 = vpack.c.bf16 %v6288_v30, %v6286_v56 }
 0x77c   : > { %12836 = vmatpush3.bf16.msra.mxu1 %v12835_v24  ;;  %v6076_v40 = vpop.permute.xlu1 %6075  ;;  %12299 = vmatprep.mubr.msk.f32.mxu1 %vm14410_vm5, %v14407_v0  ;;  %v13941_v24 = vunpack.i.h.bf16 %v15916_v48 }
 0x77d   : > { %v6078_v39 = vpop.permute.xlu0 %6077  ;;  %12833 = vmatpush1.bf16.msra.mxu0 %v12832_v37  ;;  %12837 = vmatprep.subr.bf16.mxu1 %v14409_v15  ;;  %v6087_v25 = vsel %vm16830_vm9, %v15877_v12, %v6076_v40  ;;  %v13926_v12 = vunpack.i.h.bf16 %v15902_v38 }
 0x77e   : > { %v6088_v13 = vsel %vm16830_vm9, %v6076_v40, %v6078_v39  ;;  %v6492_v40 = vsel %vm16919_vm14, %v13935_v8, %v13936_v23  ;;  %v6491_v44 = vsel %vm16921_vm10, %v13941_v24, %v13935_v8  ;;  %vm16922_vm9 = vmmov %vm16916_vm2 }
 0x77f   : > { %6115 = vmatprep.subr.mxu0 %v6088_v13  ;;  %v6487_v34 = vsel %vm16918_vm3, %v13926_v12, %v13920_v61  ;;  %vm16920_vm3 = vmmov %vm16915_vm15  ;;  %v6489_v14 = vsel %vm16922_vm9, %v13940_v2, %v13930_v20  ;;  %v13950_v13 = vunpack.i.l.bf16 %v15922_v60  ;;  %v13965_v60 = vunpack.i.l.bf16 %v15971_v1 }
 0x780   : > { %12839 = vmatpush3.bf16.msra.mxu1 %v12838_v47  ;;  %v15998_v45 = vpop.permute.xlu1 %13968  ;;  %v6486_v47 = vsel %vm16916_vm2, %v13915_v28, %v13916_v63  ;;  %v12856_v62 = vpack.c.bf16 %v6487_v34, %v6485_v10  ;;  %vm16924_vm9 = vcmask 752640  }
 0x781   : > { %v16003_v42 = vpop.permute.xlu0 %13973  ;;  %6116 = vmatpush1.msra.mxu0 %v6087_v25  ;;  %12297 = vmatprep.subr.mxu1 %v14407_v0  ;;  %v12854_v43 = vpack.c.bf16 %v6488_v3, %v6486_v47  ;;  %v13956_v25 = vunpack.i.h.bf16 %v15949_v31  ;;  %vm16925_vm10 = vmmov %vm16924_vm9  ;;  %v13971_v61 = vunpack.i.h.bf16 %v15998_v45  ;;  %v13970_v12 = vunpack.i.l.bf16 %v15998_v45 }
 0x782   : > { %12841 = vmatprep.subr.bf16.mxu0 %v12840_v6  ;;  %11652 = vmatmul.mubr.msk.f32.vlgmr.msra.gmra.mrb[6].mxu0 %vm5556_vm1, %v6048_v16  ;;  %v12860_v6 = vpack.c.bf16 %v6491_v44, %v6489_v14  ;;  %v13976_v24 = vunpack.i.h.bf16 %v16003_v42 }
 0x783   : > { %12843 = vmatpush1.bf16.msra.mxu0 %v12842_v7  ;;  %6374 = vmatprep.mubr.f32.mxu0 %v14407_v0  ;;  %v13966_v7 = vunpack.i.h.bf16 %v15971_v1 }
 0x784   : > { %12298 = vmatpush3.msra.mxu1 %v6078_v39  ;;  %v16015_v32 = vpop.permute.xlu1 %13978  ;;  %12845 = vmatprep.subr.bf16.mxu0 %v12844_v29  ;;  %v13946_v39 = vunpack.i.h.bf16 %v15919_v50  ;;  %v12866_v29 = vpack.c.bf16 %v13936_v23, %v13931_v33 }
 0x785   : > { %12300 = vmatmul.mubr.msk.f32.vlgmr.msra.gmra.mrb[64].mxu1 %vm5556_vm1, %v6048_v16  ;;  %12848 = vmatprep.subr.bf16.mxu1 %v14409_v15  ;;  %v6279_v38 = vpop.permute.xlu0 %6278  ;;  %v12863_v16 = vpack.c.bf16 %v13921_v57, %v13916_v63  ;;  %v13981_v10 = vunpack.i.h.bf16 %v16015_v32  ;;  %v13980_v34 = vunpack.i.l.bf16 %v16015_v32 }
 0x786   : > { %12850 = vmatpush3.bf16.msra.mxu1 %v12849_v26  ;;  %12312 = vmatprep.mubr.msk.f32.mxu1 %vm14410_vm5, %v14407_v0  ;;  %v6290_v48 = vsel %vm16920_vm3, %v15898_v52, %v6279_v38  ;;  %v13945_v52 = vunpack.i.l.bf16 %v15919_v50  ;;  %v13960_v50 = vunpack.i.l.bf16 %v15964_v46  ;;  %v6454_v26 = vld [vmem:[%s16808_s4 + $0x28] sm:$0xff] }
 0x787   : > { %12847 = vmatpush1.bf16.msra.mxu0 %v12846_v17  ;;  %12851 = vmatprep.subr.bf16.mxu1 %v14409_v15 }
 0x788   : > { %v6281_v51 = vpop.permute.xlu1 %6280  ;;  %v6688_v31 = vsel %vm16924_vm9, %v13955_v22, %v13945_v52  ;;  %v6689_v46 = vsel %vm16925_vm10, %v13945_v52, %v13946_v39 }
 0x789   : > { %v16034_v11 = vpop.permute.xlu0 %6682  ;;  %v6291_v37 = vsel %vm16915_vm15, %v6279_v38, %v6281_v51  ;;  %vm16923_vm15 = vmmov %vm16916_vm2 }
 0x78a   : > { %12853 = vmatpush3.bf16.msra.mxu1 %v12852_v59  ;;  %6318 = vmatprep.subr.mxu0 %v6291_v37  ;;  %v6490_v9 = vsel %vm16923_vm15, %v13930_v20, %v13931_v33  ;;  %vm16926_vm2 = vmmov %vm16924_vm9  ;;  %v13975_v37 = vunpack.i.l.bf16 %v16003_v42 }
 0x78b   : > { %6319 = vmatpush1.msra.mxu0 %v6290_v48  ;;  %12310 = vmatprep.subr.mxu1 %v14407_v0  ;;  %v12858_v27 = vpack.c.bf16 %v6492_v40, %v6490_v9  ;;  %v6691_v1 = vsel %vm16926_vm2, %v13950_v13, %v13951_v18  ;;  %vm16927_vm14 = vmmov %vm16926_vm2  ;;  %v6692_v33 = vsel %vm16926_vm2, %v13970_v12, %v13960_v50 }
 0x78c   : > { %v16049_v35 = vpop.permute.xlu1 %13983  ;;  %12855 = vmatprep.subr.bf16.mxu0 %v12854_v43  ;;  %11654 = vmatmul.mubr.msk.f32.vlgmr.msra.gmra.mrb[6].mxu0 %vm5556_vm1, %v6251_v36  ;;  %v6690_v57 = vsel %vm16927_vm14, %v13956_v25, %v13950_v13  ;;  %vm16928_vm3 = vmmov %vm16923_vm15  ;;  %v12868_v38 = vpack.c.bf16 %v6691_v1, %v6689_v46  ;;  %v12880_v48 = vpack.c.bf16 %v13966_v7, %v13961_v5  ;;  %v6657_v13 = vld [vmem:[%s16808_s4 + $0x30] sm:$0xff] }
 0x78d   : > { %v16056_v54 = vpop.permute.xlu0 %13988  ;;  %12857 = vmatpush1.bf16.msra.mxu0 %v12856_v62  ;;  %6577 = vmatprep.mubr.f32.mxu0 %v14407_v0  ;;  %vm16929_vm15 = vmmov %vm16926_vm2  ;;  %v12870_v45 = vpack.c.bf16 %v6690_v57, %v6688_v31  ;;  %v13986_v2 = vunpack.i.h.bf16 %v16049_v35  ;;  %v13985_v59 = vunpack.i.l.bf16 %v16049_v35  ;;  %v12891_v31 = vpack.c.bf16 %v13981_v10, %v13976_v24 }
 0x78e   : > { %12311 = vmatpush3.msra.mxu1 %v6281_v51  ;;  %12859 = vmatprep.subr.bf16.mxu0 %v12858_v27  ;;  %v6693_v63 = vsel %vm16929_vm15, %v13960_v50, %v13961_v5  ;;  %vm16930_vm9 = vmmov %vm16926_vm2  ;;  %v13991_v43 = vunpack.i.h.bf16 %v16056_v54  ;;  %v13990_v62 = vunpack.i.l.bf16 %v16056_v54 }
 0x78f   : > { %12313 = vmatmul.mubr.msk.f32.vlgmr.msra.gmra.mrb[66].mxu1 %vm5556_vm1, %v6251_v36  ;;  %12862 = vmatprep.subr.bf16.mxu1 %v14409_v15  ;;  %v6695_v28 = vsel %vm16930_vm9, %v13965_v60, %v13966_v7  ;;  %vm16931_vm10 = vmmov %vm16928_vm3 }
 0x790   : > { %12864 = vmatpush3.bf16.msra.mxu1 %v12863_v16  ;;  %v6482_v56 = vpop.permute.xlu1 %6481  ;;  %12325 = vmatprep.mubr.msk.f32.mxu1 %vm14410_vm5, %v14407_v0  ;;  %vm16932_vm14 = vmmov %vm16926_vm2  ;;  %v12872_v3 = vpack.c.bf16 %v6695_v28, %v6693_v63 }
 0x791   : > { %v6484_v30 = vpop.permute.xlu0 %6483  ;;  %12861 = vmatpush1.bf16.msra.mxu0 %v12860_v6  ;;  %12865 = vmatprep.subr.bf16.mxu1 %v14409_v15  ;;  %v6493_v8 = vsel %vm16931_vm10, %v15931_v41, %v6482_v56  ;;  %v6694_v20 = vsel %vm16932_vm14, %v13971_v61, %v13965_v60  ;;  %v12877_v41 = vpack.c.bf16 %v13951_v18, %v13946_v39  ;;  %vm16936_vm10 = vmmov %vm16926_vm2 }
 0x792   : > { %v6494_v4 = vsel %vm16928_vm3, %v6482_v56, %v6484_v30  ;;  %v12874_v40 = vpack.c.bf16 %v6694_v20, %v6692_v33  ;;  %vm16933_vm3 = vcmask 744448  }
 0x793   : > { %6521 = vmatprep.subr.mxu0 %v6494_v4  ;;  %v6894_v42 = vsel %vm16933_vm3, %v13980_v34, %v13981_v10  ;;  %vm16934_vm15 = vmmov %vm16933_vm3 }
 0x794   : > { %12867 = vmatpush3.bf16.msra.mxu1 %v12866_v29  ;;  %v16081_v23 = vpop.permute.xlu1 %13993  ;;  %v6891_v44 = vsel %vm16934_vm15, %v13985_v59, %v13975_v37  ;;  %vm16935_vm9 = vmmov %vm16933_vm3 }
 0x795   : > { %v13999_v17 = vpop.permute.xlu0 %13998  ;;  %6522 = vmatpush1.msra.mxu0 %v6493_v8  ;;  %12323 = vmatprep.subr.mxu1 %v14407_v0  ;;  %v13996_v47 = vunpack.i.h.bf16 %v16081_v23  ;;  %v13995_v32 = vunpack.i.l.bf16 %v16081_v23  ;;  %v6893_v14 = vsel %vm16935_vm9, %v13986_v2, %v13980_v34  ;;  %vm16937_vm2 = vmmov %vm16933_vm3 }
 0x796   : > { %12869 = vmatprep.subr.bf16.mxu0 %v12868_v38  ;;  %11656 = vmatmul.mubr.msk.f32.vlgmr.msra.gmra.mrb[6].mxu0 %vm5556_vm1, %v6454_v26  ;;  %v14001_v9 = vunpack.i.h.bf16 %v13999_v17  ;;  %v14000_v39 = vunpack.i.l.bf16 %v13999_v17  ;;  %v6892_v18 = vsel %vm16937_vm2, %v13975_v37, %v13976_v24  ;;  %vm16938_vm14 = vmmov %vm16937_vm2  ;;  %v12884_v25 = vpack.c.bf16 %v6893_v14, %v6891_v44  ;;  %v6860_v17 = vld [vmem:[%s16808_s4 + $0x38] sm:$0xff] }
 0x797   : > { %12871 = vmatpush1.bf16.msra.mxu0 %v12870_v45  ;;  %6780 = vmatprep.mubr.f32.mxu0 %v14407_v0  ;;  %v6898_v22 = vsel %vm16938_vm14, %v13995_v32, %v13996_v47  ;;  %vm16939_vm3 = vmmov %vm16936_vm10  ;;  %v12882_v16 = vpack.c.bf16 %v6894_v42, %v6892_v18  ;;  %v12894_v63 = vpack.c.bf16 %v13996_v47, %v13991_v43 }
 0x798   : > { %12324 = vmatpush3.msra.mxu1 %v6484_v30  ;;  %v16095_v51 = vpop.permute.xlu1 %14003  ;;  %12873 = vmatprep.subr.bf16.mxu0 %v12872_v3  ;;  %vm16940_vm15 = vmmov %vm16937_vm2 }
 0x799   : > { %12326 = vmatmul.mubr.msk.f32.vlgmr.msra.gmra.mrb[68].mxu1 %vm5556_vm1, %v6454_v26  ;;  %12876 = vmatprep.subr.bf16.mxu1 %v14409_v15  ;;  %v6685_v36 = vpop.permute.xlu0 %6684  ;;  %v6896_v6 = vsel %vm16940_vm15, %v13990_v62, %v13991_v43  ;;  %vm16941_vm9 = vmmov %vm16937_vm2  ;;  %v14006_v1 = vunpack.i.h.bf16 %v16095_v51  ;;  %v14005_v57 = vunpack.i.l.bf16 %v16095_v51 }
 0x79a   : > { %12878 = vmatpush3.bf16.msra.mxu1 %v12877_v41  ;;  %12338 = vmatprep.mubr.msk.f32.mxu1 %vm14410_vm5, %v14407_v0  ;;  %v6696_v54 = vsel %vm16939_vm3, %v16034_v11, %v6685_v36  ;;  %v6897_v5 = vsel %vm16941_vm9, %v14001_v9, %v13995_v32  ;;  %v12886_v60 = vpack.c.bf16 %v6898_v22, %v6896_v6  ;;  %vm16946_vm15 = vmmov %vm16941_vm9 }
 0x79b   : > { %12875 = vmatpush1.bf16.msra.mxu0 %v12874_v40  ;;  %12879 = vmatprep.subr.bf16.mxu1 %v14409_v15 }
 0x79c   : > { %v6687_v35 = vpop.permute.xlu1 %6686 }
 0x79d   : > { %v16110_v27 = vpop.permute.xlu0 %14008  ;;  %v6697_v52 = vsel %vm16936_vm10, %v6685_v36, %v6687_v35  ;;  %vm16942_vm10 = vmmov %vm16937_vm2  ;;  %vm16943_vm2 = vcmask 736256  }
 0x79e   : > { %12881 = vmatpush3.bf16.msra.mxu1 %v12880_v48  ;;  %6724 = vmatprep.subr.mxu0 %v6697_v52  ;;  %v6895_v50 = vsel %vm16942_vm10, %v14000_v39, %v13990_v62  ;;  %v14011_v29 = vunpack.i.h.bf16 %v16110_v27  ;;  %v14010_v11 = vunpack.i.l.bf16 %v16110_v27  ;;  %vm16944_vm14 = vmmov %vm16943_vm2 }
 0x79f   : > { %6725 = vmatpush1.msra.mxu0 %v6696_v54  ;;  %12336 = vmatprep.subr.mxu1 %v14407_v0  ;;  %v12888_v61 = vpack.c.bf16 %v6897_v5, %v6895_v50  ;;  %vm16945_vm3 = vmmov %vm16943_vm2 }
 0x7a0   : > { %v6886_v7 = vpop.permute.xlu1 %6885  ;;  %12883 = vmatprep.subr.bf16.mxu0 %v12882_v16  ;;  %11658 = vmatmul.mubr.msk.f32.vlgmr.msra.gmra.mrb[6].mxu0 %vm5556_vm1, %v6657_v13  ;;  %v7097_v26 = vsel %vm16943_vm2, %v14010_v11, %v14011_v29  ;;  %vm16947_vm9 = vmmov %vm16943_vm2  ;;  %v12905_v51 = vpack.c.bf16 %v14011_v29, %v14006_v1 }
 0x7a1   : > { %v14014_v56 = vpop.permute.xlu0 %14013  ;;  %12885 = vmatpush1.bf16.msra.mxu0 %v12884_v25  ;;  %6983 = vmatprep.mubr.f32.mxu0 %v14407_v0  ;;  %v7095_v38 = vsel %vm16947_vm9, %v14005_v57, %v14006_v1  ;;  %vm16951_vm9 = vmmov %vm16943_vm2 }
 0x7a2   : > { %v14016_v30 = vunpack.i.h.bf16 %v14014_v56  ;;  %v14015_v46 = vunpack.i.l.bf16 %v14014_v56  ;;  %12337 = vmatpush3.msra.mxu1 %v6687_v35  ;;  %12887 = vmatprep.subr.bf16.mxu0 %v12886_v60  ;;  %v12896_v20 = vpack.c.bf16 %v7097_v26, %v7095_v38  ;;  %v7063_v35 = vld [vmem:[%s16808_s4 + $0x40] sm:$0xff] }
 0x7a3   : > { %12339 = vmatmul.mubr.msk.f32.vlgmr.msra.gmra.mrb[70].mxu1 %vm5556_vm1, %v6657_v13  ;;  %12890 = vmatprep.subr.bf16.mxu1 %v14409_v15 }
 0x7a4   : > { %12892 = vmatpush3.bf16.msra.mxu1 %v12891_v31  ;;  %v6888_v12 = vpop.permute.xlu1 %6887  ;;  %12351 = vmatprep.mubr.msk.f32.mxu1 %vm14410_vm5, %v14407_v0  ;;  %v7094_v28 = vsel %vm16944_vm14, %v14015_v46, %v14005_v57  ;;  %v7096_v23 = vsel %vm16945_vm3, %v14016_v30, %v14010_v11  ;;  %vm16948_vm14 = vmmov %vm16943_vm2 }
 0x7a5   : > { %v6890_v4 = vpop.permute.xlu0 %6889  ;;  %12889 = vmatpush1.bf16.msra.mxu0 %v12888_v61  ;;  %12893 = vmatprep.subr.bf16.mxu1 %v14409_v15  ;;  %v6899_v33 = vsel %vm16942_vm10, %v6886_v7, %v6888_v12  ;;  %v12898_v41 = vpack.c.bf16 %v7096_v23, %v7094_v28  ;;  %vm16949_vm3 = vmmov %vm16943_vm2 }
 0x7a6   : > { %v6900_v8 = vsel %vm16946_vm15, %v6888_v12, %v6890_v4  ;;  %vm16950_vm15 = vmmov %vm16943_vm2 }
 0x7a7   : > { %6927 = vmatprep.subr.mxu0 %v6900_v8  ;;  %vm16952_vm10 = vmmov %vm16943_vm2 }
 0x7a8   : > { %12895 = vmatpush3.bf16.msra.mxu1 %v12894_v63  ;;  %v14019_v45 = vpop.permute.xlu1 %14018 }
 0x7a9   : > { %v14021_v3 = vunpack.i.h.bf16 %v14019_v45  ;;  %v14020_v10 = vunpack.i.l.bf16 %v14019_v45  ;;  %v14024_v34 = vpop.permute.xlu0 %14023  ;;  %6928 = vmatpush1.msra.mxu0 %v6899_v33  ;;  %12349 = vmatprep.subr.mxu1 %v14407_v0 }
 0x7aa   : > { %v14026_v24 = vunpack.i.h.bf16 %v14024_v34  ;;  %v14025_v2 = vunpack.i.l.bf16 %v14024_v34  ;;  %12897 = vmatprep.subr.bf16.mxu0 %v12896_v20  ;;  %11660 = vmatmul.mubr.msk.f32.vlgmr.msra.gmra.mrb[6].mxu0 %vm5556_vm1, %v6860_v17 }
 0x7ab   : > { %12899 = vmatpush1.bf16.msra.mxu0 %v12898_v41  ;;  %v7099_v59 = vsel %vm16943_vm2, %v14020_v10, %v14021_v3  ;;  %7186 = vmatprep.mubr.f32.mxu0 %v14407_v0 }
 0x7ac   : > { %12350 = vmatpush3.msra.mxu1 %v6890_v4  ;;  %v14029_v37 = vpop.permute.xlu1 %14028  ;;  %v7101_v47 = vsel %vm16948_vm14, %v14025_v2, %v14026_v24  ;;  %v12908_v42 = vpack.c.bf16 %v14026_v24, %v14021_v3 }
 0x7ad   : > { %v14031_v32 = vunpack.i.h.bf16 %v14029_v37  ;;  %v14030_v36 = vunpack.i.l.bf16 %v14029_v37  ;;  %12352 = vmatmul.mubr.msk.f32.vlgmr.msra.gmra.mrb[72].mxu1 %vm5556_vm1, %v6860_v17  ;;  %12904 = vmatprep.subr.bf16.mxu1 %v14409_v15  ;;  %v7091_v40 = vpop.permute.xlu0 %7090  ;;  %v12900_v48 = vpack.c.bf16 %v7101_v47, %v7099_v59 }
 0x7ae   : > { %12906 = vmatpush3.bf16.msra.mxu1 %v12905_v51  ;;  %12364 = vmatprep.mubr.msk.f32.mxu1 %vm14410_vm5, %v14407_v0 }
 0x7af   : > { %v7098_v43 = vsel %vm16949_vm3, %v14030_v36, %v14020_v10  ;;  %v7100_v62 = vsel %vm16950_vm15, %v14031_v32, %v14025_v2  ;;  %12901 = vmatprep.subr.bf16.mxu0 %v12900_v48  ;;  %12907 = vmatprep.subr.bf16.mxu1 %v14409_v15  ;;  %v7304_v36 = vld [vmem:[#allocation2 + $0x8] sm:$0xff]  ;;  %vm16953_vm3 = vcmask 891904  }
 0x7b0   : > { %v7093_v44 = vpop.permute.xlu1 %7092  ;;  %v12902_v14 = vpack.c.bf16 %v7100_v62, %v7098_v43  ;;  %v7307_v62 = vld [vmem:[#allocation2 + $0x20] sm:$0xff]  ;;  %vm16954_vm15 = vmmov %vm16953_vm3 }
 0x7b1   : > { %v7103_v9 = vsel %vm16951_vm9, %v7091_v40, %v7093_v44  ;;  %v7089_v39 = vpop.permute.xlu0 %7088  ;;  %vm16955_vm9 = vmmov %vm16953_vm3 }
 0x7b2   : > { %12909 = vmatpush3.bf16.msra.mxu1 %v12908_v42  ;;  %12903 = vmatpush1.bf16.msra.mxu0 %v12902_v14  ;;  %v7102_v27 = vsel %vm16952_vm10, %v7089_v39, %v7091_v40  ;;  %v7305_v40 = vld [vmem:[#allocation2 + $0x10] sm:$0xff]  ;;  %v7308_v42 = vld [vmem:[#allocation2 + $0x28] sm:$0xff]  ;;  %vm16956_vm10 = vmmov %vm16953_vm3 }
 0x7b3   : > { %7130 = vmatprep.subr.mxu0 %v7103_v9  ;;  %12362 = vmatprep.subr.mxu1 %v14407_v0  ;;  %v14032_v43 = vpack.i.bf16 %v7305_v40, %v7304_v36  ;;  %v14037_v14 = vpack.i.bf16 %v7308_v42, %v7307_v62  ;;  %v7303_v9 = vld [vmem:[#allocation2] sm:$0xff] }
 0x7b6   : > { %12363 = vmatpush3.msra.mxu1 %v7093_v44  ;;  %7131 = vmatpush1.msra.mxu0 %v7102_v27  ;;  %v7306_v44 = vld [vmem:[#allocation2 + $0x18] sm:$0xff]  ;;  %v7311_v27 = vld [vmem:[#allocation2 + $0x40] sm:$0xff] }
 0x7b7   : > { %12365 = vmatmul.mubr.msk.f32.vlgmr.msra.gmra.mrb[74].mxu1 %vm5556_vm1, %v7063_v35  ;;  %11662 = vmatmul.mubr.msk.f32.vlgmr.msra.gmra.mrb[6].mxu0 %vm5556_vm1, %v7063_v35  ;;  %v14042_v39 = vpack.i.bf16 %v7306_v44, %v7303_v9  ;;  %v7310_v35 = vld [vmem:[#allocation2 + $0x38] sm:$0xff]  ;;  %v7323_v44 = vld [vmem:[%s16814_s10 + $0x20] sm:$0xff] }
 0x7b8   : > { %7490 = vmatprep.mubr.f32.mxu1 %v14407_v0 }
 0x7c1   : > { %v7269_v33 = vpop.permute.xlu1 %7268 }
 0x82f   : > { %v5626_v52 = vpop.f32.mrb[56].mxu1 }
 0x830   : > { %v5628_v18 = vpop.f32.mrb[57].mxu1 }
 0x839   : > { %v5697_v13 = vpop.f32.mrb[58].mxu1 }
 0x83a   : > { %v12262_v22 = vpop.f32.mrb[59].mxu1 }
 0x843   : > { %v5841_v54 = vpop.f32.mrb[60].mxu1 }
 0x844   : > { %v5842_v16 = vadd.f32 %v5841_v54, %v5697_v13  ;;  %v12275_v25 = vpop.f32.mrb[61].mxu1  ;;  %v7313_v13 = vld [vmem:[#allocation2 + $0x50] sm:$0xff]  ;;  %v7312_v54 = vld [vmem:[#allocation2 + $0x48] sm:$0xff] }
 0x845   : > { %v7309_v25 = vld [vmem:[#allocation2 + $0x30] sm:$0xff] }
 0x84d   : > { %v6041_v6 = vpop.f32.mrb[62].mxu1 }
 0x84e   : > { %v6047_v5 = vadd.f32 %v6041_v6, %v5842_v16  ;;  %v12288_v50 = vpop.f32.mrb[63].mxu1  ;;  %v7317_v16 = vld [vmem:[#allocation2 + $0x70] sm:$0xff]  ;;  %v14057_v6 = vpack.i.bf16 %v7312_v54, %v7309_v25 }
 0x858   : > { %v6244_v7 = vpop.f32.mrb[64].mxu1 }
 0x859   : > { %v6250_v60 = vadd.f32 %v6244_v7, %v6047_v5  ;;  %v12301_v29 = vpop.f32.mrb[65].mxu1  ;;  %v7316_v5 = vld [vmem:[#allocation2 + $0x68] sm:$0xff] }
 0x85a   : > { %v14062_v50 = vpack.i.bf16 %v7317_v16, %v7316_v5 }
 0x862   : > { %v6447_v11 = vpop.f32.mrb[66].mxu1 }
 0x863   : > { %v6453_v56 = vadd.f32 %v6447_v11, %v6250_v60  ;;  %v12314_v31 = vpop.f32.mrb[67].mxu1 }
 0x86c   : > { %v6650_v30 = vpop.f32.mrb[68].mxu1 }
 0x86d   : > { %v6656_v46 = vadd.f32 %v6650_v30, %v6453_v56  ;;  %v12327_v1 = vpop.f32.mrb[69].mxu1 }
 0x876   : > { %v6853_v57 = vpop.f32.mrb[70].mxu1 }
 0x877   : > { %v6859_v61 = vadd.f32 %v6853_v57, %v6656_v46  ;;  %v12340_v12 = vpop.f32.mrb[71].mxu1  ;;  %v7315_v57 = vld [vmem:[#allocation2 + $0x60] sm:$0xff] }
 0x880   : > { %v7056_v4 = vpop.f32.mrb[72].mxu1 }
 0x881   : > { %v7062_v26 = vadd.f32 %v7056_v4, %v6859_v61  ;;  %v12353_v63 = vpop.f32.mrb[73].mxu1 }
 0x88a   : > { %v7259_v28 = vpop.f32.mrb[74].mxu1  ;;  %v7188_v23 = vpop.f32.mrb[6].mxu0 }
 0x88b   : > { %v7265_v8 = vadd.f32 %v7259_v28, %v7062_v26  ;;  %v13086_v38 = vadd.f32 %v7188_v23, %v5626_v52  ;;  %v7190_v17 = vpop.f32.mrb[7].mxu0  ;;  %v12366_v45 = vpop.f32.mrb[75].mxu1  ;;  %v7314_v52 = vld [vmem:[#allocation2 + $0x58] sm:$0xff] }
 0x88c   : > { %v13087_v20 = vadd.f32 %v7190_v17, %v5628_v18  ;;  %v14047_v18 = vpack.i.bf16 %v7311_v27, %v7310_v35  ;;  %v14052_v22 = vpack.i.bf16 %v7314_v52, %v7313_v13 }
 0x88d   : > { %v7273_v3 = vadd.f32 %v7269_v33, %v7265_v8  ;;  %v7271_v10 = vadd.f32 %v13086_v38, %v7269_v33 }
 0x88e   : > { %v7272_v34 = vadd.f32 %v13087_v20, %v7269_v33 }
 0x88f   : > { %v7279_v41 = vmul.f32 0.2, %v7273_v3  ;;  %vm7274_vm1 = vcmp.ge.f32.partialorder %v7271_v10, 0.0  ;;  %v7277_v24 = vmul.f32 0.2, %v7271_v10  ;;  %vm7276_vm2 = vcmp.ge.f32.partialorder %v7273_v3, 0.0 }
 0x890   : > { %vm7275_vm14 = vcmp.ge.f32.partialorder %v7272_v34, 0.0  ;;  %v7278_v2 = vmul.f32 0.2, %v7272_v34 }
 0x891   : > { %v7280_v59 = vsel %vm7274_vm1, %v7271_v10, %v7277_v24  ;;  %v7282_v47 = vsel %vm7276_vm2, %v7273_v3, %v7279_v41  ;;  %v7324_v10 = vld [vmem:[%s16814_s10 + $0x28] sm:$0xff]  ;;  %vm16957_vm1 = vmmov %vm16953_vm3 }
 0x892   : > { %v7281_v51 = vsel %vm7275_vm14, %v7272_v34, %v7278_v2  ;;  %v7283_v37 = vmul.f32 %v14850_v53, %v7280_v59  ;;  %v7285_v48 = vmul.f32 %v14830_v21, %v7282_v47  ;;  %vm16958_vm2 = vmmov %vm16957_vm1 }
 0x893   : > { %v7284_v32 = vmul.f32 %v14862_v58, %v7281_v51  ;;  %vm16959_vm14 = vmmov %vm16957_vm1 }
 0x894   : > { %7289 = vrot.lane.b32.xlu0 %v7283_v37, %s16871_s14 }
 0x895   : > { %7291 = vrot.lane.b32.xlu1 %v7284_v32, %s16871_s14 }
 0x898   : > { %7293 = vrot.lane.b32.xlu0 %v7285_v48, %s16871_s14 }
 0x899   : > { %14033 = vrot.lane.b32.xlu1 %v14032_v43, %s16835_s25 }
 0x89c   : > { %14038 = vrot.lane.b32.xlu0 %v14037_v14, %s16835_s25 }
 0x89d   : > { %14043 = vrot.lane.b32.xlu1 %v14042_v39, %s16835_s25 }
 0x8a0   : > { %14048 = vrot.lane.b32.xlu0 %v14047_v18, %s16835_s25 }
 0x8a1   : > { %14053 = vrot.lane.b32.xlu1 %v14052_v22, %s16835_s25 }
 0x8a4   : > { %14058 = vrot.lane.b32.xlu0 %v14057_v6, %s16835_s25 }
 0x8a5   : > { %14063 = vrot.lane.b32.xlu1 %v14062_v50, %s16835_s25 }
 0x906   : > { %v7290_v7 = vpop.permute.xlu0 %7289 }
 0x907   : > { %7300 = vst.msk [vmem:[#allocation2 + $0x78] sm:$0xff] %vm2075_vm13, %v7290_v7  ;;  %v7292_v60 = vpop.permute.xlu1 %7291 }
 0x908   : > { %v7295_v29 = vsel %vm385_vm0, %v7290_v7, %v7292_v60 }
 0x90a   : > { %v7294_v11 = vpop.permute.xlu0 %7293 }
 0x90b   : > { %v7296_v56 = vsel %vm385_vm0, %v7292_v60, %v7294_v11  ;;  %v14034_v31 = vpop.permute.xlu1 %14033  ;;  %v7321_v11 = vld [vmem:[%s16809_s5] sm:$0xff] }
 0x90c   : > { %7302 = vst.msk [vmem:[#allocation2 + $0x88] sm:$0xff] %vm2078_vm4, %v7296_v56  ;;  %v14036_v30 = vunpack.i.h.bf16 %v14034_v31  ;;  %v14035_v46 = vunpack.i.l.bf16 %v14034_v31  ;;  %v7322_v56 = vld [vmem:[%s16809_s5 + $0x8] sm:$0xff] }
 0x90e   : > { %v14039_v1 = vpop.permute.xlu0 %14038  ;;  %v7318_v61 = vld [vmem:[#allocation2 + $0x78] sm:$0xff]  ;;  %v7390_v38 = vsel %vm16953_vm3, %v14035_v46, %v14036_v30  ;;  %vm16960_vm3 = vmmov %vm16957_vm1 }
 0x90f   : > { %v14041_v12 = vunpack.i.h.bf16 %v14039_v1  ;;  %v14040_v4 = vunpack.i.l.bf16 %v14039_v1  ;;  %v14044_v26 = vpop.permute.xlu1 %14043  ;;  %v14072_v63 = vpack.i.bf16 %v7318_v61, %v7315_v57 }
 0x910   : > { %v14046_v28 = vunpack.i.h.bf16 %v14044_v26  ;;  %v14045_v23 = vunpack.i.l.bf16 %v14044_v26 }
 0x911   : > { %v12922_v8 = vpack.c.bf16 %v14041_v12, %v14036_v30  ;;  %14073 = vrot.lane.b32.xlu1 %v14072_v63, %s16835_s25  ;;  %v7392_v17 = vsel %vm16954_vm15, %v14040_v4, %v14041_v12  ;;  %vm16961_vm15 = vmmov %vm16957_vm1 }
 0x912   : > { %v7389_v45 = vsel %vm16955_vm9, %v14045_v23, %v14035_v46  ;;  %v7391_v33 = vsel %vm16956_vm10, %v14046_v28, %v14040_v4  ;;  %v14049_v20 = vpop.permute.xlu0 %14048  ;;  %v12910_v3 = vpack.c.bf16 %v7392_v17, %v7390_v38  ;;  %vm16962_vm9 = vmmov %vm16957_vm1 }
 0x913   : > { %v12912_v34 = vpack.c.bf16 %v7391_v33, %v7389_v45  ;;  %v14051_v41 = vunpack.i.h.bf16 %v14049_v20  ;;  %v14050_v24 = vunpack.i.l.bf16 %v14049_v20  ;;  %v14054_v2 = vpop.permute.xlu1 %14053  ;;  %v7320_v59 = vld [vmem:[#allocation2 + $0x88] sm:$0xff]  ;;  %vm16963_vm10 = vmmov %vm16957_vm1 }
 0x914   : > { %v14056_v51 = vunpack.i.h.bf16 %v14054_v2  ;;  %v14055_v37 = vunpack.i.l.bf16 %v14054_v2  ;;  %12911 = vmatprep.subr.bf16.mxu1 %v12910_v3  ;;  %v14067_v47 = vpack.i.bf16 %v7320_v59, %v7295_v29 }
 0x915   : > { %7332 = vperm.xlu1 %13551, %v7324_v10   ;;  %12913 = vmatpush1.bf16.msra.mxu1 %v12912_v34  ;;  %v7394_v32 = vsel %vm16957_vm1, %v14050_v24, %v14051_v41 }
 0x916   : > { %v12926_v36 = vpack.c.bf16 %v14056_v51, %v14051_v41  ;;  %14068 = vrot.lane.b32.xlu0 %v14067_v47, %s16835_s25  ;;  %v14059_v40 = vpop.permute.xlu0 %14058  ;;  %v7396_v48 = vsel %vm16958_vm2, %v14055_v37, %v14056_v51  ;;  %vm7419_vm2 = vcmask 392192  }
 0x917   : > { %v14061_v43 = vunpack.i.h.bf16 %v14059_v40  ;;  %v14060_v62 = vunpack.i.l.bf16 %v14059_v40  ;;  %v12914_v42 = vpack.c.bf16 %v7396_v48, %v7394_v32  ;;  %v14064_v35 = vpop.permute.xlu1 %14063 }
 0x918   : > { %v14066_v52 = vunpack.i.h.bf16 %v14064_v35  ;;  %v14065_v18 = vunpack.i.l.bf16 %v14064_v35 }
 0x919   : > { %v7395_v14 = vsel %vm16959_vm14, %v14061_v43, %v14055_v37  ;;  %v7393_v9 = vsel %vm16960_vm3, %v14060_v62, %v14050_v24  ;;  %12915 = vmatprep.subr.bf16.mxu1 %v12914_v42  ;;  %vm16964_vm14 = vcmask 130048  }
 0x91a   : > { %v12916_v39 = vpack.c.bf16 %v7395_v14, %v7393_v9  ;;  %7327 = vperm.xlu0 %13430, %v7323_v44   ;;  %v7398_v50 = vsel %vm16963_vm10, %v14065_v18, %v14066_v52  ;;  %v16261_v14 = vld [vmem:[%s16810_s6 + $0x10] sm:$0xff]  ;;  %vm16968_vm3 = vmmov %vm16964_vm14 }
 0x91b   : > { %12386 = vmatprep.mubr.msk.f32.mxu0 %vm16964_vm14, %v16261_v14  ;;  %vm16971_vm10 = vmmov %vm16968_vm3 }
 0x91c   : > { %12917 = vmatpush1.bf16.msra.mxu1 %v12916_v39  ;;  %vm16974_vm14 = vmmov %vm16968_vm3 }
 0x983   : > { %v14074_v27 = vpop.permute.xlu1 %14073 }
 0x984   : > { %v14075_v13 = vunpack.i.l.bf16 %v14074_v27  ;;  %v14076_v54 = vunpack.i.h.bf16 %v14074_v27 }
 0x986   : > { %v7397_v6 = vsel %vm16961_vm15, %v14075_v13, %v14065_v18  ;;  %v7618_v18 = vld [vmem:[%s16814_s10 + $0x30] sm:$0xff]  ;;  %v7619_v13 = vld [vmem:[%s16814_s10 + $0x38] sm:$0xff]  ;;  %vm16969_vm15 = vmmov %vm16968_vm3 }
 0x988   : > { %v14069_v22 = vpop.permute.xlu0 %14068 }
 0x989   : > { %v14071_v16 = vunpack.i.h.bf16 %v14069_v22  ;;  %v14070_v25 = vunpack.i.l.bf16 %v14069_v22 }
 0x98b   : > { %v7399_v5 = vsel %vm16962_vm9, %v14076_v54, %v14070_v25  ;;  %v7400_v7 = vsel %vm16957_vm1, %v14070_v25, %v14071_v16  ;;  %v12930_v31 = vpack.c.bf16 %v14071_v16, %v14066_v52  ;;  %vm16970_vm9 = vmmov %vm16968_vm3  ;;  %vm16972_vm1 = vcmask 900096  }
 0x98c   : > { %v12920_v60 = vpack.c.bf16 %v7399_v5, %v7397_v6  ;;  %v12918_v29 = vpack.c.bf16 %v7400_v7, %v7398_v50 }
 0x98e   : > { %12919 = vmatprep.subr.bf16.mxu1 %v12918_v29 }
 0x98f   : > { %12921 = vmatpush1.bf16.msra.mxu1 %v12920_v60 }
 0x990   : > { %12923 = vmatprep.subr.bf16.mxu1 %v12922_v8 }
 0x992   : > { %11664 = vmatmul.mubr.msk.f32.vlgmr.msra.gmra.mrb[76].mxu1 %vm7419_vm2, %v7321_v11 }
 0x993   : > { %12925 = vmatpush3.bf16.msra.mxu1 %v12922_v8  ;;  %7496 = vmatprep.mubr.f32.mxu1 %v14407_v0 }
 0x994   : > { %12927 = vmatprep.subr.bf16.mxu1 %v12926_v36  ;;  %v7333_v4 = vpop.permute.xlu1 %7332 }
 0x996   : > { %11665 = vmatmul.mubr.msk.f32.gmra.mrb[78].mxu1 %vm7419_vm2, %v7322_v56 }
 0x997   : > { %12929 = vmatpush3.bf16.msra.mxu1 %v12926_v36  ;;  %12379 = vmatprep.mubr.msk.f32.mxu1 %vm7419_vm2, %v7321_v11 }
 0x998   : > { %12931 = vmatprep.subr.bf16.mxu1 %v12930_v31 }
 0x999   : > { %v7328_v30 = vpop.permute.xlu0 %7327 }
 0x99b   : > { %12933 = vmatpush3.bf16.msra.mxu1 %v12930_v31 }
 0x99e   : > { %12380 = vmatmul.mubr.msk.f32.vlgmr.msra.gmra.mrb[80].mxu1 %vm7419_vm2, %v7322_v56  ;;  %vm16973_vm2 = vmmov %vm16972_vm1 }
 0x99f   : > { %7728 = vmatprep.mubr.f32.mxu1 %v14407_v0 }
 0xa65   : > { %v7492_v46 = vpop.f32.mrb[76].mxu1 }
 0xa66   : > { %v7493_v1 = vadd.f32 %v7492_v46, %v7328_v30  ;;  %v7494_v57 = vpop.f32.mrb[77].mxu1 }
 0xa67   : > { %v7495_v61 = vadd.f32 %v7494_v57, %v7328_v30 }
 0xa68   : > { %v7578_v12 = vmul.f32 %v14850_v53, %v7493_v1 }
 0xa69   : > { %v7579_v26 = vmul.f32 %v14862_v58, %v7495_v61  ;;  %v7498_v63 = vpop.f32.mrb[78].mxu1 }
 0xa6a   : > { %v7499_v28 = vadd.f32 %v7498_v63, %v7333_v4  ;;  %v7500_v23 = vpop.f32.mrb[79].mxu1  ;;  %7590 = vrot.lane.b32.xlu0 %v7578_v12, %s16871_s14 }
 0xa6b   : > { %7592 = vrot.lane.b32.xlu1 %v7579_v26, %s16871_s14  ;;  %v7501_v3 = vadd.f32 %v7500_v23, %v7333_v4 }
 0xa6c   : > { %v7581_v8 = vmul.f32 %v14850_v53, %v7499_v28  ;;  %v7629_v28 = vld [vmem:[%s16810_s6 + $0x18] sm:$0xff] }
 0xa6d   : > { %v7582_v34 = vmul.f32 %v14862_v58, %v7501_v3 }
 0xa6f   : > { %7596 = vrot.lane.b32.xlu1 %v7581_v8, %s16871_s14 }
 0xa71   : > { %v12381_v38 = vpop.f32.mrb[80].mxu1 }
 0xa72   : > { %v7575_v17 = vadd.f32 %v12381_v38, %v7333_v4  ;;  %v7569_v45 = vpop.f32.mrb[81].mxu1 }
 0xa73   : > { %v7570_v33 = vadd.f32 %v7569_v45, %v7328_v30 }
 0xa74   : > { %v7583_v20 = vmul.f32 %v14830_v21, %v7575_v17 }
 0xa75   : > { %v7580_v10 = vmul.f32 %v14830_v21, %v7570_v33 }
 0xa76   : > { %7600 = vrot.lane.b32.xlu1 %v7583_v20, %s16871_s14 }
 0xa77   : > { %7594 = vrot.lane.b32.xlu0 %v7580_v10, %s16871_s14  ;;  %v7626_v10 = vld [vmem:[%s16810_s6] sm:$0xff] }
 0xa7b   : > { %7598 = vrot.lane.b32.xlu0 %v7582_v34, %s16871_s14 }
 0xadc   : > { %v16222_v41 = vpop.permute.xlu0 %7590 }
 0xadd   : > { %7612 = vst.msk [vmem:[#allocation3] sm:$0xff] %vm2075_vm13, %v16222_v41  ;;  %v7593_v24 = vpop.permute.xlu1 %7592 }
 0xade   : > { %v16228_v2 = vsel %vm385_vm0, %v16222_v41, %v7593_v24 }
 0xadf   : > { %7613 = vst [vmem:[#allocation3 + $0x8] sm:$0xff] %v16228_v2 }
 0xae1   : > { %v16231_v59 = vpop.permute.xlu1 %7596 }
 0xae2   : > { %7615 = vst.msk [vmem:[#allocation3 + $0x18] sm:$0xff] %vm2075_vm13, %v16231_v59 }
 0xae4   : > { %v16242_v32 = vld [vmem:[#allocation3] sm:$0xff] }
 0xae8   : > { %v7601_v40 = vpop.permute.xlu1 %7600 }
 0xae9   : > { %v7595_v51 = vpop.permute.xlu0 %7594  ;;  %v16235_v37 = vld [vmem:[#allocation3 + $0x18] sm:$0xff] }
 0xaea   : > { %v16238_v47 = vsel %vm385_vm0, %v7593_v24, %v7595_v51  ;;  %v12944_v36 = vpack.c.bf16 %v16235_v37, %v16242_v32  ;;  %v14087_v35 = vpack.i.bf16 %v16235_v37, %v16242_v32  ;;  %v7627_v37 = vld [vmem:[%s16810_s6 + $0x8] sm:$0xff] }
 0xaeb   : > { %7614 = vst.msk [vmem:[#allocation3 + $0x10] sm:$0xff] %vm2078_vm4, %v16238_v47 }
 0xaed   : > { %v7599_v48 = vpop.permute.xlu0 %7598 }
 0xaee   : > { %v16248_v43 = vsel %vm385_vm0, %v16231_v59, %v7599_v48  ;;  %v16251_v62 = vsel %vm385_vm0, %v7599_v48, %v7601_v40 }
 0xaef   : > { %7616 = vst [vmem:[#allocation3 + $0x20] sm:$0xff] %v16248_v43  ;;  %7617 = vst.msk [vmem:[#allocation3 + $0x28] sm:$0xff] %vm2078_vm4, %v16251_v62  ;;  %v12942_v42 = vpack.c.bf16 %v16248_v43, %v16228_v2 }
 0xaf2   : > { %v7622_v44 = vld [vmem:[#allocation3 + $0x10] sm:$0xff] }
 0xaf3   : > { %v14082_v9 = vpack.i.bf16 %v7622_v44, %v16228_v2 }
 0xaf5   : > { %14083 = vrot.lane.b32.xlu0 %v14082_v9, %s14411_s16 }
 0xaf6   : > { %v7625_v39 = vld [vmem:[#allocation3 + $0x28] sm:$0xff] }
 0xaf7   : > { %v14077_v27 = vpack.i.bf16 %v7625_v39, %v16248_v43  ;;  %v16270_v52 = vpack.c.bf16 %v7625_v39, %v7622_v44 }
 0xaf9   : > { %14088 = vrot.lane.b32.xlu0 %v14087_v35, %s14411_s16  ;;  %14078 = vrot.lane.b32.xlu1 %v14077_v27, %s14411_s16 }
 0xafd   : > { %14093 = vrot.lane.b32.xlu0 %v14077_v27, %s16839_s22  ;;  %14098 = vrot.lane.b32.xlu1 %v14082_v9, %s16839_s22 }
 0xb01   : > { %14113 = vrot.lane.b32.xlu0 %v14082_v9, %s16837_s24  ;;  %14103 = vrot.lane.b32.xlu1 %v14087_v35, %s16839_s22  ;;  %s17024_s22 = smov 109  }
 0xb05   : > { %14118 = vrot.lane.b32.xlu0 %v14087_v35, %s16837_s24  ;;  %14108 = vrot.lane.b32.xlu1 %v14077_v27, %s16837_s24  ;;  %s13254_s24 = smul.u32 768, %s14505_s21 }
 0xb07   : > { %s16758_s21 = scalar_lea.hbm %s16815_s11, %s13254_s24 }
 0xb09   : > { %14123 = vrot.lane.b32.xlu0 %v14077_v27, %s16835_s25  ;;  %14128 = vrot.lane.b32.xlu1 %v14082_v9, %s16835_s25 }
 0xb0d   : > { %14143 = vrot.lane.b32.xlu0 %v14082_v9, %s16965_s12  ;;  %14133 = vrot.lane.b32.xlu1 %v14087_v35, %s16835_s25  ;;  %s17022_s25 = smov 126  }
 0xb11   : > { %14148 = vrot.lane.b32.xlu0 %v14087_v35, %s16965_s12  ;;  %14138 = vrot.lane.b32.xlu1 %v14077_v27, %s16965_s12 }
 0xb15   : > { %14153 = vrot.lane.b32.xlu0 %v14077_v27, %s16908_s30  ;;  %14158 = vrot.lane.b32.xlu1 %v14082_v9, %s16908_s30 }
 0xb19   : > { %14173 = vrot.lane.b32.xlu0 %v14082_v9, %s16966_s15  ;;  %14163 = vrot.lane.b32.xlu1 %v14087_v35, %s16908_s30 }
 0xb1d   : > { %14178 = vrot.lane.b32.xlu0 %v14087_v35, %s16966_s15  ;;  %14168 = vrot.lane.b32.xlu1 %v14077_v27, %s16966_s15 }
 0xb21   : > { %14183 = vrot.lane.b32.xlu0 %v14077_v27, %s16967_s29  ;;  %14188 = vrot.lane.b32.xlu1 %v14082_v9, %s16967_s29 }
 0xb25   : > { %9292 = vperm.xlu0 %13430, %v7618_v18   ;;  %14193 = vrot.lane.b32.xlu1 %v14087_v35, %s16967_s29  ;;  %v7974_v18 = vld [vmem:[%s16810_s6 + $0x20] sm:$0xff] }
 0xb29   : > { %9297 = vperm.xlu1 %13551, %v7619_v13  }
 0xb67   : > { %v14084_v22 = vpop.permute.xlu0 %14083 }
 0xb68   : > { %v14086_v54 = vunpack.i.h.bf16 %v14084_v22  ;;  %v14085_v16 = vunpack.i.l.bf16 %v14084_v22 }
 0xb6a   : > { %v7649_v29 = vsel %vm544_vm6, %v14085_v16, %v14086_v54 }
 0xb6b   : > { %v14079_v25 = vpop.permute.xlu1 %14078  ;;  %v14089_v6 = vpop.permute.xlu0 %14088 }
 0xb6c   : > { %v14081_v5 = vunpack.i.h.bf16 %v14079_v25  ;;  %v14080_v50 = vunpack.i.l.bf16 %v14079_v25  ;;  %v14091_v7 = vunpack.i.h.bf16 %v14089_v6  ;;  %v14090_v60 = vunpack.i.l.bf16 %v14089_v6 }
 0xb6e   : > { %v12938_v11 = vpack.c.bf16 %v14081_v5, %v14086_v54  ;;  %v7650_v56 = vsel %vm544_vm6, %v14091_v7, %v14080_v50  ;;  %v7648_v31 = vsel %vm544_vm6, %v14090_v60, %v14085_v16  ;;  %v7651_v30 = vsel %vm544_vm6, %v14080_v50, %v14081_v5  ;;  %v7975_v7 = vld [vmem:[%s16810_s6 + $0x28] sm:$0xff] }
 0xb6f   : > { %v12936_v46 = vpack.c.bf16 %v7650_v56, %v7648_v31  ;;  %v14099_v1 = vpop.permute.xlu1 %14098  ;;  %v14094_v57 = vpop.permute.xlu0 %14093  ;;  %v12934_v61 = vpack.c.bf16 %v7651_v30, %v7649_v29 }
 0xb70   : > { %v14101_v12 = vunpack.i.h.bf16 %v14099_v1  ;;  %v14100_v4 = vunpack.i.l.bf16 %v14099_v1  ;;  %v14096_v26 = vunpack.i.h.bf16 %v14094_v57  ;;  %v14095_v63 = vunpack.i.l.bf16 %v14094_v57  ;;  %12939 = vmatprep.subr.bf16.mxu0 %v12938_v11 }
 0xb71   : > { %12935 = vmatprep.subr.bf16.mxu1 %v12934_v61  ;;  %12941 = vmatpush3.bf16.msra.mxu0 %v12938_v11  ;;  %v8162_v61 = vld [vmem:[%s16810_s6 + $0x30] sm:$0xff] }
 0xb72   : > { %12937 = vmatpush1.bf16.msra.mxu1 %v12936_v46  ;;  %12947 = vmatprep.subr.bf16.mxu0 %v16270_v52  ;;  %v7989_v23 = vsel %vm857_vm7, %v14100_v4, %v14101_v12  ;;  %v7991_v8 = vsel %vm857_vm7, %v14095_v63, %v14096_v26  ;;  %v12954_v45 = vpack.c.bf16 %v14096_v26, %v14101_v12 }
 0xb73   : > { %v14104_v38 = vpop.permute.xlu1 %14103  ;;  %v14114_v17 = vpop.permute.xlu0 %14113  ;;  %12943 = vmatprep.subr.bf16.mxu1 %v12942_v42  ;;  %v12950_v3 = vpack.c.bf16 %v7991_v8, %v7989_v23 }
 0xb74   : > { %12387 = vmatmul.mubr.msk.f32.vlgmr.msra.gmra.mrb[8].mxu0 %vm16968_vm3, %v7629_v28  ;;  %v14106_v33 = vunpack.i.h.bf16 %v14104_v38  ;;  %v14105_v20 = vunpack.i.l.bf16 %v14104_v38  ;;  %v14116_v34 = vunpack.i.h.bf16 %v14114_v17  ;;  %v14115_v24 = vunpack.i.l.bf16 %v14114_v17  ;;  %v8163_v17 = vld [vmem:[%s16810_s6 + $0x38] sm:$0xff] }
 0xb75   : > { %11668 = vmatmul.mubr.msk.f32.vlgmr.msra.gmra.mrb[82].mxu1 %vm16969_vm15, %v16261_v14  ;;  %12949 = vmatpush3.bf16.msra.mxu0 %v16270_v52  ;;  %vm16975_vm15 = vmmov %vm16968_vm3 }
 0xb76   : > { %12945 = vmatpush1.bf16.msra.mxu1 %v12944_v36  ;;  %12955 = vmatprep.subr.bf16.mxu0 %v12954_v45  ;;  %v7988_v43 = vsel %vm857_vm7, %v14105_v20, %v14100_v4  ;;  %v7990_v42 = vsel %vm857_vm7, %v14106_v33, %v14095_v63  ;;  %v8177_v36 = vsel %vm16972_vm1, %v14115_v24, %v14116_v34 }
 0xb77   : > { %v14109_v2 = vpop.permute.xlu1 %14108  ;;  %v14119_v51 = vpop.permute.xlu0 %14118  ;;  %12951 = vmatprep.subr.bf16.mxu1 %v12950_v3  ;;  %7734 = vmatprep.mubr.f32.mxu1 %v14407_v0  ;;  %v12952_v35 = vpack.c.bf16 %v7990_v42, %v7988_v43 }
 0xb78   : > { %v14111_v40 = vunpack.i.h.bf16 %v14109_v2  ;;  %v14110_v48 = vunpack.i.l.bf16 %v14109_v2  ;;  %12393 = vmatprep.mubr.msk.f32.mxu0 %vm16970_vm9, %v7626_v10  ;;  %v14121_v27 = vunpack.i.h.bf16 %v14119_v51  ;;  %v14120_v52 = vunpack.i.l.bf16 %v14119_v51  ;;  %vm16976_vm9 = vmmov %vm16972_vm1  ;;  %v8350_v51 = vld [vmem:[%s16810_s6 + $0x40] sm:$0xff] }
 0xb79   : > { %11669 = vmatmul.mubr.msk.f32.gmra.mrb[84].mxu1 %vm16971_vm10, %v7629_v28  ;;  %vm16977_vm10 = vmmov %vm16972_vm1 }
 0xb7a   : > { %v12962_v32 = vpack.c.bf16 %v14111_v40, %v14116_v34  ;;  %7886 = vmatprep.mubr.f32.mxu1 %v14407_v0  ;;  %v8179_v44 = vsel %vm16973_vm2, %v14110_v48, %v14111_v40  ;;  %v8178_v5 = vsel %vm16976_vm9, %v14121_v27, %v14110_v48  ;;  %v8176_v50 = vsel %vm16977_vm10, %v14120_v52, %v14115_v24  ;;  %vm16978_vm1 = vmmov %vm16968_vm3 }
 0xb7b   : > { %v14129_v14 = vpop.permute.xlu1 %14128  ;;  %v14124_v9 = vpop.permute.xlu0 %14123  ;;  %v12958_v39 = vpack.c.bf16 %v8179_v44, %v8177_v36  ;;  %vm16979_vm2 = vcmask 891904   ;;  %v12960_v31 = vpack.c.bf16 %v8178_v5, %v8176_v50  ;;  %vm16983_vm9 = vmmov %vm16978_vm1  ;;  %v8351_v44 = vld [vmem:[%s16810_s6 + $0x48] sm:$0xff] }
 0xb7c   : > { %12394 = vmatmul.mubr.msk.f32.vlgmr.msra.gmra.mrb[8].mxu0 %vm16974_vm14, %v7627_v37  ;;  %v14131_v13 = vunpack.i.h.bf16 %v14129_v14  ;;  %v14130_v22 = vunpack.i.l.bf16 %v14129_v14  ;;  %v14126_v54 = vunpack.i.h.bf16 %v14124_v9  ;;  %v14125_v16 = vunpack.i.l.bf16 %v14124_v9  ;;  %vm16980_vm14 = vmmov %vm16979_vm2 }
 0xb7d   : > { %12957 = vmatpush3.bf16.msra.mxu0 %v12954_v45  ;;  %11672 = vmatmul.mubr.msk.f32.vlgmr.msra.gmra.mrb[82].mxu1 %vm16968_vm3, %v7626_v10  ;;  %vm16981_vm3 = vmmov %vm16978_vm1 }
 0xb7e   : > { %12953 = vmatpush1.bf16.msra.mxu1 %v12952_v35  ;;  %12963 = vmatprep.subr.bf16.mxu0 %v12962_v32  ;;  %v8365_v60 = vsel %vm16979_vm2, %v14130_v22, %v14131_v13  ;;  %v8367_v29 = vsel %vm16980_vm14, %v14125_v16, %v14126_v54  ;;  %v12970_v30 = vpack.c.bf16 %v14126_v54, %v14131_v13  ;;  %vm16984_vm10 = vmmov %vm16979_vm2  ;;  %vm16987_vm14 = vcmask 883712   ;;  %v8538_v54 = vld [vmem:[%s16810_s6 + $0x50] sm:$0xff] }
 0xb7f   : > { %12959 = vmatprep.subr.bf16.mxu1 %v12958_v39  ;;  %v14134_v25 = vpop.permute.xlu1 %14133  ;;  %v14144_v6 = vpop.permute.xlu0 %14143  ;;  %7892 = vmatprep.mubr.f32.mxu1 %v14407_v0  ;;  %v12966_v57 = vpack.c.bf16 %v8367_v29, %v8365_v60  ;;  %v8539_v60 = vld [vmem:[%s16810_s6 + $0x58] sm:$0xff] }
 0xb80   : > { %12400 = vmatprep.mubr.msk.f32.mxu0 %vm16975_vm15, %v7974_v18  ;;  %v14136_v46 = vunpack.i.h.bf16 %v14134_v25  ;;  %v14135_v1 = vunpack.i.l.bf16 %v14134_v25  ;;  %vm16982_vm15 = vmmov %vm16978_vm1  ;;  %v14146_v63 = vunpack.i.h.bf16 %v14144_v6  ;;  %v14145_v28 = vunpack.i.l.bf16 %v14144_v6 }
 0xb81   : > { %11673 = vmatmul.mubr.msk.f32.gmra.mrb[84].mxu1 %vm16978_vm1, %v7627_v37  ;;  %vm16985_vm1 = vmmov %vm16979_vm2 }
 0xb82   : > { %8068 = vmatprep.mubr.f32.mxu1 %v14407_v0  ;;  %v8364_v23 = vsel %vm16984_vm10, %v14135_v1, %v14130_v22  ;;  %v8366_v8 = vsel %vm16985_vm1, %v14136_v46, %v14125_v16  ;;  %vm16986_vm2 = vmmov %vm16981_vm3 }
 0xb83   : > { %v14139_v11 = vpop.permute.xlu1 %14138  ;;  %v14149_v56 = vpop.permute.xlu0 %14148  ;;  %v12968_v33 = vpack.c.bf16 %v8366_v8, %v8364_v23  ;;  %vm16991_vm10 = vmmov %vm16986_vm2 }
 0xb84   : > { %12401 = vmatmul.mubr.msk.f32.vlgmr.msra.gmra.mrb[8].mxu0 %vm16981_vm3, %v7975_v7  ;;  %v14141_v12 = vunpack.i.h.bf16 %v14139_v11  ;;  %v14140_v4 = vunpack.i.l.bf16 %v14139_v11  ;;  %vm16988_vm3 = vmmov %vm16986_vm2  ;;  %v14151_v10 = vunpack.i.h.bf16 %v14149_v56  ;;  %v14150_v34 = vunpack.i.l.bf16 %v14149_v56 }
 0xb85   : > { %12965 = vmatpush3.bf16.msra.mxu0 %v12962_v32  ;;  %11676 = vmatmul.mubr.msk.f32.vlgmr.msra.gmra.mrb[82].mxu1 %vm16982_vm15, %v7974_v18  ;;  %vm16989_vm15 = vmmov %vm16987_vm14 }
 0xb86   : > { %12961 = vmatpush1.bf16.msra.mxu1 %v12960_v31  ;;  %12971 = vmatprep.subr.bf16.mxu0 %v12970_v30  ;;  %v8555_v45 = vsel %vm16987_vm14, %v14140_v4, %v14141_v12  ;;  %v12978_v20 = vpack.c.bf16 %v14141_v12, %v14146_v63  ;;  %v8553_v3 = vsel %vm16989_vm15, %v14145_v28, %v14146_v63  ;;  %vm16992_vm1 = vmmov %vm16987_vm14  ;;  %v8726_v12 = vld [vmem:[%s16810_s6 + $0x60] sm:$0xff] }
 0xb87   : > { %12967 = vmatprep.subr.bf16.mxu1 %v12966_v57  ;;  %v14159_v26 = vpop.permute.xlu1 %14158  ;;  %8074 = vmatprep.mubr.f32.mxu1 %v14407_v0  ;;  %v14154_v38 = vpop.permute.xlu0 %14153  ;;  %v12974_v2 = vpack.c.bf16 %v8555_v45, %v8553_v3  ;;  %v8554_v32 = vsel %vm16992_vm1, %v14151_v10, %v14140_v4  ;;  %vm16994_vm14 = vmmov %vm16988_vm3 }
 0xb88   : > { %12407 = vmatprep.mubr.msk.f32.mxu0 %vm16983_vm9, %v8162_v61  ;;  %vm16990_vm9 = vmmov %vm16986_vm2  ;;  %v14161_v40 = vunpack.i.h.bf16 %v14159_v26  ;;  %v14160_v48 = vunpack.i.l.bf16 %v14159_v26  ;;  %v14156_v43 = vunpack.i.h.bf16 %v14154_v38  ;;  %v14155_v42 = vunpack.i.l.bf16 %v14154_v38  ;;  %v8727_v38 = vld [vmem:[%s16810_s6 + $0x68] sm:$0xff] }
 0xb89   : > { %11677 = vmatmul.mubr.msk.f32.gmra.mrb[84].mxu1 %vm16986_vm2, %v7975_v7  ;;  %vm16993_vm2 = vmmov %vm16992_vm1 }
 0xb8a   : > { %8256 = vmatprep.mubr.f32.mxu1 %v14407_v0  ;;  %v8552_v36 = vsel %vm16993_vm2, %v14150_v34, %v14145_v28  ;;  %v12986_v27 = vpack.c.bf16 %v14156_v43, %v14161_v40  ;;  %vm16998_vm1 = vmmov %vm16990_vm9 }
 0xb8b   : > { %v14164_v24 = vpop.permute.xlu1 %14163  ;;  %v14174_v37 = vpop.permute.xlu0 %14173  ;;  %v12976_v35 = vpack.c.bf16 %v8554_v32, %v8552_v36 }
 0xb8c   : > { %12408 = vmatmul.mubr.msk.f32.vlgmr.msra.gmra.mrb[8].mxu0 %vm16988_vm3, %v8163_v17  ;;  %vm16995_vm3 = vcmask 752640   ;;  %v14166_v52 = vunpack.i.h.bf16 %v14164_v24  ;;  %v14165_v18 = vunpack.i.l.bf16 %v14164_v24  ;;  %v14176_v6 = vunpack.i.h.bf16 %v14174_v37 }
 0xb8d   : > { %12973 = vmatpush3.bf16.msra.mxu0 %v12970_v30  ;;  %11680 = vmatmul.mubr.msk.f32.vlgmr.msra.gmra.mrb[82].mxu1 %vm16990_vm9, %v8162_v61  ;;  %v8741_v14 = vsel %vm16995_vm3, %v14160_v48, %v14161_v40  ;;  %vm16996_vm15 = vmmov %vm16995_vm3  ;;  %v14175_v5 = vunpack.i.l.bf16 %v14174_v37  ;;  %v9103_v37 = vld [vmem:[%s16810_s6 + $0x88] sm:$0xff] }
 0xb8e   : > { %12969 = vmatpush1.bf16.msra.mxu1 %v12968_v33  ;;  %12979 = vmatprep.subr.bf16.mxu0 %v12978_v20  ;;  %v8743_v9 = vsel %vm16996_vm15, %v14155_v42, %v14156_v43  ;;  %vm16999_vm2 = vmmov %vm16995_vm3  ;;  %vm17002_vm15 = vcmask 744448  }
 0xb8f   : > { %12975 = vmatprep.subr.bf16.mxu1 %v12974_v2  ;;  %8262 = vmatprep.mubr.f32.mxu1 %v14407_v0  ;;  %v14169_v39 = vpop.permute.xlu1 %14168  ;;  %v14179_v13 = vpop.permute.xlu0 %14178  ;;  %v12982_v22 = vpack.c.bf16 %v8743_v9, %v8741_v14  ;;  %v8740_v50 = vsel %vm16999_vm2, %v14165_v18, %v14160_v48  ;;  %vm17001_vm3 = vmmov %vm16998_vm1  ;;  %v8914_v2 = vld [vmem:[%s16810_s6 + $0x70] sm:$0xff]  ;;  %v8915_v48 = vld [vmem:[%s16810_s6 + $0x78] sm:$0xff] }
 0xb90   : > { %12414 = vmatprep.mubr.msk.f32.mxu0 %vm16991_vm10, %v8350_v51  ;;  %vm16997_vm10 = vmmov %vm16990_vm9  ;;  %v14171_v16 = vunpack.i.h.bf16 %v14169_v39  ;;  %v14170_v25 = vunpack.i.l.bf16 %v14169_v39  ;;  %v14181_v1 = vunpack.i.h.bf16 %v14179_v13  ;;  %v14180_v57 = vunpack.i.l.bf16 %v14179_v13 }
 0xb91   : > { %11681 = vmatmul.mubr.msk.f32.gmra.mrb[84].mxu1 %vm16994_vm14, %v8163_v17  ;;  %vm17000_vm14 = vmmov %vm16999_vm2 }
 0xb92   : > { %8444 = vmatprep.mubr.f32.mxu1 %v14407_v0  ;;  %v8742_v7 = vsel %vm17000_vm14, %v14166_v52, %v14155_v42  ;;  %v8931_v29 = vsel %vm17002_vm15, %v14170_v25, %v14171_v16  ;;  %v12994_v30 = vpack.c.bf16 %v14171_v16, %v14176_v6  ;;  %vm17005_vm2 = vmmov %vm16998_vm1  ;;  %v9102_v42 = vld [vmem:[%s16810_s6 + $0x80] sm:$0xff] }
 0xb93   : > { %v14189_v11 = vpop.permute.xlu1 %14188  ;;  %v14184_v56 = vpop.permute.xlu0 %14183  ;;  %v12984_v31 = vpack.c.bf16 %v8742_v7, %v8740_v50 }
 0xb94   : > { %12415 = vmatmul.mubr.msk.f32.vlgmr.msra.gmra.mrb[8].mxu0 %vm16990_vm9, %v8351_v44  ;;  %vm17003_vm9 = vmmov %vm16998_vm1  ;;  %v14191_v4 = vunpack.i.h.bf16 %v14189_v11  ;;  %v14190_v26 = vunpack.i.l.bf16 %v14189_v11  ;;  %v14186_v63 = vunpack.i.h.bf16 %v14184_v56  ;;  %v14185_v28 = vunpack.i.l.bf16 %v14184_v56 }
 0xb95   : > { %12981 = vmatpush3.bf16.msra.mxu0 %v12978_v20  ;;  %11684 = vmatmul.mubr.msk.f32.vlgmr.msra.gmra.mrb[82].mxu1 %vm16997_vm10, %v8350_v51  ;;  %vm17004_vm10 = vmmov %vm17002_vm15 }
 0xb96   : > { %12977 = vmatpush1.bf16.msra.mxu1 %v12976_v35  ;;  %12987 = vmatprep.subr.bf16.mxu0 %v12986_v27  ;;  %v8929_v46 = vsel %vm17004_vm10, %v14175_v5, %v14176_v6  ;;  %vm17006_vm14 = vmmov %vm17004_vm10  ;;  %v13002_v3 = vpack.c.bf16 %v14186_v63, %v14191_v4 }
 0xb97   : > { %12983 = vmatprep.subr.bf16.mxu1 %v12982_v22  ;;  %8450 = vmatprep.mubr.f32.mxu1 %v14407_v0  ;;  %v12990_v61 = vpack.c.bf16 %v8931_v29, %v8929_v46  ;;  %v8930_v23 = vsel %vm17006_vm14, %v14181_v1, %v14170_v25  ;;  %vm17008_vm15 = vmmov %vm16998_vm1  ;;  %v14194_v17 = vpop.permute.xlu1 %14193 }
 0xb98   : > { %12421 = vmatprep.mubr.msk.f32.mxu0 %vm16998_vm1, %v8538_v54  ;;  %v14196_v10 = vunpack.i.h.bf16 %v14194_v17  ;;  %v14195_v34 = vunpack.i.l.bf16 %v14194_v17  ;;  %vm17012_vm14 = vmmov %vm16998_vm1 }
 0xb99   : > { %11685 = vmatmul.mubr.msk.f32.gmra.mrb[84].mxu1 %vm17001_vm3, %v8351_v44  ;;  %vm17007_vm3 = vmmov %vm17004_vm10 }
 0xb9a   : > { %8632 = vmatprep.mubr.f32.mxu1 %v14407_v0  ;;  %v8928_v8 = vsel %vm17007_vm3, %v14180_v57, %v14175_v5 }
 0xb9b   : > { %v12992_v20 = vpack.c.bf16 %v8930_v23, %v8928_v8 }
 0xb9c   : > { %12422 = vmatmul.mubr.msk.f32.vlgmr.msra.gmra.mrb[8].mxu0 %vm17003_vm9, %v8539_v60  ;;  %vm17009_vm9 = vcmask 736256  }
 0xb9d   : > { %12989 = vmatpush3.bf16.msra.mxu0 %v12986_v27  ;;  %11688 = vmatmul.mubr.msk.f32.vlgmr.msra.gmra.mrb[82].mxu1 %vm16998_vm1, %v8538_v54  ;;  %v9117_v45 = vsel %vm17009_vm9, %v14190_v26, %v14191_v4  ;;  %vm17010_vm10 = vmmov %vm17009_vm9 }
 0xb9e   : > { %12985 = vmatpush1.bf16.msra.mxu1 %v12984_v31  ;;  %12995 = vmatprep.subr.bf16.mxu0 %v12994_v30  ;;  %v9119_v33 = vsel %vm17010_vm10, %v14185_v28, %v14186_v63  ;;  %vm17013_vm3 = vmmov %vm17009_vm9 }
 0xb9f   : > { %12991 = vmatprep.subr.bf16.mxu1 %v12990_v61  ;;  %8638 = vmatprep.mubr.f32.mxu1 %v14407_v0  ;;  %v12998_v24 = vpack.c.bf16 %v9119_v33, %v9117_v45  ;;  %v9116_v51 = vsel %vm17013_vm3, %v14195_v34, %v14190_v26  ;;  %vm17015_vm9 = vmmov %vm16998_vm1 }
 0xba0   : > { %12428 = vmatprep.mubr.msk.f32.mxu0 %vm17005_vm2, %v8726_v12  ;;  %vm17011_vm2 = vmmov %vm16998_vm1 }
 0xba1   : > { %11689 = vmatmul.mubr.msk.f32.gmra.mrb[84].mxu1 %vm17008_vm15, %v8539_v60  ;;  %vm17014_vm15 = vmmov %vm17013_vm3 }
 0xba2   : > { %8820 = vmatprep.mubr.f32.mxu1 %v14407_v0  ;;  %v9118_v40 = vsel %vm17014_vm15, %v14196_v10, %v14185_v28  ;;  %vm17016_vm10 = vmmov %vm16998_vm1 }
 0xba3   : > { %v13000_v43 = vpack.c.bf16 %v9118_v40, %v9116_v51  ;;  %vm17019_vm3 = vmmov %vm16998_vm1 }
 0xba4   : > { %12429 = vmatmul.mubr.msk.f32.vlgmr.msra.gmra.mrb[8].mxu0 %vm16998_vm1, %v8727_v38  ;;  %vm17020_vm15 = vmmov %vm16998_vm1  ;;  %v9293_v32 = vpop.permute.xlu0 %9292 }
 0xba5   : > { %12997 = vmatpush3.bf16.msra.mxu0 %v12994_v30  ;;  %11692 = vmatmul.mubr.msk.f32.vlgmr.msra.gmra.mrb[82].mxu1 %vm17011_vm2, %v8726_v12  ;;  %vm17017_vm2 = vmmov %vm16998_vm1 }
 0xba6   : > { %12993 = vmatpush1.bf16.msra.mxu1 %v12992_v20  ;;  %13003 = vmatprep.subr.bf16.mxu0 %v13002_v3 }
 0xba7   : > { %12999 = vmatprep.subr.bf16.mxu1 %v12998_v24  ;;  %8826 = vmatprep.mubr.f32.mxu1 %v14407_v0 }
 0xba8   : > { %12435 = vmatprep.mubr.msk.f32.mxu0 %vm17012_vm14, %v8914_v2  ;;  %vm17018_vm14 = vmmov %vm16998_vm1  ;;  %v9298_v52 = vpop.permute.xlu1 %9297 }
 0xba9   : > { %11693 = vmatmul.mubr.msk.f32.gmra.mrb[84].mxu1 %vm17015_vm9, %v8727_v38  ;;  %vm17021_vm9 = vmmov %vm16998_vm1 }
 0xbaa   : > { %9008 = vmatprep.mubr.f32.mxu1 %v14407_v0 }
 0xbac   : > { %12436 = vmatmul.mubr.msk.f32.vlgmr.msra.gmra.mrb[8].mxu0 %vm17016_vm10, %v8915_v48 }
 0xbad   : > { %13005 = vmatpush3.bf16.msra.mxu0 %v13002_v3  ;;  %11696 = vmatmul.mubr.msk.f32.vlgmr.msra.gmra.mrb[82].mxu1 %vm16998_vm1, %v8914_v2 }
 0xbae   : > { %13001 = vmatpush1.bf16.msra.mxu1 %v13000_v43  ;;  %9014 = vmatprep.mubr.f32.mxu1 %v14407_v0 }
 0xbaf   : > { %12442 = vmatprep.mubr.msk.f32.mxu0 %vm17017_vm2, %v9102_v42  ;;  %13078 = vmatprep.subr.bf16.mxu1 %v14409_v15 }
 0xbb1   : > { %11697 = vmatmul.mubr.msk.f32.gmra.mrb[84].mxu1 %vm17018_vm14, %v8915_v48 }
 0xbb2   : > { %9196 = vmatprep.mubr.f32.mxu1 %v14407_v0 }
 0xbb4   : > { %12443 = vmatmul.mubr.msk.f32.vlgmr.msra.gmra.mrb[8].mxu0 %vm17019_vm3, %v9103_v37 }
 0xbb5   : > { %11700 = vmatmul.mubr.msk.f32.vlgmr.msra.gmra.mrb[82].mxu1 %vm17020_vm15, %v9102_v42  ;;  %9474 = vmatprep.mubr.f32.mxu0 %v14407_v0 }
 0xbb6   : > { %9202 = vmatprep.mubr.f32.mxu1 %v14407_v0 }
 0xbb9   : > { %11701 = vmatmul.mubr.msk.f32.gmra.mrb[84].mxu1 %vm17021_vm9, %v9103_v37 }
 0xbba   : > { %12512 = vmatprep.mubr.msk.f32.mxu1 %vm14410_vm5, %v14407_v0 }
 0xc87   : > { %v12444_v36 = vpop.f32.mrb[8].mxu0 }
 0xc88   : > { %v9198_v44 = vpop.f32.mrb[82].mxu1  ;;  %v9275_v14 = vpop.f32.mrb[9].mxu0  ;;  %v9305_v22 = vadd.f32 %v12444_v36, %v9298_v52  ;;  %v9365_v36 = vld [vmem:[%s16814_s10 + $0x48] sm:$0xff] }
 0xc89   : > { %v9300_v9 = vadd.f32 %v9293_v32, %v9198_v44  ;;  %v9302_v39 = vadd.f32 %v9293_v32, %v9275_v14  ;;  %v9200_v35 = vpop.f32.mrb[83].mxu1 }
 0xc8a   : > { %v9301_v27 = vadd.f32 %v9293_v32, %v9200_v35  ;;  %v9317_v31 = vmul.f32 0.2, %v9305_v22  ;;  %vm9311_vm15 = vcmp.ge.f32.partialorder %v9305_v22, 0.0  ;;  %v9364_v32 = vld [vmem:[%s16814_s10 + $0x40] sm:$0xff] }
 0xc8b   : > { %vm9306_vm10 = vcmp.ge.f32.partialorder %v9300_v9, 0.0  ;;  %v9312_v18 = vmul.f32 0.2, %v9300_v9  ;;  %v9314_v13 = vmul.f32 0.2, %v9302_v39  ;;  %vm9308_vm1 = vcmp.ge.f32.partialorder %v9302_v39, 0.0 }
 0xc8c   : > { %vm9307_vm2 = vcmp.ge.f32.partialorder %v9301_v27, 0.0  ;;  %v9313_v54 = vmul.f32 0.2, %v9301_v27  ;;  %v9204_v16 = vpop.f32.mrb[84].mxu1  ;;  %v9323_v12 = vsel %vm9311_vm15, %v9305_v22, %v9317_v31 }
 0xc8d   : > { %v9318_v25 = vsel %vm9306_vm10, %v9300_v9, %v9312_v18  ;;  %v9303_v6 = vadd.f32 %v9298_v52, %v9204_v16  ;;  %v9206_v5 = vpop.f32.mrb[85].mxu1  ;;  %v9320_v29 = vsel %vm9308_vm1, %v9302_v39, %v9314_v13  ;;  %v9329_v26 = vmul.f32 %v14830_v21, %v9323_v12 }
 0xc8e   : > { %v9324_v50 = vmul.f32 %v14850_v53, %v9318_v25  ;;  %v9319_v7 = vsel %vm9307_vm2, %v9301_v27, %v9313_v54  ;;  %v9304_v60 = vadd.f32 %v9298_v52, %v9206_v5  ;;  %v9326_v1 = vmul.f32 %v14830_v21, %v9320_v29 }
 0xc8f   : > { %v9325_v11 = vmul.f32 %v14862_v58, %v9319_v7  ;;  %vm9309_vm14 = vcmp.ge.f32.partialorder %v9303_v6, 0.0  ;;  %v9315_v56 = vmul.f32 0.2, %v9303_v6  ;;  %v9374_v7 = vld [vmem:[%s16811_s7 + $0x10] sm:$0xff] }
 0xc90   : > { %vm9310_vm3 = vcmp.ge.f32.partialorder %v9304_v60, 0.0  ;;  %v9316_v30 = vmul.f32 0.2, %v9304_v60  ;;  %9336 = vrot.lane.b32.xlu0 %v9324_v50, %s16871_s14 }
 0xc91   : > { %v9321_v46 = vsel %vm9309_vm14, %v9303_v6, %v9315_v56  ;;  %9338 = vrot.lane.b32.xlu1 %v9325_v11, %s16871_s14 }
 0xc92   : > { %v9327_v57 = vmul.f32 %v14850_v53, %v9321_v46  ;;  %v9322_v61 = vsel %vm9310_vm3, %v9304_v60, %v9316_v30  ;;  %v9375_v60 = vld [vmem:[%s16811_s7 + $0x18] sm:$0xff] }
 0xc93   : > { %v9328_v4 = vmul.f32 %v14862_v58, %v9322_v61 }
 0xc94   : > { %9340 = vrot.lane.b32.xlu0 %v9326_v1, %s16871_s14 }
 0xc95   : > { %9342 = vrot.lane.b32.xlu1 %v9327_v57, %s16871_s14  ;;  %v9372_v57 = vld [vmem:[%s16811_s7] sm:$0xff] }
 0xc98   : > { %9344 = vrot.lane.b32.xlu0 %v9328_v4, %s16871_s14 }
 0xc99   : > { %9346 = vrot.lane.b32.xlu1 %v9329_v26, %s16871_s14 }
 0xd02   : > { %v9337_v63 = vpop.permute.xlu0 %9336 }
 0xd03   : > { %9358 = vst.msk [vmem:[#allocation4] sm:$0xff] %vm2075_vm13, %v9337_v63  ;;  %v9339_v28 = vpop.permute.xlu1 %9338 }
 0xd04   : > { %v16463_v23 = vsel %vm385_vm0, %v9337_v63, %v9339_v28 }
 0xd06   : > { %v9341_v8 = vpop.permute.xlu0 %9340 }
 0xd07   : > { %v9349_v38 = vsel %vm385_vm0, %v9339_v28, %v9341_v8  ;;  %v9343_v17 = vpop.permute.xlu1 %9342  ;;  %v9373_v28 = vld [vmem:[%s16811_s7 + $0x8] sm:$0xff] }
 0xd08   : > { %9360 = vst.msk [vmem:[#allocation4 + $0x10] sm:$0xff] %vm2078_vm4, %v9349_v38 }
 0xd09   : > { %9361 = vst.msk [vmem:[#allocation4 + $0x18] sm:$0xff] %vm2075_vm13, %v9343_v17  ;;  %vm17025_vm13 = vmmov %vm17021_vm9 }
 0xd0a   : > { %v9345_v45 = vpop.permute.xlu0 %9344  ;;  %v16478_v51 = vld [vmem:[#allocation4] sm:$0xff] }
 0xd0b   : > { %v16469_v33 = vsel %vm385_vm0, %v9343_v17, %v9345_v45  ;;  %v9347_v20 = vpop.permute.xlu1 %9346 }
 0xd0c   : > { %v9351_v3 = vsel %vm385_vm0, %v9345_v45, %v9347_v20  ;;  %v13014_v10 = vpack.c.bf16 %v16469_v33, %v16463_v23 }
 0xd0d   : > { %9363 = vst.msk [vmem:[#allocation4 + $0x28] sm:$0xff] %vm2078_vm4, %v9351_v3 }
 0xd0f   : > { %v9368_v34 = vld [vmem:[#allocation4 + $0x10] sm:$0xff] }
 0xd10   : > { %v16475_v24 = vld [vmem:[#allocation4 + $0x18] sm:$0xff]  ;;  %v14197_v2 = vpack.i.bf16 %v9368_v34, %v16463_v23 }
 0xd11   : > { %v13016_v40 = vpack.c.bf16 %v16475_v24, %v16478_v51  ;;  %v14207_v48 = vpack.i.bf16 %v16475_v24, %v16478_v51 }
 0xd12   : > { %14198 = vrot.lane.b32.xlu0 %v14197_v2, %s14411_s16 }
 0xd14   : > { %v9371_v43 = vld [vmem:[#allocation4 + $0x28] sm:$0xff] }
 0xd15   : > { %v14202_v42 = vpack.i.bf16 %v9371_v43, %v16469_v33  ;;  %v16486_v37 = vpack.c.bf16 %v9371_v43, %v9368_v34 }
 0xd16   : > { %14208 = vrot.lane.b32.xlu0 %v14207_v48, %s14411_s16 }
 0xd17   : > { %14203 = vrot.lane.b32.xlu1 %v14202_v42, %s14411_s16 }
 0xd1a   : > { %14218 = vrot.lane.b32.xlu0 %v14202_v42, %s17022_s25 }
 0xd1b   : > { %14213 = vrot.lane.b32.xlu1 %v14197_v2, %s17022_s25 }
 0xd1e   : > { %14228 = vrot.lane.b32.xlu0 %v14197_v2, %s17023_s13 }
 0xd1f   : > { %14223 = vrot.lane.b32.xlu1 %v14207_v48, %s17022_s25 }
 0xd22   : > { %14238 = vrot.lane.b32.xlu0 %v14207_v48, %s17023_s13 }
 0xd23   : > { %14233 = vrot.lane.b32.xlu1 %v14202_v42, %s17023_s13 }
 0xd26   : > { %14248 = vrot.lane.b32.xlu0 %v14202_v42, %s17024_s22 }
 0xd27   : > { %14243 = vrot.lane.b32.xlu1 %v14197_v2, %s17024_s22 }
 0xd2a   : > { %14258 = vrot.lane.b32.xlu0 %v14197_v2, %s16965_s12 }
 0xd2b   : > { %14253 = vrot.lane.b32.xlu1 %v14207_v48, %s17024_s22 }
 0xd2e   : > { %14268 = vrot.lane.b32.xlu0 %v14207_v48, %s16965_s12 }
 0xd2f   : > { %14263 = vrot.lane.b32.xlu1 %v14202_v42, %s16965_s12 }
 0xd32   : > { %14278 = vrot.lane.b32.xlu0 %v14202_v42, %s16908_s30 }
 0xd33   : > { %14273 = vrot.lane.b32.xlu1 %v14197_v2, %s16908_s30 }
 0xd36   : > { %14288 = vrot.lane.b32.xlu0 %v14197_v2, %s16966_s15 }
 0xd37   : > { %14283 = vrot.lane.b32.xlu1 %v14207_v48, %s16908_s30 }
 0xd3a   : > { %14298 = vrot.lane.b32.xlu0 %v14207_v48, %s16966_s15 }
 0xd3b   : > { %14293 = vrot.lane.b32.xlu1 %v14202_v42, %s16966_s15  ;;  %s14421_s15 = smov [#allocation5]  }
 0xd3e   : > { %14308 = vrot.lane.b32.xlu0 %v14202_v42, %s16967_s29 }
 0xd3f   : > { %14303 = vrot.lane.b32.xlu1 %v14197_v2, %s16967_s29  ;;  %v9720_v2 = vld [vmem:[%s16811_s7 + $0x20] sm:$0xff] }
 0xd42   : > { %11038 = vperm.xlu0 %13430, %v9364_v32  }
 0xd43   : > { %14313 = vrot.lane.b32.xlu1 %v14207_v48, %s16967_s29 }
 0xd47   : > { %11043 = vperm.xlu1 %13551, %v9365_v36  }
 0xd84   : > { %v14199_v44 = vpop.permute.xlu0 %14198 }
 0xd85   : > { %v14201_v14 = vunpack.i.h.bf16 %v14199_v44  ;;  %v14200_v9 = vunpack.i.l.bf16 %v14199_v44 }
 0xd87   : > { %v9395_v16 = vsel %vm544_vm6, %v14200_v9, %v14201_v14 }
 0xd88   : > { %v14209_v39 = vpop.permute.xlu0 %14208 }
 0xd89   : > { %v14211_v35 = vunpack.i.h.bf16 %v14209_v39  ;;  %v14210_v27 = vunpack.i.l.bf16 %v14209_v39  ;;  %v14204_v52 = vpop.permute.xlu1 %14203 }
 0xd8a   : > { %v14206_v18 = vunpack.i.h.bf16 %v14204_v52  ;;  %v14205_v13 = vunpack.i.l.bf16 %v14204_v52 }
 0xd8b   : > { %v9394_v22 = vsel %vm544_vm6, %v14210_v27, %v14200_v9 }
 0xd8c   : > { %v9396_v54 = vsel %vm544_vm6, %v14211_v35, %v14205_v13  ;;  %v9397_v25 = vsel %vm544_vm6, %v14205_v13, %v14206_v18  ;;  %v13010_v50 = vpack.c.bf16 %v14206_v18, %v14201_v14  ;;  %v14219_v29 = vpop.permute.xlu0 %14218  ;;  %vm17026_vm6 = vmmov %vm17021_vm9 }
 0xd8d   : > { %v13008_v6 = vpack.c.bf16 %v9396_v54, %v9394_v22  ;;  %v13006_v5 = vpack.c.bf16 %v9397_v25, %v9395_v16  ;;  %v14214_v11 = vpop.permute.xlu1 %14213  ;;  %v14221_v56 = vunpack.i.h.bf16 %v14219_v29  ;;  %v14220_v31 = vunpack.i.l.bf16 %v14219_v29  ;;  %vm17027_vm4 = vmmov %vm17026_vm6  ;;  %v9908_v22 = vld [vmem:[%s16811_s7 + $0x30] sm:$0xff] }
 0xd8e   : > { %v14216_v30 = vunpack.i.h.bf16 %v14214_v11  ;;  %v14215_v46 = vunpack.i.l.bf16 %v14214_v11  ;;  %vm17028_vm9 = vmmov %vm17027_vm4 }
 0xd8f   : > { %13007 = vmatprep.subr.bf16.mxu0 %v13006_v5  ;;  %v9737_v12 = vsel %vm857_vm7, %v14220_v31, %v14221_v56  ;;  %vm17029_vm10 = vmmov %vm17027_vm4 }
 0xd90   : > { %13009 = vmatpush1.bf16.msra.mxu0 %v13008_v6  ;;  %v9735_v61 = vsel %vm857_vm7, %v14215_v46, %v14216_v30  ;;  %v14229_v23 = vpop.permute.xlu0 %14228  ;;  %vm17030_vm1 = vmmov %vm17027_vm4  ;;  %v13026_v34 = vpack.c.bf16 %v14221_v56, %v14216_v30 }
 0xd91   : > { %13011 = vmatprep.subr.bf16.mxu0 %v13010_v50  ;;  %v14224_v1 = vpop.permute.xlu1 %14223  ;;  %v13022_v63 = vpack.c.bf16 %v9737_v12, %v9735_v61  ;;  %vm17031_vm2 = vmmov %vm17030_vm1  ;;  %v14231_v20 = vunpack.i.h.bf16 %v14229_v23  ;;  %v14230_v3 = vunpack.i.l.bf16 %v14229_v23  ;;  %v10096_v12 = vld [vmem:[%s16811_s7 + $0x40] sm:$0xff] }
 0xd92   : > { %v14226_v4 = vunpack.i.h.bf16 %v14224_v1  ;;  %v14225_v26 = vunpack.i.l.bf16 %v14224_v1  ;;  %vm17032_vm14 = vmmov %vm17030_vm1 }
 0xd93   : > { %11704 = vmatmul.mubr.msk.f32.vlgmr.msra.gmra.mrb[10].mxu0 %vm17025_vm13, %v9374_v7  ;;  %vm17035_vm15 = vmmov %vm17030_vm1 }
 0xd94   : > { %13013 = vmatpush3.bf16.msra.mxu0 %v13010_v50  ;;  %9480 = vmatprep.mubr.f32.mxu0 %v14407_v0  ;;  %v9734_v38 = vsel %vm857_vm7, %v14225_v26, %v14215_v46  ;;  %v9736_v17 = vsel %vm857_vm7, %v14226_v4, %v14220_v31  ;;  %v14239_v24 = vpop.permute.xlu0 %14238  ;;  %vm17033_vm7 = vcmask 900096   ;;  %v9909_v50 = vld [vmem:[%s16811_s7 + $0x38] sm:$0xff] }
 0xd95   : > { %13015 = vmatprep.subr.bf16.mxu0 %v13014_v10  ;;  %v14234_v8 = vpop.permute.xlu1 %14233  ;;  %v13024_v10 = vpack.c.bf16 %v9736_v17, %v9734_v38  ;;  %vm17034_vm3 = vmmov %vm17033_vm7  ;;  %v14241_v48 = vunpack.i.h.bf16 %v14239_v24  ;;  %v14240_v43 = vunpack.i.l.bf16 %v14239_v24 }
 0xd96   : > { %v14236_v45 = vunpack.i.h.bf16 %v14234_v8  ;;  %v14235_v33 = vunpack.i.l.bf16 %v14234_v8  ;;  %vm17036_vm13 = vmmov %vm17034_vm3  ;;  %v10097_v8 = vld [vmem:[%s16811_s7 + $0x48] sm:$0xff] }
 0xd97   : > { %11705 = vmatmul.mubr.msk.f32.gmra.mrb[12].mxu0 %vm17026_vm6, %v9375_v60  ;;  %v9922_v44 = vsel %vm17036_vm13, %v14240_v43, %v14230_v3  ;;  %vm17037_vm6 = vmmov %vm17034_vm3 }
 0xd98   : > { %12449 = vmatprep.mubr.msk.f32.mxu0 %vm17027_vm4, %v9374_v7  ;;  %v9925_v51 = vsel %vm17033_vm7, %v14235_v33, %v14236_v45  ;;  %v14249_v32 = vpop.permute.xlu0 %14248  ;;  %v9924_v14 = vsel %vm17037_vm6, %v14241_v48, %v14235_v33  ;;  %vm17038_vm4 = vmmov %vm17030_vm1  ;;  %v13034_v18 = vpack.c.bf16 %v14236_v45, %v14231_v20 }
 0xd99   : > { %v14244_v36 = vpop.permute.xlu1 %14243  ;;  %v14251_v9 = vunpack.i.h.bf16 %v14249_v32  ;;  %v14250_v39 = vunpack.i.l.bf16 %v14249_v32  ;;  %v13032_v52 = vpack.c.bf16 %v9924_v14, %v9922_v44  ;;  %vm17047_vm13 = vmmov %vm17038_vm4 }
 0xd9a   : > { %v14246_v35 = vunpack.i.h.bf16 %v14244_v36  ;;  %v14245_v27 = vunpack.i.l.bf16 %v14244_v36  ;;  %vm17048_vm6 = vmmov %vm17038_vm4  ;;  %v10285_v36 = vld [vmem:[%s16811_s7 + $0x58] sm:$0xff] }
 0xd9b   : > { %12450 = vmatmul.mubr.msk.f32.vlgmr.msra.gmra.mrb[14].mxu0 %vm17028_vm9, %v9375_v60  ;;  %vm17039_vm9 = vmmov %vm17030_vm1 }
 0xd9c   : > { %13017 = vmatpush1.bf16.msra.mxu0 %v13016_v40  ;;  %9632 = vmatprep.mubr.f32.mxu0 %v14407_v0  ;;  %v9923_v40 = vsel %vm17034_vm3, %v14230_v3, %v14231_v20  ;;  %v14259_v7 = vpop.permute.xlu0 %14258 }
 0xd9d   : > { %13019 = vmatprep.subr.bf16.mxu0 %v16486_v37  ;;  %v13030_v42 = vpack.c.bf16 %v9925_v51, %v9923_v40  ;;  %v14254_v13 = vpop.permute.xlu1 %14253  ;;  %v14261_v30 = vunpack.i.h.bf16 %v14259_v7  ;;  %v14260_v46 = vunpack.i.l.bf16 %v14259_v7  ;;  %v10284_v40 = vld [vmem:[%s16811_s7 + $0x50] sm:$0xff] }
 0xd9e   : > { %v14256_v25 = vunpack.i.h.bf16 %v14254_v13  ;;  %v14255_v6 = vunpack.i.l.bf16 %v14254_v13 }
 0xd9f   : > { %11708 = vmatmul.mubr.msk.f32.vlgmr.msra.gmra.mrb[10].mxu0 %vm17029_vm10, %v9372_v57  ;;  %vm17040_vm10 = vmmov %vm17030_vm1 }
 0xda0   : > { %13021 = vmatpush3.bf16.msra.mxu0 %v16486_v37  ;;  %9638 = vmatprep.mubr.f32.mxu0 %v14407_v0  ;;  %v9721_v37 = vld [vmem:[%s16811_s7 + $0x28] sm:$0xff]  ;;  %v14269_v61 = vpop.permute.xlu0 %14268 }
 0xda1   : > { %13023 = vmatprep.subr.bf16.mxu0 %v13022_v63  ;;  %v14264_v60 = vpop.permute.xlu1 %14263  ;;  %v14271_v63 = vunpack.i.h.bf16 %v14269_v61 }
 0xda2   : > { %v14266_v56 = vunpack.i.h.bf16 %v14264_v60  ;;  %v14265_v31 = vunpack.i.l.bf16 %v14264_v60  ;;  %v10473_v60 = vld [vmem:[%s16811_s7 + $0x68] sm:$0xff] }
 0xda3   : > { %11709 = vmatmul.mubr.msk.f32.gmra.mrb[12].mxu0 %vm17030_vm1, %v9373_v28  ;;  %vm17041_vm1 = vcmask 891904  }
 0xda4   : > { %12456 = vmatprep.mubr.msk.f32.mxu0 %vm17031_vm2, %v9372_v57  ;;  %v10111_v54 = vsel %vm17041_vm1, %v14245_v27, %v14246_v35  ;;  %vm17042_vm2 = vmmov %vm17041_vm1  ;;  %v13042_v57 = vpack.c.bf16 %v14251_v9, %v14246_v35  ;;  %v14279_v38 = vpop.permute.xlu0 %14278 }
 0xda5   : > { %v10113_v16 = vsel %vm17042_vm2, %v14250_v39, %v14251_v9  ;;  %vm17044_vm7 = vmmov %vm17041_vm1  ;;  %v14274_v17 = vpop.permute.xlu1 %14273  ;;  %v14281_v20 = vunpack.i.h.bf16 %v14279_v38  ;;  %v14280_v3 = vunpack.i.l.bf16 %v14279_v38 }
 0xda6   : > { %v13038_v5 = vpack.c.bf16 %v10113_v16, %v10111_v54  ;;  %v10110_v29 = vsel %vm17044_vm7, %v14255_v6, %v14245_v27  ;;  %vm17045_vm3 = vmmov %vm17041_vm1  ;;  %v10472_v16 = vld [vmem:[%s16811_s7 + $0x60] sm:$0xff] }
 0xda7   : > { %12457 = vmatmul.mubr.msk.f32.vlgmr.msra.gmra.mrb[14].mxu0 %vm17032_vm14, %v9373_v28  ;;  %vm17043_vm14 = vmmov %vm17038_vm4  ;;  %v10112_v11 = vsel %vm17045_vm3, %v14256_v25, %v14250_v39  ;;  %v14270_v28 = vunpack.i.l.bf16 %v14269_v61 }
 0xda8   : > { %13025 = vmatpush1.bf16.msra.mxu0 %v13024_v10  ;;  %9814 = vmatprep.mubr.f32.mxu0 %v14407_v0  ;;  %v13040_v1 = vpack.c.bf16 %v10112_v11, %v10110_v29  ;;  %v14276_v10 = vunpack.i.h.bf16 %v14274_v17  ;;  %vm17055_vm7 = vmmov %vm17048_vm6  ;;  %v14289_v44 = vpop.permute.xlu0 %14288 }
 0xda9   : > { %13027 = vmatprep.subr.bf16.mxu0 %v13026_v34  ;;  %v14284_v51 = vpop.permute.xlu1 %14283  ;;  %vm17056_vm3 = vmmov %vm17048_vm6 }
 0xdab   : > { %11712 = vmatmul.mubr.msk.f32.vlgmr.msra.gmra.mrb[10].mxu0 %vm17035_vm15, %v9720_v2  ;;  %vm17046_vm15 = vmmov %vm17038_vm4 }
 0xdac   : > { %13029 = vmatpush3.bf16.msra.mxu0 %v13026_v34  ;;  %9820 = vmatprep.mubr.f32.mxu0 %v14407_v0  ;;  %v14275_v34 = vunpack.i.l.bf16 %v14274_v17  ;;  %v14299_v54 = vpop.permute.xlu0 %14298  ;;  %v10661_v17 = vld [vmem:[%s16811_s7 + $0x78] sm:$0xff] }
 0xdad   : > { %13031 = vmatprep.subr.bf16.mxu0 %v13030_v42  ;;  %v14286_v42 = vunpack.i.h.bf16 %v14284_v51  ;;  %v14294_v14 = vpop.permute.xlu1 %14293 }
 0xdae   : > { %v14296_v35 = vunpack.i.h.bf16 %v14294_v14  ;;  %v14295_v27 = vunpack.i.l.bf16 %v14294_v14 }
 0xdaf   : > { %11713 = vmatmul.mubr.msk.f32.gmra.mrb[12].mxu0 %vm17038_vm4, %v9721_v37  ;;  %vm17049_vm4 = vcmask 883712  }
 0xdb0   : > { %12463 = vmatprep.mubr.msk.f32.mxu0 %vm17039_vm9, %v9720_v2  ;;  %v10301_v4 = vsel %vm17049_vm4, %v14265_v31, %v14266_v56  ;;  %vm17050_vm9 = vmmov %vm17049_vm4  ;;  %v13050_v2 = vpack.c.bf16 %v14266_v56, %v14261_v30  ;;  %v14309_v29 = vpop.permute.xlu0 %14308 }
 0xdb1   : > { %v10299_v26 = vsel %vm17050_vm9, %v14260_v46, %v14261_v30  ;;  %vm17052_vm1 = vmmov %vm17049_vm4  ;;  %v14304_v11 = vpop.permute.xlu1 %14303  ;;  %v14311_v30 = vunpack.i.h.bf16 %v14309_v29 }
 0xdb2   : > { %v13046_v23 = vpack.c.bf16 %v10301_v4, %v10299_v26  ;;  %v10298_v45 = vsel %vm17052_vm1, %v14270_v28, %v14260_v46  ;;  %vm17053_vm2 = vmmov %vm17052_vm1  ;;  %v14310_v46 = vunpack.i.l.bf16 %v14309_v29  ;;  %v10660_v26 = vld [vmem:[%s16811_s7 + $0x70] sm:$0xff] }
 0xdb3   : > { %12464 = vmatmul.mubr.msk.f32.vlgmr.msra.gmra.mrb[14].mxu0 %vm17040_vm10, %v9721_v37  ;;  %vm17051_vm10 = vmmov %vm17048_vm6  ;;  %v10300_v33 = vsel %vm17053_vm2, %v14271_v63, %v14265_v31  ;;  %v14285_v37 = vunpack.i.l.bf16 %v14284_v51 }
 0xdb4   : > { %13033 = vmatpush1.bf16.msra.mxu0 %v13032_v52  ;;  %10002 = vmatprep.mubr.f32.mxu0 %v14407_v0  ;;  %v13048_v24 = vpack.c.bf16 %v10300_v33, %v10298_v45  ;;  %vm17063_vm1 = vmmov %vm17056_vm3  ;;  %v14291_v52 = vunpack.i.h.bf16 %v14289_v44 }
 0xdb5   : > { %13035 = vmatprep.subr.bf16.mxu0 %v13034_v18  ;;  %vm17064_vm2 = vmmov %vm17063_vm1  ;;  %v14314_v4 = vpop.permute.xlu1 %14313 }
 0xdb7   : > { %11716 = vmatmul.mubr.msk.f32.vlgmr.msra.gmra.mrb[10].mxu0 %vm17043_vm14, %v9908_v22  ;;  %vm17054_vm14 = vmmov %vm17048_vm6 }
 0xdb8   : > { %13037 = vmatpush3.bf16.msra.mxu0 %v13034_v18  ;;  %10008 = vmatprep.mubr.f32.mxu0 %v14407_v0  ;;  %v14290_v18 = vunpack.i.l.bf16 %v14289_v44 }
 0xdb9   : > { %13039 = vmatprep.subr.bf16.mxu0 %v13038_v5  ;;  %v14301_v5 = vunpack.i.h.bf16 %v14299_v54 }
 0xdbb   : > { %11717 = vmatmul.mubr.msk.f32.gmra.mrb[12].mxu0 %vm17046_vm15, %v9909_v50  ;;  %vm17057_vm15 = vcmask 752640  }
 0xdbc   : > { %12470 = vmatprep.mubr.msk.f32.mxu0 %vm17047_vm13, %v9908_v22  ;;  %v10487_v48 = vsel %vm17057_vm15, %v14275_v34, %v14276_v10  ;;  %vm17058_vm13 = vmmov %vm17057_vm15  ;;  %v13058_v22 = vpack.c.bf16 %v14281_v20, %v14276_v10  ;;  %v10848_v10 = vld [vmem:[%s16811_s7 + $0x80] sm:$0xff] }
 0xdbd   : > { %v10489_v43 = vsel %vm17058_vm13, %v14280_v3, %v14281_v20  ;;  %vm17060_vm4 = vmmov %vm17058_vm13 }
 0xdbe   : > { %v13054_v32 = vpack.c.bf16 %v10489_v43, %v10487_v48  ;;  %v10486_v9 = vsel %vm17060_vm4, %v14285_v37, %v14275_v34  ;;  %vm17061_vm9 = vmmov %vm17060_vm4  ;;  %v10849_v34 = vld [vmem:[%s16811_s7 + $0x88] sm:$0xff] }
 0xdbf   : > { %12471 = vmatmul.mubr.msk.f32.vlgmr.msra.gmra.mrb[14].mxu0 %vm17048_vm6, %v9909_v50  ;;  %vm17059_vm6 = vmmov %vm17056_vm3  ;;  %v10488_v39 = vsel %vm17061_vm9, %v14286_v42, %v14280_v3  ;;  %v14300_v50 = vunpack.i.l.bf16 %v14299_v54 }
 0xdc0   : > { %13041 = vmatpush1.bf16.msra.mxu0 %v13040_v1  ;;  %10190 = vmatprep.mubr.f32.mxu0 %v14407_v0  ;;  %v13056_v13 = vpack.c.bf16 %v10488_v39, %v10486_v9  ;;  %v14306_v1 = vunpack.i.h.bf16 %v14304_v11  ;;  %vm17071_vm4 = vmmov %vm17063_vm1 }
 0xdc1   : > { %13043 = vmatprep.subr.bf16.mxu0 %v13042_v57  ;;  %vm17072_vm9 = vmmov %vm17063_vm1  ;;  %v11039_v51 = vpop.permute.xlu0 %11038 }
 0xdc2   : > { %v13074_v3 = vpack.c.bf16 %v14311_v30, %v14306_v1 }
 0xdc3   : > { %11720 = vmatmul.mubr.msk.f32.vlgmr.msra.gmra.mrb[10].mxu0 %vm17051_vm10, %v10096_v12  ;;  %vm17062_vm10 = vmmov %vm17056_vm3 }
 0xdc4   : > { %13045 = vmatpush3.bf16.msra.mxu0 %v13042_v57  ;;  %10196 = vmatprep.mubr.f32.mxu0 %v14407_v0  ;;  %v14305_v57 = vunpack.i.l.bf16 %v14304_v11 }
 0xdc5   : > { %13047 = vmatprep.subr.bf16.mxu0 %v13046_v23  ;;  %v14316_v23 = vunpack.i.h.bf16 %v14314_v4 }
 0xdc7   : > { %11721 = vmatmul.mubr.msk.f32.gmra.mrb[12].mxu0 %vm17054_vm14, %v10097_v8  ;;  %vm17065_vm14 = vcmask 744448  }
 0xdc8   : > { %12477 = vmatprep.mubr.msk.f32.mxu0 %vm17055_vm7, %v10096_v12  ;;  %v10677_v25 = vsel %vm17065_vm14, %v14295_v27, %v14296_v35  ;;  %vm17066_vm7 = vmmov %vm17065_vm14  ;;  %v13066_v12 = vpack.c.bf16 %v14296_v35, %v14291_v52 }
 0xdc9   : > { %v10675_v6 = vsel %vm17066_vm7, %v14290_v18, %v14291_v52  ;;  %vm17068_vm15 = vmmov %vm17066_vm7 }
 0xdca   : > { %v13062_v7 = vpack.c.bf16 %v10677_v25, %v10675_v6  ;;  %v10674_v56 = vsel %vm17068_vm15, %v14300_v50, %v14290_v18  ;;  %vm17069_vm13 = vmmov %vm17066_vm7 }
 0xdcb   : > { %12478 = vmatmul.mubr.msk.f32.vlgmr.msra.gmra.mrb[14].mxu0 %vm17056_vm3, %v10097_v8  ;;  %vm17067_vm3 = vmmov %vm17063_vm1  ;;  %v10676_v31 = vsel %vm17069_vm13, %v14301_v5, %v14295_v27  ;;  %v14315_v8 = vunpack.i.l.bf16 %v14314_v4 }
 0xdcc   : > { %13049 = vmatpush1.bf16.msra.mxu0 %v13048_v24  ;;  %10378 = vmatprep.mubr.f32.mxu0 %v14407_v0  ;;  %v13064_v61 = vpack.c.bf16 %v10676_v31, %v10674_v56  ;;  %vm17078_vm15 = vmmov %vm17064_vm2 }
 0xdcd   : > { %13051 = vmatprep.subr.bf16.mxu0 %v13050_v2  ;;  %vm17079_vm13 = vmmov %vm17064_vm2 }
 0xdcf   : > { %11724 = vmatmul.mubr.msk.f32.vlgmr.msra.gmra.mrb[10].mxu0 %vm17059_vm6, %v10284_v40  ;;  %vm17070_vm6 = vmmov %vm17063_vm1 }
 0xdd0   : > { %13053 = vmatpush3.bf16.msra.mxu0 %v13050_v2  ;;  %10384 = vmatprep.mubr.f32.mxu0 %v14407_v0 }
 0xdd1   : > { %13055 = vmatprep.subr.bf16.mxu0 %v13054_v32 }
 0xdd3   : > { %11725 = vmatmul.mubr.msk.f32.gmra.mrb[12].mxu0 %vm17062_vm10, %v10285_v36  ;;  %vm17073_vm10 = vcmask 736256  }
 0xdd4   : > { %12484 = vmatprep.mubr.msk.f32.mxu0 %vm17063_vm1, %v10284_v40  ;;  %v10863_v63 = vsel %vm17073_vm10, %v14305_v57, %v14306_v1  ;;  %vm17074_vm1 = vmmov %vm17073_vm10  ;;  %v11044_v40 = vpop.permute.xlu1 %11043 }
 0xdd5   : > { %v10865_v28 = vsel %vm17074_vm1, %v14310_v46, %v14311_v30  ;;  %vm17075_vm14 = vmmov %vm17074_vm1 }
 0xdd6   : > { %v13070_v38 = vpack.c.bf16 %v10865_v28, %v10863_v63  ;;  %v10862_v45 = vsel %vm17075_vm14, %v14315_v8, %v14305_v57  ;;  %vm17076_vm7 = vmmov %vm17074_vm1  ;;  %vm17084_vm1 = vcmask 261120   ;;  %v11090_v28 = vld [vmem:[%s16813_s9] sm:$0xff] }
 0xdd7   : > { %12485 = vmatmul.mubr.msk.f32.vlgmr.msra.gmra.mrb[14].mxu0 %vm17064_vm2, %v10285_v36  ;;  %v10864_v33 = vsel %vm17076_vm7, %v14316_v23, %v14310_v46  ;;  %vm17083_vm10 = vmmov %vm17064_vm2  ;;  %vm17090_vm7 = vcmask 7168  }
 0xdd8   : > { %13057 = vmatpush1.bf16.msra.mxu0 %v13056_v13  ;;  %10566 = vmatprep.mubr.f32.mxu0 %v14407_v0  ;;  %v13072_v20 = vpack.c.bf16 %v10864_v33, %v10862_v45  ;;  %vm17087_vm14 = vmmov %vm17084_vm1  ;;  %v11091_v45 = vld [vmem:[%s16813_s9 + $0x8] sm:$0xff] }
 0xdd9   : > { %13059 = vmatprep.subr.bf16.mxu0 %v13058_v22 }
 0xddb   : > { %11728 = vmatmul.mubr.msk.f32.vlgmr.msra.gmra.mrb[10].mxu0 %vm17067_vm3, %v10472_v16  ;;  %vm17077_vm3 = vmmov %vm17064_vm2 }
 0xddc   : > { %13061 = vmatpush3.bf16.msra.mxu0 %v13058_v22  ;;  %10572 = vmatprep.mubr.f32.mxu0 %v14407_v0 }
 0xddd   : > { %13063 = vmatprep.subr.bf16.mxu0 %v13062_v7 }
 0xddf   : > { %11729 = vmatmul.mubr.msk.f32.gmra.mrb[12].mxu0 %vm17070_vm6, %v10473_v60  ;;  %vm17080_vm6 = vmmov %vm17064_vm2 }
 0xde0   : > { %12491 = vmatprep.mubr.msk.f32.mxu0 %vm17071_vm4, %v10472_v16  ;;  %vm17081_vm4 = vmmov %vm17064_vm2 }
 0xde3   : > { %12492 = vmatmul.mubr.msk.f32.vlgmr.msra.gmra.mrb[14].mxu0 %vm17072_vm9, %v10473_v60  ;;  %vm17082_vm9 = vmmov %vm17064_vm2 }
 0xde4   : > { %13065 = vmatpush1.bf16.msra.mxu0 %v13064_v61  ;;  %10754 = vmatprep.mubr.f32.mxu0 %v14407_v0 }
 0xde5   : > { %13067 = vmatprep.subr.bf16.mxu0 %v13066_v12 }
 0xde7   : > { %11732 = vmatmul.mubr.msk.f32.vlgmr.msra.gmra.mrb[10].mxu0 %vm17064_vm2, %v10660_v26  ;;  %vm17086_vm2 = vmmov %vm17084_vm1 }
 0xde8   : > { %13069 = vmatpush3.bf16.msra.mxu0 %v13066_v12  ;;  %10760 = vmatprep.mubr.f32.mxu0 %v14407_v0 }
 0xde9   : > { %13071 = vmatprep.subr.bf16.mxu0 %v13070_v38 }
 0xdeb   : > { %11733 = vmatmul.mubr.msk.f32.gmra.mrb[12].mxu0 %vm17077_vm3, %v10661_v17 }
 0xdec   : > { %12498 = vmatprep.mubr.msk.f32.mxu0 %vm17078_vm15, %v10660_v26  ;;  %v11089_v26 = vld [vmem:[%s16812_s8] sm:$0x1] }
 0xdef   : > { %12499 = vmatmul.mubr.msk.f32.vlgmr.msra.gmra.mrb[14].mxu0 %vm17079_vm13, %v10661_v17 }
 0xdf0   : > { %13073 = vmatpush1.bf16.msra.mxu0 %v13072_v20  ;;  %10942 = vmatprep.mubr.f32.mxu0 %v14407_v0 }
 0xdf1   : > { %13075 = vmatprep.subr.bf16.mxu0 %v13074_v3 }
 0xdf3   : > { %11736 = vmatmul.mubr.msk.f32.vlgmr.msra.gmra.mrb[10].mxu0 %vm17080_vm6, %v10848_v10  ;;  %vm17094_vm6 = vmmov %vm17084_vm1 }
 0xdf4   : > { %13077 = vmatpush3.bf16.msra.mxu0 %v13074_v3  ;;  %10948 = vmatprep.mubr.f32.mxu0 %v14407_v0 }
 0xdf7   : > { %11737 = vmatmul.mubr.msk.f32.gmra.mrb[12].mxu0 %vm17081_vm4, %v10849_v34  ;;  %vm17095_vm4 = vcmask 891904  }
 0xdf8   : > { %12505 = vmatprep.mubr.msk.f32.mxu0 %vm17082_vm9, %v10848_v10 }
 0xdfb   : > { %12506 = vmatmul.mubr.msk.f32.vlgmr.msra.gmra.mrb[14].mxu0 %vm17083_vm10, %v10849_v34 }
 0xec6   : > { %v10944_v24 = vpop.f32.mrb[10].mxu0 }
 0xec7   : > { %v10946_v2 = vpop.f32.mrb[11].mxu0  ;;  %v11046_v43 = vadd.f32 %v11039_v51, %v10944_v24 }
 0xec8   : > { %v11047_v42 = vadd.f32 %v11039_v51, %v10946_v2 }
 0xec9   : > { %v16671_v39 = vmul.f32 %v14850_v53, %v11046_v43  ;;  %v11073_v13 = vsel %vm14843_vm11, %v11046_v43, -3.4028235e+38 }
 0xeca   : > { %v10950_v48 = vpop.f32.mrb[12].mxu0  ;;  %v16674_v35 = vmul.f32 %v14862_v58, %v11047_v42  ;;  %v11074_v19 = vsel %vm14854_vm12, %v11047_v42, -3.4028235e+38 }
 0xecb   : > { %v11049_v37 = vadd.f32 %v11044_v40, %v10950_v48  ;;  %v10952_v32 = vpop.f32.mrb[13].mxu0 }
 0xecc   : > { %v11050_v36 = vadd.f32 %v11044_v40, %v10952_v32  ;;  %v11058_v49 = vadd.f32 %v16674_v35, %v16671_v39 }
 0xecd   : > { %v16665_v44 = vmul.f32 %v14850_v53, %v11049_v37  ;;  %v11076_v22 = vsel %vm14843_vm11, %v11049_v37, -3.4028235e+38  ;;  %vm17085_vm11 = vmmov %vm17084_vm1 }
 0xece   : > { %v16668_v14 = vmul.f32 %v14862_v58, %v11050_v36  ;;  %v12507_v9 = vpop.f32.mrb[14].mxu0  ;;  %v11077_v60 = vsel %vm14854_vm12, %v11050_v36, -3.4028235e+38  ;;  %vm17089_vm12 = vmmov %vm17077_vm3 }
 0xecf   : > { %v11051_v27 = vadd.f32 %v12507_v9, %v11044_v40  ;;  %v11021_v52 = vpop.f32.mrb[15].mxu0 }
 0xed0   : > { %v11048_v18 = vadd.f32 %v11039_v51, %v11021_v52  ;;  %v11063_v53 = vadd.f32 %v16668_v14, %v16665_v44  ;;  %v14335_v52 = vld [vmem:[#allocation2 + $0x18] sm:$0xff] }
 0xed1   : > { %v16681_v54 = vmul.f32 %v14830_v21, %v11051_v27  ;;  %v11078_v16 = vsel %vm14822_vm8, %v11051_v27, -3.4028235e+38 }
 0xed2   : > { %v11084_v58 = vsel %vm17084_vm1, %v11078_v16, -inf  ;;  %v16689_v25 = vmul.f32 %v14830_v21, %v11048_v18  ;;  %v11075_v6 = vsel %vm14822_vm8, %v11048_v18, -3.4028235e+38  ;;  %vm17088_vm8 = vmmov %vm17077_vm3  ;;  %vm11243_vm3 = vcmask 1040384   ;;  %v14336_v16 = vld [vmem:[#allocation2] sm:$0xff] }
 0xed3   : > { %v11064_v5 = vsel %vm17085_vm11, %v16681_v54, 0.0  ;;  %v11085_v50 = vmax.f32 %v11076_v22, %v11084_v58  ;;  %v11079_v7 = vsel %vm17086_vm2, %v11075_v6, -inf  ;;  %v11421_v18 = vadd.f32 %v14335_v52, %v16231_v59  ;;  %v14339_v6 = vld [vmem:[#allocation2 + $0x10] sm:$0xff] }
 0xed4   : > { %v11059_v29 = vsel %vm17087_vm14, %v16689_v25, 0.0  ;;  %v11080_v21 = vmax.f32 %v11073_v13, %v11079_v7  ;;  %v11065_v11 = vadd.f32 %v11064_v5, %v11063_v53 }
 0xed5   : > { %v11060_v56 = vadd.f32 %v11059_v29, %v11058_v49  ;;  %v11086_v31 = vmax.f32 %v11085_v50, %v11077_v60  ;;  %v11420_v49 = vadd.f32 %v14339_v6, %v16238_v47 }
 0xed6   : > { %11066 = vadd.xlane.f32.xlu1 %v11065_v11  ;;  %v11081_v30 = vmax.f32 %v11080_v21, %v11074_v19  ;;  %v14340_v21 = vld [vmem:[#allocation2 + $0x20] sm:$0xff]  ;;  %v14341_v11 = vld [vmem:[#allocation3 + $0x20] sm:$0xff] }
 0xed7   : > { %11061 = vadd.xlane.f32.xlu0 %v11060_v56  ;;  %v11422_v19 = vadd.f32 %v14341_v11, %v14340_v21  ;;  %v14342_v56 = vld [vmem:[#allocation2 + $0x28] sm:$0xff] }
 0xedb   : > { %11082 = vmax.xlane.f32.xlu0 %v11081_v30 }
 0xedf   : > { %11087 = vmax.xlane.f32.xlu0 %v11086_v31  ;;  %v11423_v31 = vadd.f32 %v14342_v56, %v16251_v62 }
 0xf63   : > { %v11067_v46 = vpop.xlane.xlu1 %11066 }
 0xf64   : > { %v11069_v1 = vmul.f32 0.00390625, %v11067_v46  ;;  %v11062_v57 = vpop.xlane.xlu0 %11061 }
 0xf65   : > { %v11068_v61 = vmul.f32 0.00390625, %v11062_v57 }
 0xf67   : > { %v13079_v12 = vpack.c.bf16 %v11069_v1, %v11068_v61 }
 0xf68   : > { %v11083_v4 = vpop.xlane.xlu0 %11082 }
 0xf69   : > { %13080 = vmatpush3.bf16.msra.mxu1 %v13079_v12 }
 0xf6a   : > { %13081 = vmatprep.subr.bf16.mxu1 %v14409_v15 }
 0xf6c   : > { %v11088_v55 = vpop.xlane.xlu0 %11087  ;;  %12513 = vmatmul.mubr.msk.f32.vlgmr.msra.gmra.mrb[86].mxu1 %vm17088_vm8, %v11089_v26 }
 0xf6d   : > { %v13082_v63 = vpack.c.bf16 %v11088_v55, %v11083_v4  ;;  %12519 = vmatprep.mubr.msk.f32.mxu1 %vm14410_vm5, %v14407_v0  ;;  %vm17091_vm5 = vmmov %vm17090_vm7 }
 0xf6e   : > { %vm17092_vm15 = vmmov %vm17091_vm5 }
 0xf6f   : > { %13083 = vmatpush3.bf16.msra.mxu1 %v13082_v63  ;;  %vm17093_vm13 = vmmov %vm17091_vm5 }
 0xf72   : > { %12520 = vmatmul.mubr.msk.f32.vlgmr.msra.gmra.mrb[88].mxu1 %vm17089_vm12, %v11089_v26 }
 0xf73   : > { %12524 = vmatprep.mubr.msk.f32.mxu1 %vm17090_vm7, %v11090_v28 }
0x103f   : > { %v11161_v23 = vpop.f32.mrb[86].mxu1 }
0x1040   : > { %v12514_v8 = vpop.f32.mrb[87].mxu1  ;;  %v11165_v0 = vmax.f32 %v11161_v23, 0.0 }
0x1045   : > { %v11232_v38 = vpop.f32.mrb[88].mxu1 }
0x1046   : > { %v11236_v15 = vmax.f32 %v11232_v38, 0.0  ;;  %v12521_v17 = vpop.f32.mrb[89].mxu1 }
0x1048   : > { %12522 = vmatprep.subr.msk.mxu1 %vm11243_vm3, %v11236_v15 }
0x1049   : > { %12523 = vmatpush3.msk.msra.mxu1 %vm11243_vm3, %v11236_v15 }
0x104a   : > { %12525 = vmatmul.mubr.msk.f32.vlgmr.msra.gmra.mrb[90].mxu1 %vm17091_vm5, %v11091_v45  ;;  %12527 = vmatprep.subr.msk.mxu1 %vm11243_vm3, %v11165_v0 }
0x104b   : > { %12528 = vmatpush3.msk.msra.mxu1 %vm11243_vm3, %v11165_v0  ;;  %12529 = vmatprep.mubr.msk.f32.mxu1 %vm17092_vm15, %v11090_v28 }
0x1052   : > { %12530 = vmatmul.mubr.msk.f32.vlgmr.msra.gmra.mrb[90].mxu1 %vm17093_vm13, %v11091_v45 }
0x1125   : > { %v12531_v33 = vpop.f32.mrb[90].mxu1 }
0x1126   : > { %v11749_v20 = vmul.f32 -1.442695, %v12531_v33  ;;  %v11391_v3 = vpop.f32.mrb[91].mxu1 }
0x1127   : > { %v11748_v10 = vmul.f32 -1.442695, %v11391_v3 }
0x1128   : > { %14317 = vpow2.f32 %v11749_v20 }
0x1129   : > { %14319 = vpow2.f32 %v11748_v10 }
0x1132   : > { %v14318_v34 = vpop.eup %14317 }
0x1133   : > { %v14320_v24 = vpop.eup %14319  ;;  %v11407_v2 = vadd.f32 1.0, %v14318_v34 }
0x1134   : > { %v11406_v51 = vadd.f32 1.0, %v14320_v24 }
0x1135   : > { %14321 = vrcp.f32 %v11407_v2 }
0x1136   : > { %14323 = vrcp.f32 %v11406_v51 }
0x113f   : > { %v14322_v40 = vpop.eup %14321 }
0x1140   : > { %v14324_v48 = vpop.eup %14323  ;;  %11431 = vperm.xlu0 %13430, %v14322_v40  }
0x1141   : > { %11426 = vperm.xlu1 %13551, %v14324_v48  }
0x11bf   : > { %v11432_v43 = vpop.permute.xlu0 %11431 }
0x11c0   : > { %v11437_v42 = vmul.f32 %v11432_v43, %v16665_v44  ;;  %v11427_v37 = vpop.permute.xlu1 %11426  ;;  %v11438_v9 = vmul.f32 %v11432_v43, %v16668_v14  ;;  %v11439_v44 = vmul.f32 %v11432_v43, %v16681_v54  ;;  %v11418_v14 = vadd.f32 %v14336_v16, %v16222_v41 }
0x11c1   : > { %v11436_v32 = vmul.f32 %v11427_v37, %v16689_v25  ;;  %v11434_v36 = vmul.f32 %v11427_v37, %v16671_v39  ;;  %v11435_v27 = vmul.f32 %v11427_v37, %v16674_v35  ;;  %v14337_v35 = vld [vmem:[#allocation2 + $0x8] sm:$0xff]  ;;  %v14338_v25 = vld [vmem:[#allocation3 + $0x8] sm:$0xff] }
0x11c2   : > { %11452 = vrot.lane.b32.xlu1 %v11437_v42, %s16871_s14  ;;  %v11419_v54 = vadd.f32 %v14338_v25, %v14337_v35 }
0x11c3   : > { %11450 = vrot.lane.b32.xlu0 %v11436_v32, %s16871_s14 }
0x11c6   : > { %11446 = vrot.lane.b32.xlu1 %v11434_v36, %s16871_s14 }
0x11c7   : > { %11454 = vrot.lane.b32.xlu0 %v11438_v9, %s16871_s14 }
0x11ca   : > { %11448 = vrot.lane.b32.xlu1 %v11435_v27, %s16871_s14 }
0x11ce   : > { %11456 = vrot.lane.b32.xlu1 %v11439_v44, %s16871_s14  ;;  %s377_s14 = sand.u32 1, %s14397_s18  }
0x11cf   : > { %s13246_s29 = smul.u32 48, %s377_s14  ;;  %s16763_s25 = scalar_lea.sflag [#allocation6], %s377_s14 }
0x11d1   : > { %s379_s13 = scalar_lea.vmem [#allocation5], %s13246_s29  ;;  %s14347_s29 = sshll.u32 %s14421_s15, 4  ;;  %s14348_s29 = int_to_ptr.vmem [resolvable:$false] %s14347_s29 }
0x11d2   : > { %s11522_s16 = sshll.u32 %s379_s13, 4  ;;  %s14349_s24 = scalar_lea.vmem %s14348_s29, 1536  ;;  %s16753_s16 = int_to_ptr.vmem [resolvable:$true] %s11522_s16 }
0x11d3   : > { %s14343_s30 = scalar_lea.vmem %s16753_s16, 768  ;;  %p14350_p0 = scmp.lt.s32.totalorder %s16753_s16, %s14348_s29 }
0x11d4   : > { %p14344_p11 = scmp.ne.s32.totalorder %s16753_s16, %s14343_s30  ;;  %p14351_p1 = scmp.lt.s32.totalorder %s14349_s24, %s14343_s30 }
0x11d6   : > { %p14345_p12 = pnand %p14344_p11, %p14522_p5  ;;  %p14352_p2 = por %p14351_p1, %p14350_p0 }
0x11d8   : > { %p14346_p13 = pneg %p14345_p12 }
0x11da   : > { %p14353_p3 = pnand %p14352_p2, %p14346_p13 }
0x1234   : > { %v11453_v13 = vpop.permute.xlu1 %11452 }
0x1235   : > { %v11471_v22 = vadd.f32 %v11453_v13, %v11421_v18  ;;  %v11451_v39 = vpop.permute.xlu0 %11450 }
0x1237   : > { %11486 = vrot.lane.b32.xlu1 %v11471_v22, %s17024_s22 }
0x1238   : > { %v11447_v53 = vpop.permute.xlu1 %11446 }
0x1239   : > { %v11468_v58 = vadd.f32 %v11447_v53, %v11418_v14  ;;  %v11455_v5 = vpop.permute.xlu0 %11454 }
0x123a   : > { %v11460_v29 = vsel %vm385_vm0, %v11453_v13, %v11455_v5 }
0x123b   : > { %11480 = vrot.lane.b32.xlu0 %v11468_v58, %s17024_s22  ;;  %v11472_v46 = vadd.f32 %v11460_v29, %v11422_v19 }
0x123c   : > { %v11449_v59 = vpop.permute.xlu1 %11448 }
0x123d   : > { %v11458_v50 = vsel %vm385_vm0, %v11447_v53, %v11449_v59  ;;  %v11459_v7 = vsel %vm385_vm0, %v11449_v59, %v11451_v39 }
0x123e   : > { %v11469_v60 = vadd.f32 %v11458_v50, %v11419_v54  ;;  %v11470_v41 = vadd.f32 %v11459_v7, %v11420_v49 }
0x1240   : > { %11484 = vrot.lane.b32.xlu0 %v11470_v41, %s17024_s22  ;;  %11482 = vrot.lane.b32.xlu1 %v11469_v60, %s17024_s22  ;;  %v11457_v47 = vpop.permute.xlu1 %11456 }
0x1241   : > { %v11461_v30 = vsel %vm385_vm0, %v11455_v5, %v11457_v47  ;;  %vm17096_vm0 = vmmov %vm17095_vm4 }
0x1242   : > { %v11473_v1 = vadd.f32 %v11461_v30, %v11423_v31  ;;  %vm17097_vm9 = vmmov %vm17096_vm0 }
0x1243   : > { %vm17098_vm10 = vmmov %vm17096_vm0 }
0x1244   : > { %11488 = vrot.lane.b32.xlu0 %v11472_v46, %s17024_s22  ;;  %11490 = vrot.lane.b32.xlu1 %v11473_v1, %s17024_s22 }
0x12a9   : > { %v11487_v61 = vpop.permute.xlu1 %11486 }
0x12ad   : > { %v11481_v57 = vpop.permute.xlu0 %11480 }
0x12b2   : > { %v11485_v12 = vpop.permute.xlu0 %11484  ;;  %v11483_v62 = vpop.permute.xlu1 %11482 }
0x12b3   : > { %11504 = vst.msk [vmem:[%s379_s13 + $0x10] sm:$0xff] %vm17094_vm6, %v11485_v12  ;;  %v11492_v4 = vsel %vm17095_vm4, %v11481_v57, %v11483_v62  ;;  %v11493_v26 = vsel %vm17096_vm0, %v11483_v62, %v11485_v12 }
0x12b4   : > { %11502 = vst [vmem:[%s379_s13] sm:$0xff] %v11492_v4  ;;  %11503 = vst [vmem:[%s379_s13 + $0x8] sm:$0xff] %v11493_v26 }
0x12b6   : > { %v11489_v55 = vpop.permute.xlu0 %11488  ;;  %v11491_v63 = vpop.permute.xlu1 %11490 }
0x12b7   : > { %v11494_v28 = vsel %vm17097_vm9, %v11487_v61, %v11489_v55  ;;  %v11495_v23 = vsel %vm17098_vm10, %v11489_v55, %v11491_v63  ;;  %11507 = vst.msk [vmem:[%s379_s13 + $0x28] sm:$0xff] %vm17084_vm1, %v11491_v63 }
0x12b8   : > { %11505 = vst [vmem:[%s379_s13 + $0x18] sm:$0xff] %v11494_v28  ;;  %11506 = vst [vmem:[%s379_s13 + $0x20] sm:$0xff] %v11495_v23 }
0x12b9   : > { %14356 = shalt.err (!%p14353_p3)
}
0x12ba   : > { %s14357_s14 = scalar_lea.hbm %s16758_s21, 768  ;;  %s14361_s12 = scalar_lea.hbm %s16815_s11, 1536 }
0x12bb   : > { %p14358_p4 = scmp.ne.s32.totalorder %s16758_s21, %s14357_s14  ;;  %p14362_p9 = scmp.lt.u32.totalorder %s16758_s21, %s16815_s11 }
0x12bc   : > { %p14363_p10 = scmp.lt.u32.totalorder %s14361_s12, %s14357_s14  ;;  %p14365_p12 = scmp.lt.u32.totalorder %s14357_s14, %s16758_s21 }
0x12bd   : > { %p14359_p7 = pnand %p14358_p4, %p14522_p5 }
0x12be   : > { %p14364_p11 = por %p14363_p10, %p14362_p9 }
0x12bf   : > { %p14360_p8 = pneg %p14359_p7 }
0x12c0   : > { %p14366_p13 = por %p14365_p12, %p14364_p11 }
0x12c2   : > { %p14367_p0 = pnand %p14366_p13, %p14360_p8 }
0x12c4   : > { %14370 = shalt.err (!%p14367_p0)
}
0x12c5   : > { %s14422_s30 = smov 384   ;;  %s14423_s24 = smov 24  }
0x12c6   : > { %13255 = dma.vmem_to_hbm [thread:$0]  (%p14522_p5), %s16753_s16, 768, %s16758_s21, %s16763_s25, %s14422_s30, %s14422_s30, %s14423_s24  }
0x12c7 PF: > { %p13261_p1 = scmp.ge.s32.totalorder %s14405_s20, 2  ;;  %s11537_s13 = sand.u32 1, %s14393_s17  }
0x12c8   : > { %s11538_s14 = scalar_lea.sflag [#allocation6], %s11537_s13 }
0x12c9   : > { %p13258_p2 = pnand %p13261_p1, %p14526_p6 }
0x12cb   : > { %14388 = dma.done.wait (!%p13258_p2), %s11538_s14, 768  }
0x12cc   : > { %14390 = vsyncadd (!%p13258_p2), %s11538_s14, 4294966528  ;;  %p21_p3 = scmp.ge.s32.totalorder %s14509_s23, 4   ;;  %s17099_s17 = smov %s14397_s18 }
0x12cd   : > { %s17100_s18 = smov %s14401_s19  ;;  %s17101_s19 = smov %s14520_s26 }
0x12ce   : > { %s17102_s20 = smov %s14509_s23  ;;  %23 = sbr.rel (!%p21_p3) target bundleno = 3 (0x3), region = 99 }
0x12d5   :  { %11543 = vsyncpa [#allocation6], 1 }
0x12d6   :  { %11545 = vsyncpa [#allocation6 + $0x1], 1 }

</bundles_post_ra>
